<compile_context>
chip_gen: v5e
topology: v5e:2x2
jax: 0.10.0
libtpu: 0.0.40
codegen_flags: <defaults>
</compile_context>

<pallas_src>
import functools
import math

import jax
import jax.numpy as jnp
from jax.experimental import pallas as pl
from jax.experimental.pallas import tpu as pltpu


# -----------------------------------------------------------------------------
# Fused Fire kernel: one grid step == Nb batch images.
# -----------------------------------------------------------------------------
def _fire_kernel(x_ref, ws_ref, bs_ref, wc_ref, bc_ref, out_ref,
                 spad_ref, patch_ref, *, H, W, Sq, E):
    Nb = x_ref.shape[0]
    Cin = x_ref.shape[2]
    M = H * W

    # ---- squeeze: 1x1 conv + ReLU (bf16 operands, f32 accumulation) ----------
    x = x_ref[...].reshape(Nb * M, Cin)                       # free reshape
    s = jnp.dot(x, ws_ref[...], preferred_element_type=jnp.float32)
    s = jnp.maximum(s + bs_ref[...], 0.0).astype(jnp.bfloat16)   # (Nb*M, Sq)

    # ---- padded squeeze activation in VMEM: zero ONLY the 1-px border --------
    # (interior is fully overwritten every step, so no full-scratch memset)
    zrow = jnp.zeros((Nb, 1, W + 2, Sq), jnp.bfloat16)
    zcol = jnp.zeros((Nb, H, 1, Sq), jnp.bfloat16)
    spad_ref[:, pl.ds(0, 1), :, :] = zrow
    spad_ref[:, pl.ds(H + 1, 1), :, :] = zrow
    spad_ref[:, pl.ds(1, H), pl.ds(0, 1), :] = zcol
    spad_ref[:, pl.ds(1, H), pl.ds(W + 1, 1), :] = zcol
    spad_ref[:, pl.ds(1, H), pl.ds(1, W), :] = s.reshape(Nb, H, W, Sq)

    # ---- im2col patches via 9 sliced stores (no in-register concat) ----------
    for dy in range(3):
        for dx in range(3):
            t = dy * 3 + dx
            win = spad_ref[:, pl.ds(dy, H), pl.ds(dx, W), :]   # (Nb, H, W, Sq)
            patch_ref[:, pl.ds(t * Sq, Sq)] = win.reshape(Nb * M, Sq)

    # ---- combined [expand1x1 | expand3x3] matmul + bias + ReLU ----------------
    y = jnp.dot(patch_ref[...], wc_ref[...],
                preferred_element_type=jnp.float32)            # (Nb*M, E) f32
    y = jnp.maximum(y + bc_ref[...], 0.0)

    # lane-dense bf16 store, already channel-concatenated [e1 | e3]
    out_ref[...] = y.astype(jnp.bfloat16).reshape(Nb, M, E)


# -----------------------------------------------------------------------------
# Batch-tile selection: biggest Nb that fits a conservative VMEM budget while
# keeping >= 2 grid steps when N >= 2 (v7x megacore / pipelining).
# -----------------------------------------------------------------------------
def _pick_batch_tile(N, H, W, Cin, Sq, E, budget_bytes=8 * 1024 * 1024):
    M = H * W
    lanes = 128
    spad = (H + 2) * (-(-(W + 2) // 16) * 16) * lanes * 2      # Sq lane-padded
    patch = M * (-(-(9 * Sq) // lanes) * lanes) * 2
    per_image = (2 * M * Cin * 2          # double-buffered bf16 input
                 + 2 * M * E * 2          # double-buffered bf16 output
                 + spad + patch
                 + M * (Sq + E) * 4)      # f32 matmul results
    best = 1
    for nb in range(1, N + 1):
        if N % nb:
            continue
        if nb * per_image > budget_bytes:
            continue
        if N >= 2 and (N // nb) < 2:
            continue
        best = nb
    return best


# -----------------------------------------------------------------------------
# Parameter preparation (weight fusion) + wrappers
# -----------------------------------------------------------------------------
def prepare_fire_params(params):
    """Fuse expand1x1 into the expand3x3 weight; cast to MXU-friendly layouts."""
    sw, sb = params['squeeze']        # (Sq, Cin, 1, 1), (Sq,)
    w1, b1 = params['expand1x1']      # (E1, Sq, 1, 1), (E1,)
    w3, b3 = params['expand3x3']      # (E3, Sq, 3, 3), (E3,)
    Sq, Cin = sw.shape[0], sw.shape[1]
    E1, E3 = w1.shape[0], w3.shape[0]

    ws = jnp.transpose(sw.reshape(Sq, Cin)).astype(jnp.bfloat16)        # (Cin, Sq)
    w1m = jnp.transpose(w1.reshape(E1, Sq)).astype(jnp.bfloat16)        # (Sq, E1)
    # (E3,Sq,3,3) -> (ky,kx,Sq,E3) -> (9*Sq, E3); row = (dy*3+dx)*Sq + c
    w3m = jnp.transpose(w3, (2, 3, 1, 0)).reshape(9 * Sq, E3).astype(jnp.bfloat16)

    wc = jnp.zeros((9 * Sq, E1 + E3), jnp.bfloat16)
    wc = wc.at[4 * Sq:5 * Sq, :E1].set(w1m)   # 1x1 path lives on the center tap
    wc = wc.at[:, E1:].set(w3m)
    bc = jnp.concatenate([b1, b3]).reshape(1, E1 + E3).astype(jnp.float32)
    bs = sb.reshape(1, Sq).astype(jnp.float32)
    return ws, bs, wc, bc


def fire_pallas_flat(x_flat, ws, bs, wc, bc, *, H, W, block_n=None):
    """Trunk-friendly entry point: x_flat (N, H*W, Cin) bf16 -> (N, H*W, E1+E3) bf16."""
    N, M, Cin = x_flat.shape
    Sq = ws.shape[1]
    E = wc.shape[1]
    Nb = block_n if block_n is not None else _pick_batch_tile(N, H, W, Cin, Sq, E)
    assert N % Nb == 0

    kernel = functools.partial(_fire_kernel, H=H, W=W, Sq=Sq, E=E)
    return pl.pallas_call(
        kernel,
        out_shape=jax.ShapeDtypeStruct((N, M, E), jnp.bfloat16),
        grid=(N // Nb,),
        in_specs=[
            pl.BlockSpec((Nb, M, Cin), lambda n: (n, 0, 0)),
            pl.BlockSpec((Cin, Sq), lambda n: (0, 0)),
            pl.BlockSpec((1, Sq), lambda n: (0, 0)),
            pl.BlockSpec((9 * Sq, E), lambda n: (0, 0)),
            pl.BlockSpec((1, E), lambda n: (0, 0)),
        ],
        out_specs=pl.BlockSpec((Nb, M, E), lambda n: (n, 0, 0)),
        scratch_shapes=[
            pltpu.VMEM((Nb, H + 2, W + 2, Sq), jnp.bfloat16),   # padded squeeze act
            pltpu.VMEM((Nb * M, 9 * Sq), jnp.bfloat16),         # im2col patches
        ],
        compiler_params=pltpu.CompilerParams(
            dimension_semantics=("parallel",),
            vmem_limit_bytes=32 * 1024 * 1024),
    )(x_flat, ws, bs, wc, bc)


def fire_pallas(x_nchw, params):
    """PyTorch-interface Fire forward: (N, Cin, H, W) f32 -> (N, E1+E3, H, W) f32."""
    N, Cin, H, W = x_nchw.shape
    ws, bs, wc, bc = prepare_fire_params(params)
    x_flat = jnp.transpose(x_nchw, (0, 2, 3, 1)).reshape(N, H * W, Cin)
    x_flat = x_flat.astype(jnp.bfloat16)
    out_flat = fire_pallas_flat(x_flat, ws, bs, wc, bc, H=H, W=W)
    E = out_flat.shape[-1]
    out = jnp.transpose(out_flat.reshape(N, H, W, E), (0, 3, 1, 2))
    return out.astype(jnp.float32)


# -----------------------------------------------------------------------------
# Parameter init (mirrors PyTorch Conv2d default init) and a pure-JAX reference
# -----------------------------------------------------------------------------
def init_fire_params(key, inplanes, squeeze_planes, e1_planes, e3_planes):
    def conv_init(k, cout, cin, ksz):
        fan_in = cin * ksz * ksz
        bound = 1.0 / math.sqrt(fan_in)
        kw, kb = jax.random.split(k)
        w = jax.random.uniform(kw, (cout, cin, ksz, ksz), jnp.float32, -bound, bound)
        b = jax.random.uniform(kb, (cout,), jnp.float32, -bound, bound)
        return w, b
    k1, k2, k3 = jax.random.split(key, 3)
    return {
        'squeeze':   conv_init(k1, squeeze_planes, inplanes, 1),
        'expand1x1': conv_init(k2, e1_planes, squeeze_planes, 1),
        'expand3x3': conv_init(k3, e3_planes, squeeze_planes, 3),
    }


def fire_reference(x_nchw, params):
    """Pure-JAX reference mirroring the kernel precision (bf16 ops, f32 accum)."""
    def conv(x, w, b, pad):
        xb = x.astype(jnp.bfloat16).astype(jnp.float32)
        wb = w.astype(jnp.bfloat16).astype(jnp.float32)
        y = jax.lax.conv_general_dilated(
            xb, wb, window_strides=(1, 1), padding=[(pad, pad), (pad, pad)],
            dimension_numbers=('NCHW', 'OIHW', 'NCHW'))
        return jnp.maximum(y + b[None, :, None, None], 0.0)

    sw, sb = params['squeeze']
    w1, b1 = params['expand1x1']
    w3, b3 = params['expand3x3']
    s = conv(x_nchw, sw, sb, 0).astype(jnp.bfloat16).astype(jnp.float32)
    e1 = conv(s, w1, b1, 0)
    e3 = conv(s, w3, b3, 1)
    return jnp.concatenate([e1, e3], axis=1)


# -----------------------------------------------------------------------------
if __name__ == "__main__":
    key = jax.random.PRNGKey(0)
    kx, kp = jax.random.split(key)

    # Canonical first Fire block (fire2) at a small spatial size.
    N, Cin, H, W = 2, 96, 16, 16
    Sq, E1, E3 = 16, 64, 64

    x = jax.random.normal(kx, (N, Cin, H, W), jnp.float32)
    params = init_fire_params(kp, Cin, Sq, E1, E3)

    fwd = jax.jit(fire_pallas)
    out = jax.block_until_ready(fwd(x, params))
    assert out.shape == (N, E1 + E3, H, W) and out.dtype == jnp.float32

    ref = jax.block_until_ready(fire_reference(x, params))
    max_err = float(jnp.max(jnp.abs(out - ref)))
    assert max_err < 5e-2, f"max abs error too large: {max_err}"

    print("KERNEL_OK")
</pallas_src>

<mosaic_0001>
module attributes {stable_mosaic.version = 11 : i64} {
  func.func @_fire_kernel(%arg0: i32, %arg1: memref<1x256x96xbf16, #tpu.memory_space<vmem>>, %arg2: memref<96x16xbf16, #tpu.memory_space<vmem>>, %arg3: memref<1x16xf32, #tpu.memory_space<vmem>>, %arg4: memref<144x128xbf16, #tpu.memory_space<vmem>>, %arg5: memref<1x128xf32, #tpu.memory_space<vmem>>, %arg6: memref<1x256x128xbf16, #tpu.memory_space<vmem>>, %arg7: memref<1x18x18x16xbf16, #tpu.memory_space<vmem>>, %arg8: memref<256x144xbf16, #tpu.memory_space<vmem>>) attributes {dimension_semantics = [#tpu.dimension_semantics<parallel>], iteration_bounds = array<i64: 2>, scalar_prefetch = 0 : i64, scratch_operands = 2 : i64, tpu.core_type = #tpu.core_type<tc>, window_params = [{transform_indices = @transform_0, window_bounds = array<i64: 1, 256, 96>}, {pipeline_mode = #tpu.pipeline_mode<synchronous>, transform_indices = @transform_1, window_bounds = array<i64: 96, 16>}, {pipeline_mode = #tpu.pipeline_mode<synchronous>, transform_indices = @transform_2, window_bounds = array<i64: 1, 16>}, {pipeline_mode = #tpu.pipeline_mode<synchronous>, transform_indices = @transform_3, window_bounds = array<i64: 144, 128>}, {pipeline_mode = #tpu.pipeline_mode<synchronous>, transform_indices = @transform_4, window_bounds = array<i64: 1, 128>}, {transform_indices = @transform_5, window_bounds = array<i64: 1, 256, 128>}]} {
    %c0 = arith.constant 0 : index
    %c0_0 = arith.constant 0 : index
    %c0_1 = arith.constant 0 : index
    %0 = vector.load %arg1[%c0, %c0_0, %c0_1] : memref<1x256x96xbf16, #tpu.memory_space<vmem>>, vector<1x256x96xbf16>
    %1 = vector.shape_cast %0 : vector<1x256x96xbf16> to vector<256x96xbf16>
    %c0_2 = arith.constant 0 : index
    %c0_3 = arith.constant 0 : index
    %2 = vector.load %arg2[%c0_2, %c0_3] : memref<96x16xbf16, #tpu.memory_space<vmem>>, vector<96x16xbf16>
    %cst = arith.constant dense<0.000000e+00> : vector<256x16xf32>
    %3 = tpu.matmul %1, %2, %cst {dimension_numbers = #tpu.dot_dimension_numbers<[1], [0], [0], [1], [0, 0, 1, 1], [], []>} : vector<256x96xbf16>, vector<96x16xbf16>, vector<256x16xf32> -> vector<256x16xf32>
    %c0_4 = arith.constant 0 : index
    %c0_5 = arith.constant 0 : index
    %4 = vector.load %arg3[%c0_4, %c0_5] : memref<1x16xf32, #tpu.memory_space<vmem>>, vector<1x16xf32>
    %5 = vector.broadcast %4 : vector<1x16xf32> to vector<256x16xf32>
    %6 = arith.addf %3, %5 : vector<256x16xf32>
    %cst_6 = arith.constant 0.000000e+00 : f32
    %7 = vector.broadcast %cst_6 : f32 to vector<256x16xf32>
    %8 = arith.maximumf %6, %7 : vector<256x16xf32>
    %9 = arith.truncf %8 : vector<256x16xf32> to vector<256x16xbf16>
    %cst_7 = arith.constant 0.000000e+00 : bf16
    %10 = vector.broadcast %cst_7 : bf16 to vector<1x1x18x16xbf16>
    %cst_8 = arith.constant 0.000000e+00 : bf16
    %11 = vector.broadcast %cst_8 : bf16 to vector<1x16x1x16xbf16>
    %c0_9 = arith.constant 0 : index
    %c0_10 = arith.constant 0 : index
    %c0_11 = arith.constant 0 : index
    %c0_12 = arith.constant 0 : index
    %12 = vector.load %arg7[%c0_9, %c0_10, %c0_11, %c0_12] : memref<1x18x18x16xbf16, #tpu.memory_space<vmem>>, vector<1x1x18x16xbf16>
    tpu.vector_store %arg7[%c0_9, %c0_10, %c0_11, %c0_12], %10 {strides = array<i32>} : memref<1x18x18x16xbf16, #tpu.memory_space<vmem>>, vector<1x1x18x16xbf16>,
    %c0_13 = arith.constant 0 : index
    %c17 = arith.constant 17 : index
    %c0_14 = arith.constant 0 : index
    %c0_15 = arith.constant 0 : index
    %13 = vector.load %arg7[%c0_13, %c17, %c0_14, %c0_15] : memref<1x18x18x16xbf16, #tpu.memory_space<vmem>>, vector<1x1x18x16xbf16>
    tpu.vector_store %arg7[%c0_13, %c17, %c0_14, %c0_15], %10 {strides = array<i32>} : memref<1x18x18x16xbf16, #tpu.memory_space<vmem>>, vector<1x1x18x16xbf16>,
    %c0_16 = arith.constant 0 : index
    %c1 = arith.constant 1 : index
    %c0_17 = arith.constant 0 : index
    %c0_18 = arith.constant 0 : index
    %14 = vector.load %arg7[%c0_16, %c1, %c0_17, %c0_18] : memref<1x18x18x16xbf16, #tpu.memory_space<vmem>>, vector<1x16x1x16xbf16>
    tpu.vector_store %arg7[%c0_16, %c1, %c0_17, %c0_18], %11 {strides = array<i32>} : memref<1x18x18x16xbf16, #tpu.memory_space<vmem>>, vector<1x16x1x16xbf16>,
    %c0_19 = arith.constant 0 : index
    %c1_20 = arith.constant 1 : index
    %c17_21 = arith.constant 17 : index
    %c0_22 = arith.constant 0 : index
    %15 = vector.load %arg7[%c0_19, %c1_20, %c17_21, %c0_22] : memref<1x18x18x16xbf16, #tpu.memory_space<vmem>>, vector<1x16x1x16xbf16>
    tpu.vector_store %arg7[%c0_19, %c1_20, %c17_21, %c0_22], %11 {strides = array<i32>} : memref<1x18x18x16xbf16, #tpu.memory_space<vmem>>, vector<1x16x1x16xbf16>,
    %16 = vector.shape_cast %9 : vector<256x16xbf16> to vector<1x16x16x16xbf16>
    %c0_23 = arith.constant 0 : index
    %c1_24 = arith.constant 1 : index
    %c1_25 = arith.constant 1 : index
    %c0_26 = arith.constant 0 : index
    %17 = vector.load %arg7[%c0_23, %c1_24, %c1_25, %c0_26] : memref<1x18x18x16xbf16, #tpu.memory_space<vmem>>, vector<1x16x16x16xbf16>
    tpu.vector_store %arg7[%c0_23, %c1_24, %c1_25, %c0_26], %16 {strides = array<i32>} : memref<1x18x18x16xbf16, #tpu.memory_space<vmem>>, vector<1x16x16x16xbf16>,
    %c0_27 = arith.constant 0 : index
    %c0_28 = arith.constant 0 : index
    %c0_29 = arith.constant 0 : index
    %c0_30 = arith.constant 0 : index
    %18 = vector.load %arg7[%c0_27, %c0_28, %c0_29, %c0_30] : memref<1x18x18x16xbf16, #tpu.memory_space<vmem>>, vector<1x16x16x16xbf16>
    %19 = vector.shape_cast %18 : vector<1x16x16x16xbf16> to vector<256x16xbf16>
    %c0_31 = arith.constant 0 : index
    %c0_32 = arith.constant 0 : index
    %20 = vector.load %arg8[%c0_31, %c0_32] : memref<256x144xbf16, #tpu.memory_space<vmem>>, vector<256x16xbf16>
    tpu.vector_store %arg8[%c0_31, %c0_32], %19 {strides = array<i32>} : memref<256x144xbf16, #tpu.memory_space<vmem>>, vector<256x16xbf16>,
    %c0_33 = arith.constant 0 : index
    %c0_34 = arith.constant 0 : index
    %c1_35 = arith.constant 1 : index
    %c0_36 = arith.constant 0 : index
    %21 = vector.load %arg7[%c0_33, %c0_34, %c1_35, %c0_36] : memref<1x18x18x16xbf16, #tpu.memory_space<vmem>>, vector<1x16x16x16xbf16>
    %22 = vector.shape_cast %21 : vector<1x16x16x16xbf16> to vector<256x16xbf16>
    %c0_37 = arith.constant 0 : index
    %c16 = arith.constant 16 : index
    %23 = vector.load %arg8[%c0_37, %c16] : memref<256x144xbf16, #tpu.memory_space<vmem>>, vector<256x16xbf16>
    tpu.vector_store %arg8[%c0_37, %c16], %22 {strides = array<i32>} : memref<256x144xbf16, #tpu.memory_space<vmem>>, vector<256x16xbf16>,
    %c0_38 = arith.constant 0 : index
    %c0_39 = arith.constant 0 : index
    %c2 = arith.constant 2 : index
    %c0_40 = arith.constant 0 : index
    %24 = vector.load %arg7[%c0_38, %c0_39, %c2, %c0_40] : memref<1x18x18x16xbf16, #tpu.memory_space<vmem>>, vector<1x16x16x16xbf16>
    %25 = vector.shape_cast %24 : vector<1x16x16x16xbf16> to vector<256x16xbf16>
    %c0_41 = arith.constant 0 : index
    %c32 = arith.constant 32 : index
    %26 = vector.load %arg8[%c0_41, %c32] : memref<256x144xbf16, #tpu.memory_space<vmem>>, vector<256x16xbf16>
    tpu.vector_store %arg8[%c0_41, %c32], %25 {strides = array<i32>} : memref<256x144xbf16, #tpu.memory_space<vmem>>, vector<256x16xbf16>,
    %c0_42 = arith.constant 0 : index
    %c1_43 = arith.constant 1 : index
    %c0_44 = arith.constant 0 : index
    %c0_45 = arith.constant 0 : index
    %27 = vector.load %arg7[%c0_42, %c1_43, %c0_44, %c0_45] : memref<1x18x18x16xbf16, #tpu.memory_space<vmem>>, vector<1x16x16x16xbf16>
    %28 = vector.shape_cast %27 : vector<1x16x16x16xbf16> to vector<256x16xbf16>
    %c0_46 = arith.constant 0 : index
    %c48 = arith.constant 48 : index
    %29 = vector.load %arg8[%c0_46, %c48] : memref<256x144xbf16, #tpu.memory_space<vmem>>, vector<256x16xbf16>
    tpu.vector_store %arg8[%c0_46, %c48], %28 {strides = array<i32>} : memref<256x144xbf16, #tpu.memory_space<vmem>>, vector<256x16xbf16>,
    %c0_47 = arith.constant 0 : index
    %c1_48 = arith.constant 1 : index
    %c1_49 = arith.constant 1 : index
    %c0_50 = arith.constant 0 : index
    %30 = vector.load %arg7[%c0_47, %c1_48, %c1_49, %c0_50] : memref<1x18x18x16xbf16, #tpu.memory_space<vmem>>, vector<1x16x16x16xbf16>
    %31 = vector.shape_cast %30 : vector<1x16x16x16xbf16> to vector<256x16xbf16>
    %c0_51 = arith.constant 0 : index
    %c64 = arith.constant 64 : index
    %32 = vector.load %arg8[%c0_51, %c64] : memref<256x144xbf16, #tpu.memory_space<vmem>>, vector<256x16xbf16>
    tpu.vector_store %arg8[%c0_51, %c64], %31 {strides = array<i32>} : memref<256x144xbf16, #tpu.memory_space<vmem>>, vector<256x16xbf16>,
    %c0_52 = arith.constant 0 : index
    %c1_53 = arith.constant 1 : index
    %c2_54 = arith.constant 2 : index
    %c0_55 = arith.constant 0 : index
    %33 = vector.load %arg7[%c0_52, %c1_53, %c2_54, %c0_55] : memref<1x18x18x16xbf16, #tpu.memory_space<vmem>>, vector<1x16x16x16xbf16>
    %34 = vector.shape_cast %33 : vector<1x16x16x16xbf16> to vector<256x16xbf16>
    %c0_56 = arith.constant 0 : index
    %c80 = arith.constant 80 : index
    %35 = vector.load %arg8[%c0_56, %c80] : memref<256x144xbf16, #tpu.memory_space<vmem>>, vector<256x16xbf16>
    tpu.vector_store %arg8[%c0_56, %c80], %34 {strides = array<i32>} : memref<256x144xbf16, #tpu.memory_space<vmem>>, vector<256x16xbf16>,
    %c0_57 = arith.constant 0 : index
    %c2_58 = arith.constant 2 : index
    %c0_59 = arith.constant 0 : index
    %c0_60 = arith.constant 0 : index
    %36 = vector.load %arg7[%c0_57, %c2_58, %c0_59, %c0_60] : memref<1x18x18x16xbf16, #tpu.memory_space<vmem>>, vector<1x16x16x16xbf16>
    %37 = vector.shape_cast %36 : vector<1x16x16x16xbf16> to vector<256x16xbf16>
    %c0_61 = arith.constant 0 : index
    %c96 = arith.constant 96 : index
    %38 = vector.load %arg8[%c0_61, %c96] : memref<256x144xbf16, #tpu.memory_space<vmem>>, vector<256x16xbf16>
    tpu.vector_store %arg8[%c0_61, %c96], %37 {strides = array<i32>} : memref<256x144xbf16, #tpu.memory_space<vmem>>, vector<256x16xbf16>,
    %c0_62 = arith.constant 0 : index
    %c2_63 = arith.constant 2 : index
    %c1_64 = arith.constant 1 : index
    %c0_65 = arith.constant 0 : index
    %39 = vector.load %arg7[%c0_62, %c2_63, %c1_64, %c0_65] : memref<1x18x18x16xbf16, #tpu.memory_space<vmem>>, vector<1x16x16x16xbf16>
    %40 = vector.shape_cast %39 : vector<1x16x16x16xbf16> to vector<256x16xbf16>
    %c0_66 = arith.constant 0 : index
    %c112 = arith.constant 112 : index
    %41 = vector.load %arg8[%c0_66, %c112] : memref<256x144xbf16, #tpu.memory_space<vmem>>, vector<256x16xbf16>
    tpu.vector_store %arg8[%c0_66, %c112], %40 {strides = array<i32>} : memref<256x144xbf16, #tpu.memory_space<vmem>>, vector<256x16xbf16>,
    %c0_67 = arith.constant 0 : index
    %c2_68 = arith.constant 2 : index
    %c2_69 = arith.constant 2 : index
    %c0_70 = arith.constant 0 : index
    %42 = vector.load %arg7[%c0_67, %c2_68, %c2_69, %c0_70] : memref<1x18x18x16xbf16, #tpu.memory_space<vmem>>, vector<1x16x16x16xbf16>
    %43 = vector.shape_cast %42 : vector<1x16x16x16xbf16> to vector<256x16xbf16>
    %c0_71 = arith.constant 0 : index
    %c128 = arith.constant 128 : index
    %44 = vector.load %arg8[%c0_71, %c128] : memref<256x144xbf16, #tpu.memory_space<vmem>>, vector<256x16xbf16>
    tpu.vector_store %arg8[%c0_71, %c128], %43 {strides = array<i32>} : memref<256x144xbf16, #tpu.memory_space<vmem>>, vector<256x16xbf16>,
    %c0_72 = arith.constant 0 : index
    %c0_73 = arith.constant 0 : index
    %45 = vector.load %arg8[%c0_72, %c0_73] : memref<256x144xbf16, #tpu.memory_space<vmem>>, vector<256x144xbf16>
    %c0_74 = arith.constant 0 : index
    %c0_75 = arith.constant 0 : index
    %46 = vector.load %arg4[%c0_74, %c0_75] : memref<144x128xbf16, #tpu.memory_space<vmem>>, vector<144x128xbf16>
    %cst_76 = arith.constant dense<0.000000e+00> : vector<256x128xf32>
    %47 = tpu.matmul %45, %46, %cst_76 {dimension_numbers = #tpu.dot_dimension_numbers<[1], [0], [0], [1], [0, 0, 1, 1], [], []>} : vector<256x144xbf16>, vector<144x128xbf16>, vector<256x128xf32> -> vector<256x128xf32>
    %c0_77 = arith.constant 0 : index
    %c0_78 = arith.constant 0 : index
    %48 = vector.load %arg5[%c0_77, %c0_78] : memref<1x128xf32, #tpu.memory_space<vmem>>, vector<1x128xf32>
    %49 = vector.broadcast %48 : vector<1x128xf32> to vector<256x128xf32>
    %50 = arith.addf %47, %49 : vector<256x128xf32>
    %cst_79 = arith.constant 0.000000e+00 : f32
    %51 = vector.broadcast %cst_79 : f32 to vector<256x128xf32>
    %52 = arith.maximumf %50, %51 : vector<256x128xf32>
    %53 = arith.truncf %52 : vector<256x128xf32> to vector<256x128xbf16>
    %54 = vector.shape_cast %53 : vector<256x128xbf16> to vector<1x256x128xbf16>
    %c0_80 = arith.constant 0 : index
    %c0_81 = arith.constant 0 : index
    %c0_82 = arith.constant 0 : index
    %55 = vector.load %arg6[%c0_80, %c0_81, %c0_82] : memref<1x256x128xbf16, #tpu.memory_space<vmem>>, vector<1x256x128xbf16>
    tpu.vector_store %arg6[%c0_80, %c0_81, %c0_82], %54 {strides = array<i32>} : memref<1x256x128xbf16, #tpu.memory_space<vmem>>, vector<1x256x128xbf16>,
    return
  }
  func.func @transform_0(%arg0: i32) -> (i32, i32, i32) {
    %c0_i32 = arith.constant 0 : i32
    %c0_i32_0 = arith.constant 0 : i32
    %c0_i32_1 = arith.constant 0 : i32
    return %arg0, %c0_i32, %c0_i32_0 : i32, i32, i32
  }
  func.func @transform_1(%arg0: i32) -> (i32, i32) {
    %c0_i32 = arith.constant 0 : i32
    %c0_i32_0 = arith.constant 0 : i32
    %c0_i32_1 = arith.constant 0 : i32
    return %c0_i32, %c0_i32_0 : i32, i32
  }
  func.func @transform_2(%arg0: i32) -> (i32, i32) {
    %c0_i32 = arith.constant 0 : i32
    %c0_i32_0 = arith.constant 0 : i32
    %c0_i32_1 = arith.constant 0 : i32
    return %c0_i32, %c0_i32_0 : i32, i32
  }
  func.func @transform_3(%arg0: i32) -> (i32, i32) {
    %c0_i32 = arith.constant 0 : i32
    %c0_i32_0 = arith.constant 0 : i32
    %c0_i32_1 = arith.constant 0 : i32
    return %c0_i32, %c0_i32_0 : i32, i32
  }
  func.func @transform_4(%arg0: i32) -> (i32, i32) {
    %c0_i32 = arith.constant 0 : i32
    %c0_i32_0 = arith.constant 0 : i32
    %c0_i32_1 = arith.constant 0 : i32
    return %c0_i32, %c0_i32_0 : i32, i32
  }
  func.func @transform_5(%arg0: i32) -> (i32, i32, i32) {
    %c0_i32 = arith.constant 0 : i32
    %c0_i32_0 = arith.constant 0 : i32
    %c0_i32_1 = arith.constant 0 : i32
    return %arg0, %c0_i32, %c0_i32_0 : i32, i32, i32
  }
}

</mosaic_0001>

<bundles_post_ra>
// kernel: fire_pallas.1
= control target key start
LH: loop header
LB: loop body
LE: loop exit
PB: predicated region body
PF: predicated region fallthrough
CT: control target
= control target key end

     0   :  { %s5442_s18 = smov 0   ;;  %s7311_s0 = inlined_call_operand.vmem [shape: bf16[2,256,96], index: 0, kind: input, shape index: {}]   ;;  %s7312_s1 = inlined_call_operand.vmem [shape: bf16[96,16], index: 1, kind: input, shape index: {}]   ;;  %s7313_s2 = inlined_call_operand.vmem [shape: f32[1,16], index: 2, kind: input, shape index: {}]   ;;  %s7314_s3 = inlined_call_operand.vmem [shape: bf16[144,128], index: 3, kind: input, shape index: {}]   ;;  %s7315_s4 = inlined_call_operand.vmem [shape: f32[1,128], index: 4, kind: input, shape index: {}]   ;;  %s7316_s5 = inlined_call_operand.vmem [shape: bf16[2,256,128], index: 5, kind: output, shape index: {}]  }
   0x1 LB: > { %s4855_s19 = sadd.s32 4294967295, %s5402_s18   ;;  %p4859_p0 = scmp.ge.s32.totalorder %s5402_s18, 1  ;;  %s5402_s18 = sphi %s5442_s18, %s15_s18  }
   0x2   : > { %p187_p1 = scmp.lt.s32.totalorder %s5402_s18, 3 }
   0x4   : > { %p188_p2 = pnand %p4859_p0, %p187_p1 }
   0x5   : > { %p215_p3 = scmp.lt.s32.totalorder (!%p188_p2), %s4855_s19, 1  ;;  %s5405_s11 = smov (!%p188_p2), 32  }
   0x6   : > { %191 = sbr.rel (%p188_p2) target bundleno = 1050 (0x41a), region = 40  ;;  %s5406_s12 = smov (!%p188_p2), 16  }
   0x7   : > { %s5407_s15 = smov (!%p188_p2), 48   ;;  %s5408_s16 = smov (!%p188_p2), 64  }
   0x8   : > { %s5409_s17 = smov (!%p188_p2), 80   ;;  %s5410_s22 = smov (!%p188_p2), 96  }
   0x9   : > { %s5411_s23 = smov (!%p188_p2), 112  }
   0xb   : > { %v5221_v0 = vld [vmem:[%s7312_s1 + $0x28] sm:$0xff]  ;;  %v5220_v1 = vld [vmem:[%s7312_s1 + $0x20] sm:$0xff]  ;;  %v5219_v2 = vld [vmem:[%s7312_s1 + $0x18] sm:$0xff]  ;;  %s7330_s19 = smov (!%p215_p3, %s4855_s19), 1  ;;  %vm390_vm0 = vcmask 785408   ;;  %vm592_vm1 = vcmask 125952  }
   0xc   : > { %441 = vmatpush.bf16.msra.mxu0 %v5221_v0  ;;  %5358 = vmatpush.bf16.msra.mxu3 %v5221_v0  ;;  %v5218_v3 = vld [vmem:[%s7312_s1 + $0x10] sm:$0xff]  ;;  %v5217_v4 = vld [vmem:[%s7312_s1 + $0x8] sm:$0xff]  ;;  %s5198_s30 = sshll.u32 %s7330_s19, 7  ;;  %v5216_v5 = vld [vmem:[%s7312_s1] sm:$0xff]  ;;  %v5404_v14 = vmov 0   ;;  %vm595_vm2 = vcmask 122880  }
   0xd   : > { %s5476_s10 = scalar_lea.vmem %s7311_s0, %s5198_s30  ;;  %594 = vst.msk [vmem:[#allocation2 + $0x4] sm:$0xf] %vm592_vm1, %v5404_v14  ;;  %vm1863_vm3 = vcmask 1042432   ;;  %vm1864_vm4 = vcmask 1046532   ;;  %vm1251_vm6 = vsmask.f32 3328 }
   0xe   : > { %v5200_v6 = vld [vmem:[%s5476_s10] sm:$0xff]  ;;  %v5201_v8 = vld [vmem:[%s5476_s10 + $0x8] sm:$0xff]  ;;  %v5202_v10 = vld [vmem:[%s5476_s10 + $0x10] sm:$0xff]  ;;  %593 = vst.msk [vmem:[#allocation2] sm:$0xf] %vm592_vm1, %v5404_v14 }
   0xf   : > { %v5212_v7 = vld [vmem:[%s5476_s10 + $0x60] sm:$0xff]  ;;  %v5213_v9 = vld [vmem:[%s5476_s10 + $0x68] sm:$0xff]  ;;  %v5203_v11 = vld [vmem:[%s5476_s10 + $0x18] sm:$0xff]  ;;  %596 = vst.msk [vmem:[#allocation2 + $0x8] sm:$0x1] %vm595_vm2, %v5404_v14 }
  0x10   : > { %442 = vmatpush.bf16.msra.mxu0 %v5220_v1  ;;  %5359 = vmatpush.bf16.msra.mxu3 %v5220_v1  ;;  %v5204_v12 = vld [vmem:[%s5476_s10 + $0x20] sm:$0xff]  ;;  %v5214_v13 = vld [vmem:[%s5476_s10 + $0x70] sm:$0xff]  ;;  %598 = vst.msk [vmem:[#allocation2 + $0xcc] sm:$0xf] %vm592_vm1, %v5404_v14  ;;  %v5205_v16 = vld [vmem:[%s5476_s10 + $0x28] sm:$0xff] }
  0x11   : > { %599 = vst.msk [vmem:[#allocation2 + $0xd0] sm:$0xf] %vm592_vm1, %v5404_v14  ;;  %vm5504_vm5 = vmor %vm1863_vm3, %vm1864_vm4  ;;  %vm1252_vm7 = vsmask.f32 7440  ;;  %vm603_vm9 = vsmask.f32 256 }
  0x12   : > { %600 = vst.msk [vmem:[#allocation2 + $0xd4] sm:$0x1] %vm595_vm2, %v5404_v14  ;;  %vm5512_vm8 = vmor %vm1251_vm6, %vm1252_vm7  ;;  %v5206_v38 = vld [vmem:[%s5476_s10 + $0x30] sm:$0xff]  ;;  %v605_v44 = vld [vmem:[#allocation2 + $0xc] sm:$0x1]  ;;  %vm2074_vm3 = vcmask 388352  }
  0x13   : > { %vm5522_vm10 = vmand %vm595_vm2, %vm603_vm9  ;;  %vm653_vm11 = vsmask.f32 7938  ;;  %v641_v48 = vld [vmem:[#allocation2 + $0x9c] sm:$0x1]  ;;  %v655_v50 = vld [vmem:[#allocation2 + $0x14] sm:$0x1] }
  0x14   : > { %443 = vmatpush.bf16.msra.mxu0 %v5219_v2  ;;  %5360 = vmatpush.bf16.msra.mxu3 %v5219_v2  ;;  %v5500_v15 = vld [vmem:[#allocation2 + $0x4] sm:$0xf]  ;;  %v606_v46 = vsel %vm5522_vm10, 0, %v605_v44  ;;  %vm5534_vm12 = vmand %vm595_vm2, %vm653_vm11  ;;  %v642_v49 = vsel %vm5522_vm10, 0, %v641_v48  ;;  %v5207_v52 = vld [vmem:[%s5476_s10 + $0x38] sm:$0xff]  ;;  %vm1734_vm2 = vcmask 257152  }
  0x15   : > { %v1868_v17 = vrot.slane %v5500_v15, 5  ;;  %v1203_v22 = vld [vmem:[#allocation2] sm:$0xf]  ;;  %v1204_v24 = vld [vmem:[#allocation2 + $0x4] sm:$0xf]  ;;  %v656_v51 = vsel %vm5534_vm12, 0, %v655_v50  ;;  %vm5569_vm13 = vmand %vm592_vm1, %vm653_vm11 }
  0x16   : > { %v1769_v18 = vld [vmem:[#allocation2 + $0x8] sm:$0x1]  ;;  %v1255_v25 = vshrl.u32 %v1203_v22, 16  ;;  %v1258_v26 = vshll.u32 %v1203_v22, 16  ;;  %v1264_v27 = vshll.u32 %v1204_v24, 16  ;;  %v1268_v33 = vshrl.u32 %v1204_v24, 16 }
  0x17   : > { %v1870_v19 = vrot.slane %v1868_v17, 4  ;;  %v1871_v20 = vrot.slane %v1769_v18, 5  ;;  %v1205_v37 = vld [vmem:[#allocation2 + $0x8] sm:$0x1]  ;;  %607 = vst [vmem:[#allocation2 + $0xc] sm:$0x1] %v606_v46 }
  0x18   : > { %444 = vmatpush.bf16.msra.mxu0 %v5218_v3  ;;  %5361 = vmatpush.bf16.msra.mxu3 %v5218_v3  ;;  %v1257_v28 = vrot.slane %v1255_v25, 4  ;;  %v1260_v29 = vrot.slane %v1258_v26, 5  ;;  %v1266_v31 = vrot.slane %v1264_v27, 5  ;;  %v1270_v36 = vrot.slane %v1268_v33, 4  ;;  %643 = vst [vmem:[#allocation2 + $0x9c] sm:$0x1] %v642_v49 }
  0x19   : > { %v1872_v23 = vsel %vm5504_vm5, %v1870_v19, %v1871_v20  ;;  %v1274_v40 = vshll.u32 %v1205_v37, 16  ;;  %657 = vst [vmem:[#allocation2 + $0x14] sm:$0x1] %v656_v51  ;;  %v5215_v53 = vld [vmem:[%s5476_s10 + $0x78] sm:$0xff]  ;;  %v691_v54 = vld [vmem:[#allocation2 + $0xa4] sm:$0x1] }
  0x1a   : > { %1980 = vrot.lane.b32.xlu0 %v1872_v23, %s5405_s11  ;;  %v1261_v30 = vor.u32 %v1260_v29, %v1257_v28  ;;  %v1271_v39 = vor.u32 %v1270_v36, %v1266_v31  ;;  %v692_v55 = vsel %vm5534_vm12, 0, %v691_v54  ;;  %v1767_v56 = vld [vmem:[#allocation2] sm:$0xe]  ;;  %v5554_v59 = vld [vmem:[%s7313_s2] ss:$0 sm:$0xff]  ;;  %v5209_v33 = vld [vmem:[%s5476_s10 + $0x48] sm:$0xff] }
  0x1b   : > { %v1276_v43 = vrot.slane %v1274_v40, 5  ;;  %693 = vst [vmem:[#allocation2 + $0xa4] sm:$0x1] %v692_v55  ;;  %v4968_v57 = vrot.slane %v1767_v56, 9  ;;  %v608_v60 = vld [vmem:[#allocation2 + $0x18] sm:$0x1] }
  0x1c   : > { %445 = vmatpush.bf16.msra.mxu0 %v5217_v4  ;;  %5362 = vmatpush.bf16.msra.mxu3 %v5217_v4  ;;  %v1262_v34 = vrot.slane %v1261_v30, 4  ;;  %v1272_v42 = vrot.slane %v1271_v39, 4  ;;  %v609_v61 = vsel %vm5522_vm10, 0, %v608_v60  ;;  %v658_v62 = vld [vmem:[#allocation2 + $0x20] sm:$0x1]  ;;  %vm2267_vm4 = vcmask 519552  }
  0x1d   : > { %v1869_v58 = vsel %vm5504_vm5, %v4968_v57, %v1868_v17  ;;  %v5208_v63 = vld [vmem:[%s5476_s10 + $0x40] sm:$0xff]  ;;  %610 = vst [vmem:[#allocation2 + $0x18] sm:$0x1] %v609_v61  ;;  %v659_v0 = vsel %vm5534_vm12, 0, %v658_v62  ;;  %v644_v15 = vld [vmem:[#allocation2 + $0xa8] sm:$0x1] }
  0x1e   : > { %v1267_v35 = vsel %vm5512_vm8, %v1262_v34, %v1266_v31  ;;  %v1277_v45 = vsel %vm5512_vm8, %v1272_v42, %v1276_v43  ;;  %1978 = vrot.lane.b32.xlu2 %v1869_v58, %s5405_s11  ;;  %660 = vst [vmem:[#allocation2 + $0x20] sm:$0x1] %v659_v0  ;;  %v1027_v17 = vld [vmem:[#allocation2 + $0xc] sm:$0xf]  ;;  %v645_v18 = vsel %vm5522_vm10, 0, %v644_v15  ;;  %vm2828_vm6 = vcmask 650752  }
  0x1f   : > { %646 = vst [vmem:[#allocation2 + $0xa8] sm:$0x1] %v645_v18  ;;  %v661_v28 = vld [vmem:[#allocation2 + $0x2c] sm:$0x1]  ;;  %vm703_vm14 = vsmask.f32 4368 }
  0x20   : > { %446 = vmatpush.bf16.msra.mxu0 %v5216_v5  ;;  %5363 = vmatpush.bf16.msra.mxu3 %v5216_v5  ;;  %v1111_v34 = vld [vmem:[#allocation2 + $0x9c] sm:$0xf]  ;;  %v662_v36 = vsel %vm5534_vm12, 0, %v661_v28  ;;  %vm5582_vm15 = vmor %vm603_vm9, %vm703_vm14  ;;  %v1031_v44 = vld [vmem:[#allocation2 + $0x14] sm:$0x1]  ;;  %vm3165_vm7 = vcmask 781952  }
  0x21   : > { %663 = vst [vmem:[#allocation2 + $0x2c] sm:$0x1] %v662_v36  ;;  %v5210_v36 = vld [vmem:[%s5476_s10 + $0x50] sm:$0xff]  ;;  %vm3359_vm9 = vcmask 913152  }
  0x22   : > { %1638 = vrot.lane.b32.xlu0 %v1267_v35, %s5406_s12  ;;  %v1115_v57 = vld [vmem:[#allocation2 + $0xa4] sm:$0x1] }
  0x23   : > { %4952 = vmatmul.msk.bf16.vlgmr.msra.gmra.mxu0 %vm390_vm0, %v5200_v6  ;;  %4964 = vmatmul.msk.bf16.vlgmr.msra.gmra.mxu3 %vm390_vm0, %v5212_v7 }
  0x2a   : > { %1640 = vrot.lane.b32.xlu0 %v1277_v45, %s5406_s12 }
  0x33   : > { %4953 = vmatmul.msk.bf16.gmra.mxu0 %vm390_vm0, %v5201_v8  ;;  %4965 = vmatmul.msk.bf16.gmra.mxu3 %vm390_vm0, %v5213_v9  ;;  %v611_v8 = vld [vmem:[#allocation2 + $0x24] sm:$0x1] }
  0x43   : > { %4954 = vmatmul.msk.bf16.gmra.mxu0 %vm390_vm0, %v5202_v10  ;;  %4966 = vmatmul.msk.bf16.gmra.mxu3 %vm390_vm0, %v5214_v13 }
  0x53   : > { %4955 = vmatmul.msk.bf16.gmra.mxu0 %vm390_vm0, %v5203_v11  ;;  %4967 = vmatmul.msk.bf16.gmra.mxu3 %vm390_vm0, %v5215_v53  ;;  %v612_v11 = vsel %vm5522_vm10, 0, %v611_v8 }
  0x54   : > { %613 = vst [vmem:[#allocation2 + $0x24] sm:$0x1] %v612_v11 }
  0x63   : > { %4956 = vmatmul.msk.bf16.gmra.mxu0 %vm390_vm0, %v5204_v12 }
  0x73   : > { %4957 = vmatmul.msk.bf16.gmra.mxu0 %vm390_vm0, %v5205_v16 }
  0x83   : > { %4958 = vmatmul.msk.bf16.gmra.mxu0 %vm390_vm0, %v5206_v38 }
  0x93   : > { %4959 = vmatmul.msk.bf16.gmra.mxu0 %vm390_vm0, %v5207_v52 }
  0xa0   : > { %v448_v1 = vpop.f32.mrf.mxu0 }
  0xa1   : > { %v449_v2 = vadd.f32 %v5554_v59, %v448_v1 }
  0xa3   : > { %v528_v3 = vmax.f32 %v449_v2, 0.0  ;;  %4960 = vmatmul.msk.bf16.gmra.mxu0 %vm390_vm0, %v5208_v63 }
  0xa5   : > { %v560_v4 = vpack.c.bf16 %v528_v3, %v528_v3 }
  0xa6   : > { %v508_v5 = vpop.f32.mrf.mxu3 }
  0xa7   : > { %v706_v6 = vshrl.u32 %v560_v4, 16  ;;  %v509_v7 = vadd.f32 %v5554_v59, %v508_v5  ;;  %v709_v9 = vshll.u32 %v560_v4, 16 }
  0xa8   : > { %v450_v10 = vpop.f32.mrf.mxu0 }
  0xa9   : > { %v708_v12 = vrot.slane %v706_v6, 7  ;;  %v552_v13 = vmax.f32 %v509_v7, 0.0  ;;  %v451_v14 = vadd.f32 %v5554_v59, %v450_v10 }
  0xab   : > { %v711_v19 = vor.u32 %v709_v9, %v708_v12  ;;  %v584_v20 = vpack.c.bf16 %v552_v13, %v552_v13  ;;  %v529_v22 = vmax.f32 %v451_v14, 0.0  ;;  %v712_v42 = vrot.slane %v708_v12, 4  ;;  %v694_v14 = vld [vmem:[#allocation2 + $0xb0] sm:$0x1] }
  0xad   : > { %v1028_v23 = vsel %vm5569_vm13, %v711_v19, %v1027_v17  ;;  %v910_v24 = vshrl.u32 %v584_v20, 16  ;;  %v913_v25 = vshll.u32 %v584_v20, 16  ;;  %v561_v26 = vpack.c.bf16 %v529_v22, %v529_v22  ;;  %v1034_v20 = vld [vmem:[#allocation2 + $0x18] sm:$0xf] }
  0xae   : > { %1029 = vst [vmem:[#allocation2 + $0xc] sm:$0xf] %v1028_v23  ;;  %v510_v27 = vpop.f32.mrf.mxu3  ;;  %v695_v17 = vsel %vm5534_vm12, 0, %v694_v14 }
  0xaf   : > { %v912_v29 = vrot.slane %v910_v24, 7  ;;  %v714_v30 = vshrl.u32 %v561_v26, 16  ;;  %v511_v31 = vadd.f32 %v5554_v59, %v510_v27  ;;  %v717_v39 = vshll.u32 %v561_v26, 16  ;;  %696 = vst [vmem:[#allocation2 + $0xb0] sm:$0x1] %v695_v17 }
  0xb0   : > { %v453_v35 = vpop.f32.mrf.mxu0 }
  0xb1   : > { %v915_v37 = vor.u32 %v913_v25, %v912_v29  ;;  %v716_v38 = vrot.slane %v714_v30, 7  ;;  %v553_v40 = vmax.f32 %v511_v31, 0.0  ;;  %v454_v45 = vadd.f32 %v5554_v59, %v453_v35 }
  0xb2   : > { %v916_v63 = vrot.slane %v912_v29, 4 }
  0xb3   : > { %v1112_v46 = vsel %vm5569_vm13, %v915_v37, %v1111_v34  ;;  %v719_v48 = vor.u32 %v717_v39, %v716_v38  ;;  %v721_v49 = vrot.slane %v716_v38, 4  ;;  %v585_v50 = vpack.c.bf16 %v553_v40, %v553_v40  ;;  %4961 = vmatmul.msk.bf16.gmra.mxu0 %vm390_vm0, %v5209_v33 }
  0xb4   : > { %1113 = vst [vmem:[#allocation2 + $0x9c] sm:$0xf] %v1112_v46  ;;  %v530_v51 = vmax.f32 %v454_v45, 0.0  ;;  %v1118_v46 = vld [vmem:[#allocation2 + $0xa8] sm:$0xf] }
  0xb5   : > { %v720_v52 = vsel %vm5582_vm15, %v712_v42, %v719_v48  ;;  %v1032_v53 = vsel %vm5522_vm10, %v721_v49, %v1031_v44  ;;  %v918_v54 = vshrl.u32 %v585_v50, 16  ;;  %v2107_v55 = vld [vmem:[#allocation2 + $0xc] sm:$0xf]  ;;  %v921_v1 = vshll.u32 %v585_v50, 16 }
  0xb6   : > { %v2300_v56 = vld [vmem:[#allocation2 + $0xc] sm:$0xf]  ;;  %1030 = vst.msk [vmem:[#allocation2 + $0x10] sm:$0xf] %vm592_vm1, %v720_v52  ;;  %v562_v58 = vpack.c.bf16 %v530_v51, %v530_v51  ;;  %2171 = vrot.lane.b32.xlu1 %v2107_v55, %s5407_s15  ;;  %v513_v62 = vpop.f32.mrf.mxu3 }
  0xb7   : > { %v2349_v60 = vshrl.u32 %v2300_v56, 16  ;;  %v2352_v61 = vshll.u32 %v2300_v56, 16  ;;  %1033 = vst [vmem:[#allocation2 + $0x14] sm:$0x1] %v1032_v53  ;;  %v920_v0 = vrot.slane %v918_v54, 7  ;;  %v514_v2 = vadd.f32 %v5554_v59, %v513_v62 }
  0xb8   : > { %v723_v3 = vshrl.u32 %v562_v58, 16  ;;  %v726_v4 = vshll.u32 %v562_v58, 16  ;;  %v455_v5 = vpop.f32.mrf.mxu0  ;;  %v2861_v8 = vld [vmem:[#allocation2 + $0xc] sm:$0xe] }
  0xb9   : > { %v2351_v6 = vrot.slane %v2349_v60, 4  ;;  %v2354_v7 = vrot.slane %v2352_v61, 5  ;;  %v923_v9 = vor.u32 %v921_v1, %v920_v0  ;;  %v925_v10 = vrot.slane %v920_v0, 4  ;;  %v5598_v13 = vld [vmem:[#allocation2 + $0xc] sm:$0xe] }
  0xba   : > { %v456_v11 = vadd.f32 %v5554_v59, %v455_v5  ;;  %v554_v12 = vmax.f32 %v514_v2, 0.0  ;;  %v5600_v15 = vrot.slane %v723_v3, 7  ;;  %v4984_v27 = vrot.slane %v2861_v8, 9  ;;  %v5611_v29 = vld [vmem:[#allocation2 + $0xc] sm:$0xf] }
  0xbb   : > { %v924_v18 = vsel %vm5582_vm15, %v916_v63, %v923_v9  ;;  %v1116_v19 = vsel %vm5522_vm10, %v925_v10, %v1115_v57  ;;  %v2131_v25 = vld [vmem:[#allocation2 + $0x9c] sm:$0xf]  ;;  %v2355_v26 = vor.u32 %v2354_v7, %v2351_v6  ;;  %v4969_v28 = vrot.slane %v5598_v13, 9  ;;  %v1038_v61 = vld [vmem:[#allocation2 + $0x20] sm:$0x1] }
  0xbc   : > { %v531_v22 = vmax.f32 %v456_v11, 0.0  ;;  %v586_v23 = vpack.c.bf16 %v554_v12, %v554_v12  ;;  %1114 = vst.msk [vmem:[#allocation2 + $0xa0] sm:$0xf] %vm592_vm1, %v924_v18  ;;  %v728_v24 = vor.u32 %v726_v4, %v5600_v15  ;;  %v729_v34 = vrot.slane %v5600_v15, 4  ;;  %v614_v12 = vld [vmem:[#allocation2 + $0x30] sm:$0x1] }
  0xbd   : > { %1117 = vst [vmem:[#allocation2 + $0xa4] sm:$0x1] %v1116_v19  ;;  %v2108_v31 = vld [vmem:[#allocation2 + $0x10] sm:$0xf]  ;;  %v2356_v50 = vrot.slane %v2355_v26, 4  ;;  %v1279_v60 = vshrl.u32 %v5611_v29, 16 }
  0xbe   : > { %v563_v30 = vpack.c.bf16 %v531_v22, %v531_v22  ;;  %v5613_v33 = vld [vmem:[#allocation2 + $0x10] sm:$0xf]  ;;  %v1035_v35 = vsel %vm5569_vm13, %v728_v24, %v1034_v20  ;;  %2173 = vrot.lane.b32.xlu2 %v2108_v31, %s5407_s15  ;;  %2219 = vrot.lane.b32.xlu1 %v2131_v25, %s5407_s15  ;;  %v927_v38 = vshrl.u32 %v586_v23, 16  ;;  %v515_v40 = vpop.f32.mrf.mxu3  ;;  %v930_v45 = vshll.u32 %v586_v23, 16  ;;  %v2863_v58 = vld [vmem:[#allocation2 + $0x14] sm:$0x1] }
  0xbf   : > { %v2358_v37 = vshll.u32 %v5613_v33, 16  ;;  %v2862_v39 = vld [vmem:[#allocation2 + $0x10] sm:$0xf]  ;;  %1036 = vst [vmem:[#allocation2 + $0x18] sm:$0xf] %v1035_v35  ;;  %v516_v54 = vadd.f32 %v5554_v59, %v515_v40  ;;  %v2962_v9 = vrot.slane %v2863_v58, 5 }
  0xc0   : > { %v731_v42 = vshrl.u32 %v563_v30, 16  ;;  %v734_v44 = vshll.u32 %v563_v30, 16  ;;  %v2959_v48 = vrot.slane %v2862_v39, 5  ;;  %v458_v49 = vpop.f32.mrf.mxu0  ;;  %v5624_v52 = vrot.slane %v927_v38, 7  ;;  %v1771_v53 = vld [vmem:[#allocation2 + $0x10] sm:$0xf] }
  0xc1   : > { %v5622_v51 = vrot.slane %v2358_v37, 5  ;;  %v459_v56 = vadd.f32 %v5554_v59, %v458_v49  ;;  %v1875_v57 = vrot.slane %v1771_v53, 5  ;;  %v1772_v6 = vld [vmem:[#allocation2 + $0x14] sm:$0x1]  ;;  %v555_v10 = vmax.f32 %v516_v54, 0.0 }
  0xc2   : > { %v733_v55 = vrot.slane %v731_v42, 7  ;;  %v932_v63 = vor.u32 %v930_v45, %v5624_v52  ;;  %v933_v0 = vrot.slane %v5624_v52, 4  ;;  %v2960_v1 = vsel %vm5504_vm5, %v4984_v27, %v2959_v48  ;;  %v5642_v11 = vld [vmem:[#allocation2 + $0x10] sm:$0xf]  ;;  %v664_v18 = vld [vmem:[#allocation2 + $0x38] sm:$0x1] }
  0xc3   : > { %v2361_v62 = vsel %vm5512_vm8, %v2356_v50, %v5622_v51  ;;  %v532_v4 = vmax.f32 %v459_v56, 0.0  ;;  %4962 = vmatmul.msk.bf16.gmra.mxu0 %vm390_vm0, %v5210_v36  ;;  %v2961_v5 = vrot.slane %v2959_v48, 4  ;;  %v1876_v8 = vsel %vm5504_vm5, %v4969_v28, %v1875_v57  ;;  %v5262_v27 = vld [vmem:[%s7314_s3 + $0x40] sm:$0xff]  ;;  %v1122_v38 = vld [vmem:[#allocation2 + $0xb0] sm:$0x1] }
  0xc4   : > { %v736_v2 = vor.u32 %v734_v44, %v733_v55  ;;  %v738_v3 = vrot.slane %v733_v55, 4  ;;  %2732 = vrot.lane.b32.xlu0 %v2361_v62, %s5408_s16  ;;  %v1119_v7 = vsel %vm5569_vm13, %v932_v63, %v1118_v46  ;;  %v1877_v17 = vrot.slane %v1875_v57, 4  ;;  %v1041_v28 = vld [vmem:[#allocation2 + $0x24] sm:$0xf]  ;;  %4622 = vmatpush.bf16.msra.mxu2 %v5262_v27  ;;  %v1242_v44 = vld [vmem:[#allocation2 + $0x9c] sm:$0xf] }
  0xc5   : > { %v564_v15 = vpack.c.bf16 %v532_v4, %v532_v4  ;;  %1120 = vst [vmem:[#allocation2 + $0xa8] sm:$0xf] %v1119_v7  ;;  %v587_v19 = vpack.c.bf16 %v555_v10, %v555_v10  ;;  %v1878_v20 = vrot.slane %v1772_v6, 5  ;;  %v1281_v22 = vrot.slane %v1279_v60, 4  ;;  %v5211_v7 = vld [vmem:[%s5476_s10 + $0x58] sm:$0xff]  ;;  %s6721_s10 = scalar_lea.vmem %s7316_s5, %s5198_s30 }
  0xc6   : > { %v737_v13 = vsel %vm5582_vm15, %v729_v34, %v736_v2  ;;  %v1039_v14 = vsel %vm5522_vm10, %v738_v3, %v1038_v61  ;;  %3069 = vrot.lane.b32.xlu2 %v2960_v1, %s5409_s17  ;;  %1982 = vrot.lane.b32.xlu1 %v1876_v8, %s5405_s11  ;;  %v1282_v23 = vshll.u32 %v5611_v29, 16  ;;  %v1288_v26 = vshll.u32 %v5642_v11, 16  ;;  %v3953_v42 = vld [vmem:[#allocation2 + $0x18] sm:$0xe]  ;;  %v1243_v1 = vld [vmem:[#allocation2 + $0xa0] sm:$0xf] }
  0xc7   : > { %1037 = vst.msk [vmem:[#allocation2 + $0x1c] sm:$0xf] %vm592_vm1, %v737_v13  ;;  %v740_v24 = vshrl.u32 %v564_v15, 16  ;;  %v743_v25 = vshll.u32 %v564_v15, 16  ;;  %v2963_v31 = vsel %vm5504_vm5, %v2961_v5, %v2962_v9  ;;  %v935_v34 = vshrl.u32 %v587_v19, 16 }
  0xc8   : > { %1040 = vst [vmem:[#allocation2 + $0x20] sm:$0x1] %v1039_v14  ;;  %v460_v30 = vpop.f32.mrf.mxu0  ;;  %v938_v35 = vshll.u32 %v587_v19, 16  ;;  %v1284_v36 = vrot.slane %v1282_v23, 5  ;;  %v1879_v39 = vsel %vm5504_vm5, %v1877_v17, %v1878_v20  ;;  %v615_v40 = vsel %vm5522_vm10, 0, %v614_v12 }
  0xc9   : > { %v5658_v37 = vrot.slane %v740_v24, 7  ;;  %v461_v29 = vadd.f32 %v5554_v59, %v460_v30  ;;  %v937_v45 = vrot.slane %v935_v34, 7  ;;  %v5665_v48 = vrot.slane %v1288_v26, 5  ;;  %616 = vst [vmem:[#allocation2 + $0x30] sm:$0x1] %v615_v40 }
  0xca   : > { %v1285_v46 = vor.u32 %v1284_v36, %v1281_v22  ;;  %v665_v49 = vsel %vm5534_vm12, 0, %v664_v18  ;;  %v1292_v54 = vshrl.u32 %v5642_v11, 16  ;;  %v5000_v55 = vrot.slane %v3953_v42, 9  ;;  %v2109_v8 = vld [vmem:[#allocation2 + $0x18] sm:$0xf] }
  0xcb   : > { %v745_v50 = vor.u32 %v743_v25, %v5658_v37  ;;  %v533_v53 = vmax.f32 %v461_v29, 0.0  ;;  %666 = vst [vmem:[#allocation2 + $0x38] sm:$0x1] %v665_v49  ;;  %v746_v56 = vrot.slane %v5658_v37, 4  ;;  %v940_v57 = vor.u32 %v938_v35, %v937_v45  ;;  %v1208_v13 = vld [vmem:[#allocation2 + $0x14] sm:$0x1] }
  0xcc   : > { %3071 = vrot.lane.b32.xlu0 %v2963_v31, %s5409_s17  ;;  %v942_v58 = vrot.slane %v937_v45, 4  ;;  %v1286_v60 = vrot.slane %v1285_v46, 4  ;;  %v1567_v2 = vshrl.u32 %v1242_v44, 16  ;;  %v1570_v3 = vshll.u32 %v1242_v44, 16  ;;  %v617_v24 = vld [vmem:[#allocation2 + $0x3c] sm:$0x1] }
  0xcd   : > { %v1042_v61 = vsel %vm5569_vm13, %v745_v50, %v1041_v28  ;;  %v565_v62 = vpack.c.bf16 %v533_v53, %v533_v53  ;;  %v941_v4 = vsel %vm5582_vm15, %v933_v0, %v940_v57  ;;  %v1576_v19 = vshll.u32 %v1243_v1, 16  ;;  %v1045_v25 = vld [vmem:[#allocation2 + $0x2c] sm:$0x1]  ;;  %v1244_v29 = vld [vmem:[#allocation2 + $0xa4] sm:$0x1] }
  0xce   : > { %v3954_v63 = vld [vmem:[#allocation2 + $0x1c] sm:$0xf]  ;;  %1043 = vst [vmem:[#allocation2 + $0x24] sm:$0xf] %v1042_v61  ;;  %v1123_v5 = vsel %vm5522_vm10, %v942_v58, %v1122_v38  ;;  %1984 = vrot.lane.b32.xlu2 %v1879_v39, %s5405_s11  ;;  %v1291_v6 = vsel %vm5512_vm8, %v1286_v60, %v5665_v48  ;;  %v1569_v0 = vrot.slane %v1567_v2, 4  ;;  %v1572_v18 = vrot.slane %v1570_v3, 5 }
  0xcf   : > { %v3955_v9 = vld [vmem:[#allocation2 + $0x20] sm:$0x1]  ;;  %v4051_v10 = vrot.slane %v3954_v63, 5  ;;  %v748_v11 = vshrl.u32 %v565_v62, 16  ;;  %v751_v12 = vshll.u32 %v565_v62, 16  ;;  %1642 = vrot.lane.b32.xlu1 %v1291_v6, %s5406_s12  ;;  %v1580_v23 = vshrl.u32 %v1243_v1, 16 }
  0xd0   : > { %1121 = vst.msk [vmem:[#allocation2 + $0xac] sm:$0xf] %vm592_vm1, %v941_v4  ;;  %v4054_v52 = vrot.slane %v3955_v9, 5  ;;  %v463_v14 = vpop.f32.mrf.mxu0  ;;  %v5694_v27 = vrot.slane %v1576_v19, 5  ;;  %v1294_v28 = vrot.slane %v1292_v54, 4  ;;  %v1573_v35 = vor.u32 %v1572_v18, %v1569_v0 }
  0xd1   : > { %1124 = vst [vmem:[#allocation2 + $0xb0] sm:$0x1] %v1123_v5  ;;  %v4052_v15 = vsel %vm5504_vm5, %v5000_v55, %v4051_v10  ;;  %v4053_v17 = vrot.slane %v4051_v10, 4  ;;  %v750_v20 = vrot.slane %v748_v11, 7  ;;  %v464_v22 = vadd.f32 %v5554_v59, %v463_v14  ;;  %v2132_v44 = vld [vmem:[#allocation2 + $0xa0] sm:$0xf] }
  0xd2   : > { %4193 = vst.msk [vmem:[#allocation3 + $0x4] sm:$0xf] %vm592_vm1, %v4052_v15  ;;  %v1298_v36 = vshll.u32 %v1208_v13, 16  ;;  %v618_v37 = vsel %vm5522_vm10, 0, %v617_v24  ;;  %v1582_v38 = vrot.slane %v1580_v23, 4  ;;  %v1295_v46 = vor.u32 %v1294_v28, %v5665_v48 }
  0xd3   : > { %v4055_v26 = vsel %vm5504_vm5, %v4053_v17, %v4054_v52  ;;  %v753_v30 = vor.u32 %v751_v12, %v750_v20  ;;  %v755_v31 = vrot.slane %v750_v20, 4  ;;  %v534_v34 = vmax.f32 %v464_v22, 0.0  ;;  %4963 = vmatmul.msk.bf16.gmra.mxu0 %vm390_vm0, %v5211_v7  ;;  %v3199_v45 = vld [vmem:[#allocation2 + $0x18] sm:$0xf]  ;;  %619 = vst [vmem:[#allocation2 + $0x3c] sm:$0x1] %v618_v37 }
  0xd4   : > { %2175 = vrot.lane.b32.xlu0 %v2109_v8, %s5407_s15  ;;  %4194 = vst.msk [vmem:[#allocation3 + $0xc] sm:$0xf] %vm592_vm1, %v4055_v26  ;;  %v2133_v49 = vld [vmem:[#allocation2 + $0xa8] sm:$0xf]  ;;  %v1583_v50 = vor.u32 %v1582_v38, %v5694_v27  ;;  %v5709_v53 = vld [vmem:[#allocation2 + $0xa0] sm:$0xf] }
  0xd5   : > { %v754_v39 = vsel %vm5582_vm15, %v746_v56, %v753_v30  ;;  %v1046_v40 = vsel %vm5522_vm10, %v755_v31, %v1045_v25  ;;  %v566_v42 = vpack.c.bf16 %v534_v34, %v534_v34  ;;  %v2362_v54 = vshrl.u32 %v5613_v33, 16  ;;  %v1048_v48 = vld [vmem:[#allocation2 + $0x30] sm:$0xf]  ;;  %v1808_v3 = vld [vmem:[#allocation2 + $0xa4] sm:$0x1] }
  0xd6   : > { %1044 = vst.msk [vmem:[#allocation2 + $0x28] sm:$0xf] %vm592_vm1, %v754_v39  ;;  %2221 = vrot.lane.b32.xlu2 %v2132_v44, %s5407_s15  ;;  %v1586_v57 = vshll.u32 %v1244_v29, 16  ;;  %vm4477_vm0 = vcmask 130048   ;;  %v1574_v61 = vrot.slane %v1573_v35, 4  ;;  %v1296_v1 = vrot.slane %v1295_v46, 4 }
  0xd7   : > { %1047 = vst [vmem:[#allocation2 + $0x2c] sm:$0x1] %v1046_v40  ;;  %v757_v55 = vshrl.u32 %v566_v42, 16  ;;  %v760_v56 = vshll.u32 %v566_v42, 16  ;;  %3263 = vrot.lane.b32.xlu1 %v3199_v45, %s5410_s22  ;;  %v1300_v2 = vrot.slane %v1298_v36, 5  ;;  %v1584_v4 = vrot.slane %v1583_v50, 4 }
  0xd8   : > { %v465_v58 = vpop.f32.mrf.mxu0  ;;  %v1959_v5 = vrot.slane %v5709_v53, 5  ;;  %v667_v6 = vld [vmem:[#allocation2 + $0x44] sm:$0x1]  ;;  %v1588_v10 = vrot.slane %v1586_v57, 5  ;;  %v1579_v11 = vsel %vm5512_vm8, %v1574_v61, %v5694_v27  ;;  %v1962_v12 = vrot.slane %v1808_v3, 5 }
  0xd9   : > { %v5222_v60 = vld [vmem:[#allocation3 + $0x4] sm:$0xf]  ;;  %v5713_v62 = vrot.slane %v757_v55, 7  ;;  %v466_v63 = vadd.f32 %v5554_v59, %v465_v58  ;;  %v668_v0 = vsel %vm5534_vm12, 0, %v667_v6  ;;  %v3956_v13 = vld [vmem:[#allocation2 + $0x24] sm:$0xe]  ;;  %v1301_v20 = vsel %vm5512_vm8, %v1296_v1, %v1300_v2 }
  0xda   : > { %v1806_v52 = vld [vmem:[#allocation2 + $0x9c] sm:$0xe]  ;;  %669 = vst [vmem:[#allocation2 + $0x44] sm:$0x1] %v668_v0  ;;  %v5001_v18 = vrot.slane %v3956_v13, 9  ;;  %v2364_v19 = vrot.slane %v2362_v54, 4  ;;  %v1589_v46 = vsel %vm5512_vm8, %v1584_v4, %v1588_v10 }
  0xdb   : > { %v5020_v33 = vld [vmem:[#allocation3 + $0x8] sm:$0xf0]  ;;  %v762_v7 = vor.u32 %v760_v56, %v5713_v62  ;;  %v535_v8 = vmax.f32 %v466_v63, 0.0  ;;  %v1961_v22 = vrot.slane %v1959_v5, 4  ;;  %v4981_v27 = vrot.slane %v1806_v52, 9 }
  0xdc   : > { %2223 = vrot.lane.b32.xlu0 %v2133_v49, %s5407_s15  ;;  %v5023_v9 = vor.u32 %v5222_v60, %v5020_v33  ;;  %v1773_v28 = vld [vmem:[#allocation2 + $0x18] sm:$0xe]  ;;  %v763_v31 = vrot.slane %v5713_v62, 4  ;;  %v1052_v34 = vld [vmem:[#allocation2 + $0x38] sm:$0x1]  ;;  %v2365_v44 = vor.u32 %v2364_v19, %v5622_v51 }
  0xdd   : > { %v1049_v14 = vsel %vm5569_vm13, %v762_v7, %v1048_v48  ;;  %v567_v15 = vpack.c.bf16 %v535_v8, %v535_v8  ;;  %v3957_v17 = vld [vmem:[#allocation2 + $0x28] sm:$0xf]  ;;  %v2302_v29 = vld [vmem:[#allocation2 + $0x14] sm:$0x1]  ;;  %v5735_v42 = vld [vmem:[#allocation2 + $0x1c] sm:$0xf]  ;;  %v1963_v49 = vsel %vm5504_vm5, %v1961_v22, %v1962_v12  ;;  %v1960_v51 = vsel %vm5504_vm5, %v4981_v27, %v1959_v5 }
  0xde   : > { %5180 = vmatmul.msk.bf16.vlgmr.msra.gmra.mxu2 %vm4477_vm0, %v5023_v9  ;;  %1050 = vst [vmem:[#allocation2 + $0x30] sm:$0xf] %v1049_v14  ;;  %1690 = vrot.lane.b32.xlu2 %v1579_v11, %s5406_s12  ;;  %v3958_v23 = vld [vmem:[#allocation2 + $0x2c] sm:$0x1]  ;;  %v4058_v24 = vrot.slane %v3957_v17, 5  ;;  %v2368_v53 = vshll.u32 %v2302_v29, 16 }
  0xdf   : > { %v765_v25 = vshrl.u32 %v567_v15, 16  ;;  %v768_v26 = vshll.u32 %v567_v15, 16  ;;  %1644 = vrot.lane.b32.xlu1 %v1301_v20, %s5406_s12  ;;  %v4061_v30 = vrot.slane %v3958_v23, 5  ;;  %v620_v38 = vld [vmem:[#allocation2 + $0x48] sm:$0x1]  ;;  %v4970_v58 = vrot.slane %v1773_v28, 9 }
  0xe0   : > { %v468_v35 = vpop.f32.mrf.mxu0  ;;  %v4059_v36 = vsel %vm5504_vm5, %v5001_v18, %v4058_v24  ;;  %v4060_v37 = vrot.slane %v4058_v24, 4  ;;  %v621_v45 = vsel %vm5522_vm10, 0, %v620_v38  ;;  %v3392_v54 = vld [vmem:[#allocation2 + $0x18] sm:$0xf]  ;;  %v5751_v48 = vld [vmem:[#allocation2 + $0x1c] sm:$0xf] }
  0xe1   : > { %v767_v39 = vrot.slane %v765_v25, 7  ;;  %v469_v40 = vadd.f32 %v5554_v59, %v468_v35  ;;  %4195 = vst.msk [vmem:[#allocation3 + $0x14] sm:$0xf] %vm592_vm1, %v4059_v36  ;;  %v1882_v60 = vrot.slane %v5735_v42, 5  ;;  %v3441_v61 = vshrl.u32 %v3392_v54, 16 }
  0xe2   : > { %v4062_v50 = vsel %vm5504_vm5, %v4060_v37, %v4061_v30  ;;  %622 = vst [vmem:[#allocation2 + $0x48] sm:$0x1] %v621_v45  ;;  %v3444_v62 = vshll.u32 %v3392_v54, 16  ;;  %v2366_v3 = vrot.slane %v2365_v44, 4  ;;  %v2370_v33 = vrot.slane %v2368_v53, 5 }
  0xe3   : > { %v770_v55 = vor.u32 %v768_v26, %v767_v39  ;;  %v772_v56 = vrot.slane %v767_v39, 4  ;;  %v536_v57 = vmax.f32 %v469_v40, 0.0  ;;  %4196 = vst.msk [vmem:[#allocation3 + $0x1c] sm:$0xf] %vm592_vm1, %v4062_v50  ;;  %v3443_v4 = vrot.slane %v3441_v61, 4 }
  0xe4   : > { %1692 = vrot.lane.b32.xlu0 %v1589_v46, %s5406_s12  ;;  %v3446_v5 = vrot.slane %v3444_v62, 5  ;;  %v3450_v6 = vshll.u32 %v5751_v48, 16  ;;  %v5762_v9 = vld [vmem:[#allocation2 + $0x18] sm:$0xe]  ;;  %v1055_v10 = vld [vmem:[#allocation2 + $0x3c] sm:$0xf]  ;;  %v1883_v20 = vsel %vm5504_vm5, %v4970_v58, %v1882_v60  ;;  %v2371_v46 = vsel %vm5512_vm8, %v2366_v3, %v2370_v33 }
  0xe5   : > { %v771_v63 = vsel %vm5582_vm15, %v763_v31, %v770_v55  ;;  %v1053_v1 = vsel %vm5522_vm10, %v772_v56, %v1052_v34  ;;  %v568_v2 = vpack.c.bf16 %v536_v57, %v536_v57  ;;  %v5764_v0 = vld [vmem:[#allocation2 + $0x1c] sm:$0xf]  ;;  %v670_v13 = vld [vmem:[#allocation2 + $0x50] sm:$0x1]  ;;  %v3454_v17 = vshrl.u32 %v5751_v48, 16 }
  0xe6   : > { %1051 = vst.msk [vmem:[#allocation2 + $0x34] sm:$0xf] %vm592_vm1, %v771_v63  ;;  %2032 = vrot.lane.b32.xlu2 %v1963_v49, %s5405_s11  ;;  %v3447_v52 = vor.u32 %v3446_v5, %v3443_v4  ;;  %v671_v18 = vsel %vm5534_vm12, 0, %v670_v13  ;;  %v3959_v19 = vld [vmem:[#allocation2 + $0x30] sm:$0xe]  ;;  %v5774_v23 = vrot.slane %v3450_v6, 5 }
  0xe7   : > { %1054 = vst [vmem:[#allocation2 + $0x38] sm:$0x1] %v1053_v1  ;;  %v774_v7 = vshrl.u32 %v568_v2, 16  ;;  %v777_v8 = vshll.u32 %v568_v2, 16  ;;  %2030 = vrot.lane.b32.xlu1 %v1960_v51, %s5405_s11  ;;  %v4985_v24 = vrot.slane %v5762_v9, 9  ;;  %v2966_v28 = vrot.slane %v5764_v0, 5 }
  0xe8   : > { %v470_v11 = vpop.f32.mrf.mxu0  ;;  %v5224_v12 = vld [vmem:[#allocation3 + $0x14] sm:$0xf]  ;;  %672 = vst [vmem:[#allocation2 + $0x50] sm:$0x1] %v671_v18  ;;  %v1209_v30 = vld [vmem:[#allocation2 + $0x18] sm:$0xf] }
  0xe9   : > { %v5766_v14 = vrot.slane %v774_v7, 7  ;;  %v471_v15 = vadd.f32 %v5554_v59, %v470_v11  ;;  %v5780_v31 = vld [vmem:[#allocation2 + $0x1c] sm:$0xf]  ;;  %v3448_v35 = vrot.slane %v3447_v52, 4  ;;  %v5002_v36 = vrot.slane %v3959_v19, 9 }
  0xea   : > { %v5028_v22 = vld [vmem:[#allocation3 + $0x18] sm:$0xf0]  ;;  %v3200_v34 = vld [vmem:[#allocation2 + $0x1c] sm:$0xf]  ;;  %v1303_v37 = vshrl.u32 %v1209_v30, 16  ;;  %v5782_v29 = vrot.slane %v1882_v60, 4 }
  0xeb   : > { %v779_v25 = vor.u32 %v777_v8, %v5766_v14  ;;  %v537_v26 = vmax.f32 %v471_v15, 0.0  ;;  %v5031_v27 = vor.u32 %v5224_v12, %v5028_v22  ;;  %v5787_v40 = vld [vmem:[#allocation2 + $0x20] sm:$0x1]  ;;  %v1306_v44 = vshll.u32 %v1209_v30, 16  ;;  %v623_v51 = vld [vmem:[#allocation2 + $0x54] sm:$0x1] }
  0xec   : > { %1986 = vrot.lane.b32.xlu0 %v1883_v20, %s5405_s11  ;;  %v1312_v45 = vshll.u32 %v5780_v31, 16  ;;  %v1305_v53 = vrot.slane %v1303_v37, 4  ;;  %v780_v58 = vrot.slane %v5766_v14, 4  ;;  %v2968_v61 = vrot.slane %v2966_v28, 4  ;;  %v1059_v2 = vld [vmem:[#allocation2 + $0x44] sm:$0x1] }
  0xed   : > { %v1056_v38 = vsel %vm5569_vm13, %v779_v25, %v1055_v10  ;;  %v569_v39 = vpack.c.bf16 %v537_v26, %v537_v26  ;;  %v3960_v42 = vld [vmem:[#allocation2 + $0x34] sm:$0xf]  ;;  %v1308_v57 = vrot.slane %v1306_v44, 5  ;;  %v3453_v33 = vsel %vm5512_vm8, %v3448_v35, %v5774_v23  ;;  %v5807_v8 = vld [vmem:[#allocation2 + $0x20] sm:$0x1]  ;;  %v5811_v10 = vpop.permute.xlu0 %1980 }
  0xee   : > { %5181 = vmatmul.msk.bf16.gmra.mxu2 %vm4477_vm0, %v5031_v27  ;;  %1057 = vst [vmem:[#allocation2 + $0x3c] sm:$0xf] %v1056_v38  ;;  %3265 = vrot.lane.b32.xlu2 %v3200_v34, %s5410_s22  ;;  %v3961_v49 = vld [vmem:[#allocation2 + $0x38] sm:$0x1]  ;;  %v4065_v50 = vrot.slane %v3960_v42, 5  ;;  %v2969_v4 = vrot.slane %v5787_v40, 5  ;;  %v2967_v14 = vsel %vm5504_vm5, %v4985_v24, %v2966_v28  ;;  %v518_v42 = vpop.f32.mrf.mxu3 }
  0xef   : > { %v782_v54 = vshrl.u32 %v569_v39, 16  ;;  %v785_v55 = vshll.u32 %v569_v39, 16  ;;  %2734 = vrot.lane.b32.xlu1 %v2371_v46, %s5408_s16  ;;  %v4068_v56 = vrot.slane %v3961_v49, 5  ;;  %v1309_v6 = vor.u32 %v1308_v57, %v1305_v53  ;;  %v2303_v11 = vld [vmem:[#allocation2 + $0x18] sm:$0xf] }
  0xf0   : > { %v473_v60 = vpop.f32.mrf.mxu0  ;;  %v4066_v62 = vsel %vm5504_vm5, %v5002_v36, %v4065_v50  ;;  %v4067_v63 = vrot.slane %v4065_v50, 4  ;;  %v5805_v7 = vrot.slane %v1312_v45, 5  ;;  %v624_v9 = vsel %vm5522_vm10, 0, %v623_v51  ;;  %v2110_v15 = vld [vmem:[#allocation2 + $0x1c] sm:$0xf] }
  0xf1   : > { %v784_v1 = vrot.slane %v782_v54, 7  ;;  %v474_v3 = vadd.f32 %v5554_v59, %v473_v60  ;;  %4197 = vst.msk [vmem:[#allocation3 + $0x24] sm:$0xf] %vm592_vm1, %v4066_v62  ;;  %v1316_v13 = vshrl.u32 %v5780_v31, 16  ;;  %v5818_v18 = vld [vmem:[#allocation2 + $0xa8] sm:$0xe]  ;;  %v519_v53 = vadd.f32 %v5554_v59, %v518_v42 }
  0xf2   : > { %v4069_v5 = vsel %vm5504_vm5, %v4067_v63, %v4068_v56  ;;  %625 = vst [vmem:[#allocation2 + $0x54] sm:$0x1] %v624_v9  ;;  %v5820_v19 = vld [vmem:[#allocation2 + $0xac] sm:$0xf]  ;;  %v2373_v20 = vshrl.u32 %v2303_v11, 16  ;;  %v2376_v22 = vshll.u32 %v2303_v11, 16 }
  0xf3   : > { %v787_v12 = vor.u32 %v785_v55, %v784_v1  ;;  %v789_v52 = vrot.slane %v784_v1, 4  ;;  %v538_v0 = vmax.f32 %v474_v3, 0.0  ;;  %4198 = vst.msk [vmem:[#allocation3 + $0x2c] sm:$0xf] %vm592_vm1, %v4069_v5  ;;  %v1885_v30 = vrot.slane %v5807_v8, 5 }
  0xf4   : > { %3824 = vrot.lane.b32.xlu0 %v3453_v33, %s5411_s23  ;;  %v2304_v34 = vld [vmem:[#allocation2 + $0x1c] sm:$0xf]  ;;  %v1310_v24 = vrot.slane %v1309_v6, 4  ;;  %v2375_v28 = vrot.slane %v2373_v20, 4  ;;  %v5829_v36 = vld [vmem:[#allocation2 + $0x20] sm:$0x1] }
  0xf5   : > { %v788_v25 = vsel %vm5582_vm15, %v780_v58, %v787_v12  ;;  %v1060_v26 = vsel %vm5522_vm10, %v789_v52, %v1059_v2  ;;  %v570_v27 = vpack.c.bf16 %v538_v0, %v538_v0  ;;  %v673_v35 = vld [vmem:[#allocation2 + $0x5c] sm:$0x1]  ;;  %v2378_v39 = vrot.slane %v2376_v22, 5  ;;  %v1062_v44 = vld [vmem:[#allocation2 + $0x48] sm:$0xf]  ;;  %v1639_v9 = vpop.permute.xlu0 %1638 }
  0xf6   : > { %1058 = vst.msk [vmem:[#allocation2 + $0x40] sm:$0xf] %vm592_vm1, %v788_v25  ;;  %3073 = vrot.lane.b32.xlu2 %v2967_v14, %s5409_s17  ;;  %v674_v40 = vsel %vm5534_vm12, 0, %v673_v35  ;;  %v2382_v49 = vshll.u32 %v2304_v34, 16  ;;  %v2386_v50 = vshrl.u32 %v2304_v34, 16  ;;  %v4982_v56 = vrot.slane %v5818_v18, 9 }
  0xf7   : > { %1061 = vst [vmem:[#allocation2 + $0x44] sm:$0x1] %v1060_v26  ;;  %v791_v37 = vshrl.u32 %v570_v27, 16  ;;  %v794_v38 = vshll.u32 %v570_v27, 16  ;;  %2177 = vrot.lane.b32.xlu1 %v2110_v15, %s5407_s15  ;;  %v1966_v57 = vrot.slane %v5820_v19, 5  ;;  %v2970_v58 = vsel %vm5504_vm5, %v2968_v61, %v2969_v4 }
  0xf8   : > { %v475_v45 = vpop.f32.mrf.mxu0  ;;  %v5226_v46 = vld [vmem:[#allocation3 + $0x24] sm:$0xf]  ;;  %675 = vst [vmem:[#allocation2 + $0x5c] sm:$0x1] %v674_v40  ;;  %v647_v51 = vld [vmem:[#allocation2 + $0xb4] sm:$0x1]  ;;  %v1315_v62 = vsel %vm5512_vm8, %v1310_v24, %v5805_v7  ;;  %v2379_v61 = vor.u32 %v2378_v39, %v2375_v28  ;;  %v1886_v15 = vsel %vm5504_vm5, %v5782_v29, %v1885_v30  ;;  %v1979_v30 = vpop.permute.xlu2 %1978 }
  0xf9   : > { %v5835_v54 = vrot.slane %v791_v37, 7  ;;  %v476_v55 = vadd.f32 %v5554_v59, %v475_v45  ;;  %v556_v63 = vmax.f32 %v519_v53, 0.0  ;;  %v648_v1 = vsel %vm5522_vm10, 0, %v647_v51  ;;  %v3962_v2 = vld [vmem:[#allocation2 + $0x3c] sm:$0xe] }
  0xfa   : > { %v5036_v60 = vld [vmem:[#allocation3 + $0x28] sm:$0xf0]  ;;  %649 = vst [vmem:[#allocation2 + $0xb4] sm:$0x1] %v648_v1  ;;  %v2392_v5 = vshll.u32 %v5829_v36, 16  ;;  %v5850_v4 = vrot.slane %v2382_v49, 5  ;;  %v1967_v18 = vsel %vm5504_vm5, %v4982_v56, %v1966_v57 }
  0xfb   : > { %v796_v59 = vor.u32 %v794_v38, %v5835_v54  ;;  %v539_v3 = vmax.f32 %v476_v55, 0.0  ;;  %v5039_v33 = vor.u32 %v5226_v46, %v5036_v60  ;;  %v588_v6 = vpack.c.bf16 %v556_v63, %v556_v63  ;;  %v1139_v11 = vld [vmem:[#allocation2] sm:$0xf]  ;;  %v1066_v28 = vld [vmem:[#allocation2 + $0x50] sm:$0x1] }
  0xfc   : > { %3075 = vrot.lane.b32.xlu0 %v2970_v58, %s5409_s17  ;;  %v5852_v8 = vrot.slane %v2386_v50, 4  ;;  %v5003_v14 = vrot.slane %v3962_v2, 9  ;;  %1171 = vst.msk [vmem:[#allocation3] sm:$0xf] %vm592_vm1, %v1139_v11  ;;  %v797_v24 = vrot.slane %v5835_v54, 4  ;;  %v2380_v37 = vrot.slane %v2379_v61, 4 }
  0xfd   : > { %v1063_v12 = vsel %vm5569_vm13, %v796_v59, %v1062_v44  ;;  %v571_v52 = vpack.c.bf16 %v539_v3, %v539_v3  ;;  %v3963_v0 = vld [vmem:[#allocation2 + $0x40] sm:$0xf]  ;;  %v944_v20 = vshrl.u32 %v588_v6, 16  ;;  %v947_v22 = vshll.u32 %v588_v6, 16  ;;  %1735 = vst.msk [vmem:[#allocation3] sm:$0xf] %vm1734_vm2, %v1639_v9  ;;  %v1641_v61 = vpop.permute.xlu0 %1640 }
  0xfe   : > { %5182 = vmatmul.msk.bf16.gmra.mxu2 %vm4477_vm0, %v5039_v33  ;;  %1064 = vst [vmem:[#allocation2 + $0x48] sm:$0xf] %v1063_v12  ;;  %1646 = vrot.lane.b32.xlu2 %v1315_v62, %s5406_s12  ;;  %v3964_v25 = vld [vmem:[#allocation2 + $0x44] sm:$0x1]  ;;  %v4072_v34 = vrot.slane %v3963_v0, 5  ;;  %v2389_v50 = vor.u32 %v5852_v8, %v5850_v4  ;;  %v1318_v54 = vrot.slane %v1316_v13, 4  ;;  %v2385_v59 = vsel %vm5512_vm8, %v2380_v37, %v5850_v4 }
  0xff   : > { %v799_v26 = vshrl.u32 %v571_v52, 16  ;;  %v802_v27 = vshll.u32 %v571_v52, 16  ;;  %1988 = vrot.lane.b32.xlu1 %v1886_v15, %s5405_s11  ;;  %v4075_v35 = vrot.slane %v3964_v25, 5  ;;  %v5868_v29 = vrot.slane %v944_v20, 7  ;;  %v5874_v39 = vld [vmem:[%s7313_s2] ss:$0 sm:$0xff] }
 0x100   : > { %v478_v36 = vpop.f32.mrf.mxu0  ;;  %v4073_v42 = vsel %vm5504_vm5, %v5003_v14, %v4072_v34  ;;  %v4074_v44 = vrot.slane %v4072_v34, 4  ;;  %2075 = vst.msk [vmem:[#allocation3] sm:$0xf] %vm2074_vm3, %v1979_v30  ;;  %v626_v45 = vld [vmem:[#allocation2 + $0x60] sm:$0x1]  ;;  %v2394_v63 = vrot.slane %v2392_v5, 5  ;;  %v1319_v6 = vor.u32 %v1318_v54, %v5805_v7 }
 0x101   : > { %v801_v38 = vrot.slane %v799_v26, 7  ;;  %v479_v40 = vadd.f32 %v5874_v39, %v478_v36  ;;  %v949_v46 = vor.u32 %v947_v22, %v5868_v29  ;;  %v1125_v49 = vld [vmem:[#allocation2 + $0xb4] sm:$0xf]  ;;  %4199 = vst.msk [vmem:[#allocation3 + $0x34] sm:$0xf] %vm592_vm1, %v4073_v42  ;;  %v627_v53 = vsel %vm5522_vm10, 0, %v626_v45 }
 0x102   : > { %v4076_v58 = vsel %vm5504_vm5, %v4074_v44, %v4075_v35  ;;  %628 = vst [vmem:[#allocation2 + $0x60] sm:$0x1] %v627_v53  ;;  %v2134_v60 = vld [vmem:[#allocation2 + $0xac] sm:$0xf]  ;;  %v1211_v1 = vld [vmem:[#allocation2 + $0x20] sm:$0x1] }
 0x103   : > { %v804_v55 = vor.u32 %v802_v27, %v801_v38  ;;  %v806_v56 = vrot.slane %v801_v38, 4  ;;  %v540_v51 = vmax.f32 %v479_v40, 0.0  ;;  %v1126_v62 = vsel %vm5569_vm13, %v949_v46, %v1125_v49  ;;  %4200 = vst.msk [vmem:[#allocation3 + $0x3c] sm:$0xf] %vm592_vm1, %v4076_v58  ;;  %v1140_v3 = vld [vmem:[#allocation2 + $0x4] sm:$0xf]  ;;  %v520_v49 = vpop.f32.mrf.mxu3 }
 0x104   : > { %2034 = vrot.lane.b32.xlu0 %v1967_v18, %s5405_s11  ;;  %1127 = vst [vmem:[#allocation2 + $0xb4] sm:$0xf] %v1126_v62  ;;  %v3394_v33 = vld [vmem:[#allocation2 + $0x20] sm:$0x1]  ;;  %v2390_v5 = vrot.slane %v2389_v50, 4  ;;  %v1322_v8 = vshll.u32 %v1211_v1, 16 }
 0x105   : > { %v805_v31 = vsel %vm5582_vm15, %v797_v24, %v804_v55  ;;  %v1067_v13 = vsel %vm5522_vm10, %v806_v56, %v1066_v28  ;;  %v572_v2 = vpack.c.bf16 %v540_v51, %v540_v51  ;;  %v3456_v9 = vrot.slane %v3454_v17, 4  ;;  %v676_v4 = vld [vmem:[#allocation2 + $0x68] sm:$0x1]  ;;  %1172 = vst.msk [vmem:[#allocation3 + $0x8] sm:$0xf] %vm592_vm1, %v1140_v3 }
 0x106   : > { %1065 = vst.msk [vmem:[#allocation2 + $0x4c] sm:$0xf] %vm592_vm1, %v805_v31  ;;  %2736 = vrot.lane.b32.xlu2 %v2385_v59, %s5408_s16  ;;  %v3460_v14 = vshll.u32 %v3394_v33, 16  ;;  %v677_v15 = vsel %vm5534_vm12, 0, %v676_v4  ;;  %v1069_v18 = vld [vmem:[#allocation2 + $0x54] sm:$0xf]  ;;  %v2395_v20 = vsel %vm5512_vm8, %v2390_v5, %v2394_v63 }
 0x107   : > { %1068 = vst [vmem:[#allocation2 + $0x50] sm:$0x1] %v1067_v13  ;;  %v808_v11 = vshrl.u32 %v572_v2, 16  ;;  %v811_v12 = vshll.u32 %v572_v2, 16  ;;  %2225 = vrot.lane.b32.xlu1 %v2134_v60, %s5407_s15  ;;  %v3457_v0 = vor.u32 %v3456_v9, %v5774_v23  ;;  %v5919_v22 = vrot.slane %v1319_v6, 4 }
 0x108   : > { %v480_v52 = vpop.f32.mrf.mxu0  ;;  %v5228_v17 = vld [vmem:[#allocation3 + $0x34] sm:$0xf]  ;;  %1736 = vst.msk [vmem:[#allocation3 + $0x8] sm:$0xf] %vm1734_vm2, %v1641_v61  ;;  %v5921_v23 = vrot.slane %v1322_v8, 5  ;;  %v950_v27 = vrot.slane %v5868_v29, 4  ;;  %v521_v2 = vadd.f32 %v5874_v39, %v520_v49 }
 0x109   : > { %v5911_v7 = vrot.slane %v808_v11, 7  ;;  %v481_v48 = vadd.f32 %v5874_v39, %v480_v52  ;;  %2076 = vst.msk [vmem:[#allocation3 + $0x8] sm:$0xf] %vm2074_vm3, %v5811_v10  ;;  %v2111_v35 = vld [vmem:[#allocation2 + $0x24] sm:$0xf]  ;;  %v5926_v36 = vrot.slane %v3457_v0, 4 }
 0x10a   : > { %v5044_v34 = vld [vmem:[#allocation3 + $0x38] sm:$0xf0]  ;;  %678 = vst [vmem:[#allocation2 + $0x68] sm:$0x1] %v677_v15  ;;  %v3201_v28 = vld [vmem:[#allocation2 + $0x24] sm:$0xf]  ;;  %v1325_v19 = vsel %vm5512_vm8, %v5919_v22, %v5921_v23 }
 0x10b   : > { %v813_v25 = vor.u32 %v811_v12, %v5911_v7  ;;  %v541_v26 = vmax.f32 %v481_v48, 0.0  ;;  %v5047_v24 = vor.u32 %v5228_v17, %v5044_v34  ;;  %v5928_v37 = vrot.slane %v3460_v14, 5  ;;  %v5936_v40 = vld [vmem:[#allocation2 + $0x24] sm:$0xe]  ;;  %v3965_v42 = vld [vmem:[#allocation2 + $0x48] sm:$0xe] }
 0x10c   : > { %2738 = vrot.lane.b32.xlu0 %v2395_v20, %s5408_s16  ;;  %v5932_v10 = vrot.slane %v1966_v57, 4  ;;  %v5004_v45 = vrot.slane %v3965_v42, 9  ;;  %v814_v50 = vrot.slane %v5911_v7, 4  ;;  %v5946_v55 = vld [vmem:[#allocation2 + $0x28] sm:$0xf]  ;;  %v4986_v61 = vrot.slane %v5936_v40, 9 }
 0x10d   : > { %v1070_v30 = vsel %vm5569_vm13, %v813_v25, %v1069_v18  ;;  %v573_v38 = vpack.c.bf16 %v541_v26, %v541_v26  ;;  %v3966_v44 = vld [vmem:[#allocation2 + $0x4c] sm:$0xf]  ;;  %v1073_v51 = vld [vmem:[#allocation2 + $0x5c] sm:$0x1]  ;;  %v2112_v60 = vld [vmem:[#allocation2 + $0x28] sm:$0xf]  ;;  %v3463_v62 = vsel %vm5512_vm8, %v5926_v36, %v5928_v37 }
 0x10e   : > { %1071 = vst [vmem:[#allocation2 + $0x54] sm:$0xf] %v1070_v30  ;;  %5183 = vmatmul.msk.bf16.gmra.mxu2 %vm4477_vm0, %v5047_v24  ;;  %2179 = vrot.lane.b32.xlu2 %v2111_v35, %s5407_s15  ;;  %v3967_v57 = vld [vmem:[#allocation2 + $0x50] sm:$0x1]  ;;  %v4079_v46 = vrot.slane %v3966_v44, 5  ;;  %v2973_v6 = vrot.slane %v5946_v55, 5 }
 0x10f   : > { %v816_v53 = vshrl.u32 %v573_v38, 16  ;;  %v819_v54 = vshll.u32 %v573_v38, 16  ;;  %3267 = vrot.lane.b32.xlu1 %v3201_v28, %s5410_s22  ;;  %v4082_v56 = vrot.slane %v3967_v57, 5  ;;  %v1245_v31 = vld [vmem:[#allocation2 + $0xa8] sm:$0xf]  ;;  %v557_v48 = vmax.f32 %v521_v2, 0.0 }
 0x110   : > { %v483_v58 = vpop.f32.mrf.mxu0  ;;  %v4080_v63 = vsel %vm5504_vm5, %v5004_v45, %v4079_v46  ;;  %v4081_v1 = vrot.slane %v4079_v46, 4  ;;  %v5954_v13 = vld [vmem:[#allocation2 + $0xac] sm:$0xf]  ;;  %v1591_v33 = vshrl.u32 %v1245_v31, 16  ;;  %v1594_v5 = vshll.u32 %v1245_v31, 16 }
 0x111   : > { %v818_v59 = vrot.slane %v816_v53, 7  ;;  %v484_v3 = vadd.f32 %v5874_v39, %v483_v58  ;;  %4201 = vst.msk [vmem:[#allocation3 + $0x44] sm:$0xf] %vm592_vm1, %v4080_v63  ;;  %v1600_v9 = vshll.u32 %v5954_v13, 16  ;;  %v629_v11 = vld [vmem:[#allocation2 + $0x6c] sm:$0x1]  ;;  %v589_v34 = vpack.c.bf16 %v557_v48, %v557_v48 }
 0x112   : > { %v4083_v8 = vsel %vm5504_vm5, %v4081_v1, %v4082_v56  ;;  %v1593_v0 = vrot.slane %v1591_v33, 4  ;;  %v1596_v14 = vrot.slane %v1594_v5, 5  ;;  %v1604_v15 = vshrl.u32 %v5954_v13, 16  ;;  %v697_v17 = vld [vmem:[#allocation2 + $0xbc] sm:$0x1] }
 0x113   : > { %v821_v12 = vor.u32 %v819_v54, %v818_v59  ;;  %v823_v4 = vrot.slane %v818_v59, 4  ;;  %v542_v52 = vmax.f32 %v484_v3, 0.0  ;;  %4202 = vst.msk [vmem:[#allocation3 + $0x4c] sm:$0xf] %vm592_vm1, %v4083_v8  ;;  %v630_v7 = vsel %vm5522_vm10, 0, %v629_v11 }
 0x114   : > { %2181 = vrot.lane.b32.xlu0 %v2112_v60, %s5407_s15  ;;  %631 = vst [vmem:[#allocation2 + $0x6c] sm:$0x1] %v630_v7  ;;  %v698_v23 = vsel %vm5534_vm12, 0, %v697_v17  ;;  %v1212_v25 = vld [vmem:[#allocation2 + $0x24] sm:$0xf]  ;;  %v1597_v26 = vor.u32 %v1596_v14, %v1593_v0  ;;  %v1602_v30 = vrot.slane %v1600_v9, 5  ;;  %v2974_v54 = vsel %vm5504_vm5, %v4986_v61, %v2973_v6 }
 0x115   : > { %v822_v18 = vsel %vm5582_vm15, %v814_v50, %v821_v12  ;;  %v1074_v20 = vsel %vm5522_vm10, %v823_v4, %v1073_v51  ;;  %v574_v22 = vpack.c.bf16 %v542_v52, %v542_v52  ;;  %v5977_v35 = vld [vmem:[#allocation2 + $0x28] sm:$0xf]  ;;  %v1327_v24 = vshrl.u32 %v1212_v25, 16  ;;  %699 = vst [vmem:[#allocation2 + $0xbc] sm:$0x1] %v698_v23 }
 0x116   : > { %1072 = vst.msk [vmem:[#allocation2 + $0x58] sm:$0xf] %vm592_vm1, %v822_v18  ;;  %1648 = vrot.lane.b32.xlu2 %v1325_v19, %s5406_s12  ;;  %v1330_v28 = vshll.u32 %v1212_v25, 16  ;;  %v1336_v38 = vshll.u32 %v5977_v35, 16  ;;  %v1598_v57 = vrot.slane %v1597_v26, 4  ;;  %v952_v19 = vshrl.u32 %v589_v34, 16 }
 0x117   : > { %1075 = vst [vmem:[#allocation2 + $0x5c] sm:$0x1] %v1074_v20  ;;  %v825_v36 = vshrl.u32 %v574_v22, 16  ;;  %v828_v37 = vshll.u32 %v574_v22, 16  ;;  %3826 = vrot.lane.b32.xlu1 %v3463_v62, %s5411_s23  ;;  %v955_v49 = vshll.u32 %v589_v34, 16  ;;  %v1329_v50 = vrot.slane %v1327_v24, 4 }
 0x118   : > { %v485_v40 = vpop.f32.mrf.mxu0  ;;  %v2174_v42 = vpop.permute.xlu2 %2173  ;;  %v5230_v44 = vld [vmem:[#allocation3 + $0x44] sm:$0xf]  ;;  %v1076_v53 = vld [vmem:[#allocation2 + $0x60] sm:$0xf]  ;;  %v1603_v51 = vsel %vm5512_vm8, %v1598_v57, %v1602_v30  ;;  %v954_v58 = vrot.slane %v952_v19, 7  ;;  %v1332_v60 = vrot.slane %v1330_v28, 5 }
 0x119   : > { %v5981_v45 = vrot.slane %v825_v36, 7  ;;  %v486_v46 = vadd.f32 %v5874_v39, %v485_v40  ;;  %2269 = vst.msk [vmem:[#allocation3 + $0x8] sm:$0xf] %vm2267_vm4, %v2174_v42  ;;  %v2135_v31 = vld [vmem:[#allocation2 + $0xb4] sm:$0xf]  ;;  %v5993_v13 = vrot.slane %v1336_v38, 5  ;;  %v523_v19 = vpop.f32.mrf.mxu3 }
 0x11a   : > { %v5052_v56 = vld [vmem:[#allocation3 + $0x48] sm:$0xf0]  ;;  %v1247_v2 = vld [vmem:[#allocation2 + $0xb0] sm:$0x1]  ;;  %v957_v59 = vor.u32 %v955_v49, %v954_v58  ;;  %v959_v3 = vrot.slane %v954_v58, 4  ;;  %v1333_v33 = vor.u32 %v1332_v60, %v1329_v50  ;;  %v1606_v5 = vrot.slane %v1604_v15, 4 }
 0x11b   : > { %v830_v62 = vor.u32 %v828_v37, %v5981_v45  ;;  %v543_v63 = vmax.f32 %v486_v46, 0.0  ;;  %v5055_v1 = vor.u32 %v5230_v44, %v5052_v56  ;;  %v1811_v61 = vld [vmem:[#allocation2 + $0xb0] sm:$0x1]  ;;  %v679_v8 = vld [vmem:[#allocation2 + $0x74] sm:$0x1]  ;;  %v831_v9 = vrot.slane %v5981_v45, 4 }
 0x11c   : > { %3077 = vrot.lane.b32.xlu0 %v2974_v54, %s5409_s17  ;;  %v1610_v4 = vshll.u32 %v1247_v2, 16  ;;  %v5998_v52 = vld [vmem:[#allocation2 + $0x28] sm:$0xf]  ;;  %v6000_v0 = vld [vmem:[#allocation2 + $0x2c] sm:$0x1]  ;;  %v958_v14 = vsel %vm5582_vm15, %v950_v27, %v957_v59  ;;  %v1334_v15 = vrot.slane %v1333_v33, 4  ;;  %v1607_v7 = vor.u32 %v1606_v5, %v1602_v30 }
 0x11d   : > { %v1077_v11 = vsel %vm5569_vm13, %v830_v62, %v1076_v53  ;;  %v575_v12 = vpack.c.bf16 %v543_v63, %v543_v63  ;;  %v680_v48 = vsel %vm5534_vm12, 0, %v679_v8  ;;  %v3968_v17 = vld [vmem:[#allocation2 + $0x54] sm:$0xe]  ;;  %1128 = vst.msk [vmem:[#allocation2 + $0xb8] sm:$0xf] %vm592_vm1, %v958_v14  ;;  %v1969_v37 = vrot.slane %v1811_v61, 5 }
 0x11e   : > { %1078 = vst [vmem:[#allocation2 + $0x60] sm:$0xf] %v1077_v11  ;;  %5184 = vmatmul.msk.bf16.gmra.mxu2 %vm4477_vm0, %v5055_v1  ;;  %2227 = vrot.lane.b32.xlu2 %v2135_v31, %s5407_s15  ;;  %v1129_v22 = vld [vmem:[#allocation2 + $0xbc] sm:$0x1]  ;;  %v1080_v23 = vld [vmem:[#allocation2 + $0x68] sm:$0x1]  ;;  %v1339_v38 = vsel %vm5512_vm8, %v1334_v15, %v5993_v13 }
 0x11f   : > { %v833_v18 = vshrl.u32 %v575_v12, 16  ;;  %v836_v20 = vshll.u32 %v575_v12, 16  ;;  %1694 = vrot.lane.b32.xlu1 %v1603_v51, %s5406_s12  ;;  %v1130_v29 = vsel %vm5522_vm10, %v959_v3, %v1129_v22  ;;  %v1608_v27 = vrot.slane %v1607_v7, 4  ;;  %681 = vst [vmem:[#allocation2 + $0x74] sm:$0x1] %v680_v48 }
 0x120   : > { %v488_v25 = vpop.f32.mrf.mxu0  ;;  %v6012_v26 = vpop.permute.xlu2 %3069  ;;  %v1612_v34 = vrot.slane %v1610_v4, 5  ;;  %v3969_v24 = vld [vmem:[#allocation2 + $0x58] sm:$0xf]  ;;  %1131 = vst [vmem:[#allocation2 + $0xbc] sm:$0x1] %v1130_v29  ;;  %v1889_v30 = vrot.slane %v5998_v52, 5  ;;  %v1970_v59 = vsel %vm5504_vm5, %v5932_v10, %v1969_v37 }
 0x121   : > { %v835_v28 = vrot.slane %v833_v18, 7  ;;  %v489_v36 = vadd.f32 %v5874_v39, %v488_v25  ;;  %v1892_v40 = vrot.slane %v6000_v0, 5  ;;  %v3970_v42 = vld [vmem:[#allocation2 + $0x5c] sm:$0x1]  ;;  %v5005_v44 = vrot.slane %v3968_v17, 9 }
 0x122   : > { %v4086_v57 = vrot.slane %v3969_v24, 5  ;;  %v1613_v50 = vsel %vm5512_vm8, %v1608_v27, %v1612_v34  ;;  %v2306_v53 = vld [vmem:[#allocation2 + $0x24] sm:$0xf]  ;;  %v4089_v51 = vrot.slane %v3970_v42, 5  ;;  %v6027_v58 = vld [vmem:[#allocation2 + $0x28] sm:$0xf]  ;;  %v524_v18 = vadd.f32 %v5874_v39, %v523_v19  ;;  %v525_v42 = vpop.f32.mrf.mxu3 }
 0x123   : > { %v838_v45 = vor.u32 %v836_v20, %v835_v28  ;;  %v840_v46 = vrot.slane %v835_v28, 4  ;;  %v544_v49 = vmax.f32 %v489_v36, 0.0  ;;  %v2397_v60 = vshrl.u32 %v2306_v53, 16  ;;  %v632_v2 = vld [vmem:[#allocation2 + $0x78] sm:$0x1] }
 0x124   : > { %1650 = vrot.lane.b32.xlu0 %v1339_v38, %s5406_s12  ;;  %v4087_v54 = vsel %vm5504_vm5, %v5005_v44, %v4086_v57  ;;  %v4088_v56 = vrot.slane %v4086_v57, 4  ;;  %v1891_v31 = vrot.slane %v1889_v30, 4  ;;  %v2400_v5 = vshll.u32 %v2306_v53, 16  ;;  %v3395_v61 = vld [vmem:[#allocation2 + $0x24] sm:$0xf] }
 0x125   : > { %v839_v62 = vsel %vm5582_vm15, %v831_v9, %v838_v45  ;;  %v1081_v63 = vsel %vm5522_vm10, %v840_v46, %v1080_v23  ;;  %v576_v1 = vpack.c.bf16 %v544_v49, %v544_v49  ;;  %4203 = vst.msk [vmem:[#allocation3 + $0x54] sm:$0xf] %vm592_vm1, %v4087_v54  ;;  %v2399_v33 = vrot.slane %v2397_v60, 4  ;;  %v1083_v14 = vld [vmem:[#allocation2 + $0x6c] sm:$0xf] }
 0x126   : > { %1079 = vst.msk [vmem:[#allocation2 + $0x64] sm:$0xf] %vm592_vm1, %v839_v62  ;;  %1696 = vrot.lane.b32.xlu2 %v1613_v50, %s5406_s12  ;;  %v4090_v3 = vsel %vm5504_vm5, %v4088_v56, %v4089_v51  ;;  %v2406_v11 = vshll.u32 %v6027_v58, 16  ;;  %v2402_v0 = vrot.slane %v2400_v5, 5  ;;  %v1893_v48 = vsel %vm5504_vm5, %v1891_v31, %v1892_v40  ;;  %v6053_v17 = vld [vmem:[#allocation2 + $0x28] sm:$0xf] }
 0x127   : > { %1082 = vst [vmem:[#allocation2 + $0x68] sm:$0x1] %v1081_v63  ;;  %v842_v8 = vshrl.u32 %v576_v1, 16  ;;  %v845_v9 = vshll.u32 %v576_v1, 16  ;;  %2036 = vrot.lane.b32.xlu1 %v1970_v59, %s5405_s11  ;;  %v633_v22 = vsel %vm5522_vm10, 0, %v632_v2  ;;  %v3465_v23 = vshrl.u32 %v3395_v61, 16 }
 0x128   : > { %v490_v12 = vpop.f32.mrf.mxu0  ;;  %v6045_v4 = vpop.permute.xlu2 %1984  ;;  %4204 = vst.msk [vmem:[#allocation3 + $0x5c] sm:$0xf] %vm592_vm1, %v4090_v3  ;;  %v2403_v20 = vor.u32 %v2402_v0, %v2399_v33  ;;  %v3468_v25 = vshll.u32 %v3395_v61, 16  ;;  %v3202_v34 = vld [vmem:[#allocation2 + $0x28] sm:$0xf]  ;;  %v6061_v24 = vrot.slane %v2406_v11, 5  ;;  %v526_v1 = vadd.f32 %v5874_v39, %v525_v42 }
 0x129   : > { %v6048_v10 = vrot.slane %v842_v8, 7  ;;  %v491_v15 = vadd.f32 %v5874_v39, %v490_v12  ;;  %v2172_v7 = vpop.permute.xlu1 %2171  ;;  %634 = vst [vmem:[#allocation2 + $0x78] sm:$0x1] %v633_v22  ;;  %v3467_v37 = vrot.slane %v3465_v23, 4  ;;  %v3474_v40 = vshll.u32 %v6053_v17, 16 }
 0x12a   : > { %2268 = vst.msk [vmem:[#allocation3] sm:$0xf] %vm2267_vm4, %v2172_v7  ;;  %v2404_v36 = vrot.slane %v2403_v20, 4  ;;  %v3470_v38 = vrot.slane %v3468_v25, 5  ;;  %v558_v19 = vmax.f32 %v524_v18, 0.0  ;;  %v2975_v7 = vrot.slane %v2973_v6, 4 }
 0x12b   : > { %v847_v29 = vor.u32 %v845_v9, %v6048_v10  ;;  %v545_v27 = vmax.f32 %v491_v15, 0.0  ;;  %v650_v45 = vld [vmem:[#allocation2 + $0xc0] sm:$0x1]  ;;  %v1776_v46 = vld [vmem:[#allocation2 + $0x24] sm:$0xe]  ;;  %v848_v49 = vrot.slane %v6048_v10, 4 }
 0x12c   : > { %1992 = vrot.lane.b32.xlu0 %v1893_v48, %s5405_s11  ;;  %v5232_v28 = vld [vmem:[#allocation3 + $0x54] sm:$0xf]  ;;  %v2409_v50 = vsel %vm5512_vm8, %v2404_v36, %v6061_v24  ;;  %v3471_v53 = vor.u32 %v3470_v38, %v3467_v37  ;;  %v651_v54 = vsel %vm5522_vm10, 0, %v650_v45  ;;  %v590_v63 = vpack.c.bf16 %v558_v19, %v558_v19  ;;  %v1087_v31 = vld [vmem:[#allocation2 + $0x74] sm:$0x1] }
 0x12d   : > { %v1084_v44 = vsel %vm5569_vm13, %v847_v29, %v1083_v14  ;;  %v577_v57 = vpack.c.bf16 %v545_v27, %v545_v27  ;;  %v2869_v56 = vld [vmem:[#allocation2 + $0x2c] sm:$0x1]  ;;  %652 = vst [vmem:[#allocation2 + $0xc0] sm:$0x1] %v651_v54  ;;  %v6077_v5 = vrot.slane %v3474_v40, 5  ;;  %v4971_v61 = vrot.slane %v1776_v46, 9 }
 0x12e   : > { %1085 = vst [vmem:[#allocation2 + $0x6c] sm:$0xf] %v1084_v44  ;;  %3269 = vrot.lane.b32.xlu2 %v3202_v34, %s5410_s22  ;;  %v3472_v33 = vrot.slane %v3471_v53, 4  ;;  %v682_v8 = vld [vmem:[#allocation2 + $0x80] sm:$0x1]  ;;  %v961_v0 = vshrl.u32 %v590_v63, 16 }
 0x12f   : > { %v850_v51 = vshrl.u32 %v577_v57, 16  ;;  %v853_v60 = vshll.u32 %v577_v57, 16  ;;  %v5060_v62 = vld [vmem:[#allocation3 + $0x58] sm:$0xf0]  ;;  %2740 = vrot.lane.b32.xlu1 %v2409_v50, %s5408_s16  ;;  %v964_v10 = vshll.u32 %v590_v63, 16  ;;  %v2976_v48 = vrot.slane %v2869_v56, 5 }
 0x130   : > { %v5063_v2 = vor.u32 %v5232_v28, %v5060_v62  ;;  %v493_v59 = vpop.f32.mrf.mxu0  ;;  %v6075_v3 = vpop.permute.xlu2 %2221  ;;  %v1165_v14 = vld [vmem:[#allocation2 + $0x9c] sm:$0xf]  ;;  %v3477_v15 = vsel %vm5512_vm8, %v3472_v33, %v6077_v5  ;;  %v683_v18 = vsel %vm5534_vm12, 0, %v682_v8  ;;  %v6092_v25 = vrot.slane %v961_v0, 7  ;;  %v700_v29 = vld [vmem:[#allocation2 + $0xc8] sm:$0x1] }
 0x131   : > { %v852_v9 = vrot.slane %v850_v51, 7  ;;  %v494_v11 = vadd.f32 %v5874_v39, %v493_v59  ;;  %v6080_v12 = vpop.permute.xlu1 %2219  ;;  %1197 = vst.msk [vmem:[#allocation3 + $0xd0] sm:$0xf] %vm592_vm1, %v1165_v14  ;;  %v1890_v55 = vsel %vm5504_vm5, %v4971_v61, %v1889_v30  ;;  %v559_v6 = vmax.f32 %v526_v1, 0.0  ;;  %v3971_v38 = vld [vmem:[#allocation2 + $0x60] sm:$0xe] }
 0x132   : > { %5185 = vmatmul.msk.bf16.gmra.mxu2 %vm4477_vm0, %v5063_v2  ;;  %684 = vst [vmem:[#allocation2 + $0x80] sm:$0x1] %v683_v18  ;;  %v966_v36 = vor.u32 %v964_v10, %v6092_v25  ;;  %v3972_v40 = vld [vmem:[#allocation2 + $0x64] sm:$0xf]  ;;  %v3973_v42 = vld [vmem:[#allocation2 + $0x68] sm:$0x1]  ;;  %v2977_v30 = vsel %vm5504_vm5, %v2975_v7, %v2976_v48 }
 0x133   : > { %v855_v20 = vor.u32 %v853_v60, %v852_v9  ;;  %v857_v22 = vrot.slane %v852_v9, 4  ;;  %v546_v23 = vmax.f32 %v494_v11, 0.0  ;;  %v2136_v44 = vld [vmem:[#allocation2 + $0xb8] sm:$0xf]  ;;  %v591_v57 = vpack.c.bf16 %v559_v6, %v559_v6  ;;  %v3203_v0 = vld [vmem:[#allocation2 + $0x30] sm:$0xf] }
 0x134   : > { %3828 = vrot.lane.b32.xlu0 %v3477_v15, %s5411_s23  ;;  %v1132_v52 = vld [vmem:[#allocation2 + $0xc0] sm:$0xf]  ;;  %v701_v19 = vsel %vm5534_vm12, 0, %v700_v29  ;;  %v5006_v50 = vrot.slane %v3971_v38, 9  ;;  %v4093_v60 = vrot.slane %v3972_v40, 5  ;;  %v4096_v62 = vrot.slane %v3973_v42, 5 }
 0x135   : > { %v856_v27 = vsel %vm5582_vm15, %v848_v49, %v855_v20  ;;  %v1088_v34 = vsel %vm5522_vm10, %v857_v22, %v1087_v31  ;;  %v578_v28 = vpack.c.bf16 %v546_v23, %v546_v23  ;;  %v1133_v49 = vsel %vm5569_vm13, %v966_v36, %v1132_v52  ;;  %v1090_v31 = vld [vmem:[#allocation2 + $0x78] sm:$0xf]  ;;  %702 = vst [vmem:[#allocation2 + $0xc8] sm:$0x1] %v701_v19  ;;  %v2113_v15 = vld [vmem:[#allocation2 + $0x30] sm:$0xf] }
 0x136   : > { %v2733_v37 = vpop.permute.xlu0 %2732  ;;  %1086 = vst.msk [vmem:[#allocation2 + $0x70] sm:$0xf] %vm592_vm1, %v856_v27  ;;  %1990 = vrot.lane.b32.xlu2 %v1890_v55, %s5405_s11  ;;  %v969_v56 = vshrl.u32 %v591_v57, 16  ;;  %v972_v51 = vshll.u32 %v591_v57, 16  ;;  %v1340_v63 = vshrl.u32 %v5977_v35, 16  ;;  %v967_v33 = vrot.slane %v6092_v25, 4 }
 0x137   : > { %1089 = vst [vmem:[#allocation2 + $0x74] sm:$0x1] %v1088_v34  ;;  %v859_v45 = vshrl.u32 %v578_v28, 16  ;;  %v862_v46 = vshll.u32 %v578_v28, 16  ;;  %3079 = vrot.lane.b32.xlu1 %v2977_v30, %s5409_s17  ;;  %v4094_v8 = vsel %vm5504_vm5, %v5006_v50, %v4093_v60  ;;  %v4095_v9 = vrot.slane %v4093_v60, 4 }
 0x138   : > { %1134 = vst [vmem:[#allocation2 + $0xc0] sm:$0xf] %v1133_v49  ;;  %v495_v53 = vpop.f32.mrf.mxu0  ;;  %v1691_v54 = vpop.permute.xlu2 %1690  ;;  %v971_v61 = vrot.slane %v969_v56, 7  ;;  %v635_v7 = vld [vmem:[#allocation2 + $0x84] sm:$0x1]  ;;  %v1342_v25 = vrot.slane %v1340_v63, 4 }
 0x139   : > { %v6113_v1 = vrot.slane %v859_v45, 7  ;;  %2829 = vst.msk [vmem:[#allocation3] sm:$0xf] %vm2828_vm6, %v2733_v37  ;;  %v496_v2 = vadd.f32 %v5874_v39, %v495_v53  ;;  %v1983_v59 = vpop.permute.xlu1 %1982  ;;  %v4097_v14 = vsel %vm5504_vm5, %v4095_v9, %v4096_v62  ;;  %v636_v22 = vsel %vm5522_vm10, 0, %v635_v7  ;;  %v1141_v23 = vld [vmem:[#allocation2 + $0xc] sm:$0xf] }
 0x13a   : > { %1761 = vst.msk [vmem:[#allocation3 + $0xd0] sm:$0xf] %vm1734_vm2, %v1691_v54  ;;  %v974_v10 = vor.u32 %v972_v51, %v971_v61  ;;  %v1248_v6 = vld [vmem:[#allocation2 + $0xb4] sm:$0xf]  ;;  %v6136_v29 = vld [vmem:[#allocation2 + $0xb8] sm:$0xf]  ;;  %v1343_v54 = vor.u32 %v1342_v25, %v5993_v13 }
 0x13b   : > { %v864_v11 = vor.u32 %v862_v46, %v6113_v1  ;;  %v547_v35 = vmax.f32 %v496_v2, 0.0  ;;  %4205 = vst.msk [vmem:[#allocation3 + $0x64] sm:$0xf] %vm592_vm1, %v4094_v8  ;;  %v976_v28 = vrot.slane %v971_v61, 4  ;;  %v2410_v36 = vshrl.u32 %v6027_v58, 16 }
 0x13c   : > { %2229 = vrot.lane.b32.xlu0 %v2136_v44, %s5407_s15  ;;  %4206 = vst.msk [vmem:[#allocation3 + $0x6c] sm:$0xf] %vm592_vm1, %v4097_v14  ;;  %v975_v55 = vsel %vm5582_vm15, %v967_v33, %v974_v10  ;;  %v865_v37 = vrot.slane %v6113_v1, 4  ;;  %v1094_v38 = vld [vmem:[#allocation2 + $0x80] sm:$0x1]  ;;  %v1615_v52 = vshrl.u32 %v1248_v6, 16 }
 0x13d   : > { %v1091_v48 = vsel %vm5569_vm13, %v864_v11, %v1090_v31  ;;  %v579_v18 = vpack.c.bf16 %v547_v35, %v547_v35  ;;  %1135 = vst.msk [vmem:[#allocation2 + $0xc4] sm:$0xf] %vm592_vm1, %v975_v55  ;;  %v1618_v30 = vshll.u32 %v1248_v6, 16  ;;  %v1624_v45 = vshll.u32 %v6136_v29, 16  ;;  %v1812_v46 = vld [vmem:[#allocation2 + $0xb4] sm:$0xe] }
 0x13e   : > { %v6129_v20 = vpop.permute.xlu0 %3071  ;;  %1092 = vst [vmem:[#allocation2 + $0x78] sm:$0xf] %v1091_v48  ;;  %3271 = vrot.lane.b32.xlu2 %v3203_v0, %s5410_s22  ;;  %v1136_v49 = vld [vmem:[#allocation2 + $0xc8] sm:$0x1]  ;;  %v1617_v50 = vrot.slane %v1615_v52, 4  ;;  %v3478_v1 = vshrl.u32 %v6053_v17, 16 }
 0x13f   : > { %v867_v27 = vshrl.u32 %v579_v18, 16  ;;  %v870_v34 = vshll.u32 %v579_v18, 16  ;;  %2183 = vrot.lane.b32.xlu1 %v2113_v15, %s5407_s15  ;;  %637 = vst [vmem:[#allocation2 + $0x84] sm:$0x1] %v636_v22  ;;  %v1620_v53 = vrot.slane %v1618_v30, 5  ;;  %v1137_v60 = vsel %vm5522_vm10, %v976_v28, %v1136_v49 }
 0x140   : > { %v498_v40 = vpop.f32.mrf.mxu0  ;;  %v6142_v42 = vpop.permute.xlu2 %2032  ;;  %1173 = vst.msk [vmem:[#allocation3 + $0x10] sm:$0xf] %vm592_vm1, %v1141_v23  ;;  %v4983_v33 = vrot.slane %v1812_v46, 9  ;;  %v1813_v35 = vld [vmem:[#allocation2 + $0xb8] sm:$0xf]  ;;  %v6158_v14 = vrot.slane %v1624_v45, 5 }
 0x141   : > { %v869_v44 = vrot.slane %v867_v27, 7  ;;  %v499_v57 = vadd.f32 %v5874_v39, %v498_v40  ;;  %v1643_v19 = vpop.permute.xlu1 %1642  ;;  %1138 = vst [vmem:[#allocation2 + $0xc8] sm:$0x1] %v1137_v60  ;;  %v1621_v2 = vor.u32 %v1620_v53, %v1617_v50  ;;  %v1214_v0 = vld [vmem:[#allocation2 + $0x2c] sm:$0x1]  ;;  %v1973_v15 = vrot.slane %v1813_v35, 5 }
 0x142   : > { %1737 = vst.msk [vmem:[#allocation3 + $0x10] sm:$0xf] %vm1734_vm2, %v1643_v19  ;;  %v5234_v62 = vld [vmem:[#allocation3 + $0x64] sm:$0xf]  ;;  %v685_v10 = vld [vmem:[#allocation2 + $0x8c] sm:$0x1] }
 0x143   : > { %v872_v56 = vor.u32 %v870_v34, %v869_v44  ;;  %v874_v51 = vrot.slane %v869_v44, 4  ;;  %v548_v63 = vmax.f32 %v499_v57, 0.0  ;;  %2077 = vst.msk [vmem:[#allocation3 + $0x10] sm:$0xf] %vm2074_vm3, %v1983_v59  ;;  %v5068_v31 = vld [vmem:[#allocation3 + $0x68] sm:$0xf0]  ;;  %v1974_v25 = vsel %vm5504_vm5, %v4983_v33, %v1973_v15 }
 0x144   : > { %v5071_v8 = vor.u32 %v5234_v62, %v5068_v31  ;;  %v1622_v59 = vrot.slane %v1621_v2, 4  ;;  %v1344_v7 = vrot.slane %v1343_v54, 4  ;;  %v1346_v22 = vshll.u32 %v1214_v0, 16  ;;  %3166 = vst.msk [vmem:[#allocation3] sm:$0xf] %vm3165_vm7, %v6012_v26 }
 0x145   : > { %v873_v61 = vsel %vm5582_vm15, %v865_v37, %v872_v56  ;;  %v1095_v13 = vsel %vm5522_vm10, %v874_v51, %v1094_v38  ;;  %v580_v9 = vpack.c.bf16 %v548_v63, %v548_v63  ;;  %v686_v6 = vsel %vm5534_vm12, 0, %v685_v10  ;;  %v1814_v52 = vld [vmem:[#allocation2 + $0xbc] sm:$0x1]  ;;  %v3974_v30 = vld [vmem:[#allocation2 + $0x6c] sm:$0xe] }
 0x146   : > { %v2176_v11 = vpop.permute.xlu0 %2175  ;;  %1093 = vst.msk [vmem:[#allocation2 + $0x7c] sm:$0xf] %vm592_vm1, %v873_v61  ;;  %5186 = vmatmul.msk.bf16.gmra.mxu2 %vm4477_vm0, %v5071_v8  ;;  %v1627_v23 = vsel %vm5512_vm8, %v1622_v59, %v6158_v14  ;;  %v1097_v28 = vld [vmem:[#allocation2 + $0x84] sm:$0xf]  ;;  %2038 = vrot.lane.b32.xlu2 %v1974_v25, %s5405_s11  ;;  %v1348_v37 = vrot.slane %v1346_v22, 5  ;;  %v1628_v57 = vshrl.u32 %v6136_v29, 16 }
 0x147   : > { %1096 = vst [vmem:[#allocation2 + $0x80] sm:$0x1] %v1095_v13  ;;  %v876_v48 = vshrl.u32 %v580_v9, 16  ;;  %v879_v18 = vshll.u32 %v580_v9, 16  ;;  %1698 = vrot.lane.b32.xlu0 %v1627_v23, %s5406_s12  ;;  %v1975_v46 = vrot.slane %v1973_v15, 4  ;;  %v1976_v49 = vrot.slane %v1814_v52, 5 }
 0x148   : > { %2270 = vst.msk [vmem:[#allocation3 + $0x10] sm:$0xf] %vm2267_vm4, %v2176_v11  ;;  %v500_v55 = vpop.f32.mrf.mxu0  ;;  %v6169_v27 = vpop.permute.xlu2 %3265  ;;  %v1349_v19 = vsel %vm5512_vm8, %v1344_v7, %v1348_v37  ;;  %v3975_v50 = vld [vmem:[#allocation2 + $0x70] sm:$0xf]  ;;  %v3976_v53 = vld [vmem:[#allocation2 + $0x74] sm:$0x1] }
 0x149   : > { %v6171_v34 = vrot.slane %v876_v48, 7  ;;  %v501_v38 = vadd.f32 %v5874_v39, %v500_v55  ;;  %687 = vst [vmem:[#allocation2 + $0x8c] sm:$0x1] %v686_v6  ;;  %v3264_v40 = vpop.permute.xlu1 %3263  ;;  %1652 = vrot.lane.b32.xlu1 %v1349_v19, %s5406_s12  ;;  %v5007_v56 = vrot.slane %v3974_v30, 9  ;;  %v4100_v51 = vrot.slane %v3975_v50, 5 }
 0x14a   : > { %3360 = vst.msk [vmem:[#allocation3] sm:$0xf] %vm3359_vm9, %v3264_v40  ;;  %v2308_v29 = vld [vmem:[#allocation2 + $0x2c] sm:$0x1]  ;;  %v4103_v31 = vrot.slane %v3976_v53, 5  ;;  %v2412_v2 = vrot.slane %v2410_v36, 4  ;;  %v1977_v35 = vsel %vm5504_vm5, %v1975_v46, %v1976_v49 }
 0x14b   : > { %v881_v44 = vor.u32 %v879_v18, %v6171_v34  ;;  %v549_v45 = vmax.f32 %v501_v38, 0.0  ;;  %v3397_v62 = vld [vmem:[#allocation2 + $0x2c] sm:$0x1]  ;;  %v882_v63 = vrot.slane %v6171_v34, 4  ;;  %v2416_v33 = vshll.u32 %v2308_v29, 16 }
 0x14c   : > { %v4101_v8 = vsel %vm5504_vm5, %v5007_v56, %v4100_v51  ;;  %v4102_v9 = vrot.slane %v4100_v51, 4  ;;  %v638_v11 = vld [vmem:[#allocation2 + $0x90] sm:$0x1]  ;;  %v2413_v0 = vor.u32 %v2412_v2, %v6061_v24  ;;  %v3480_v58 = vrot.slane %v3478_v1, 4  ;;  %v6226_v29 = vld [vmem:[#allocation2 + $0x34] sm:$0xf] }
 0x14d   : > { %v1098_v26 = vsel %vm5569_vm13, %v881_v44, %v1097_v28  ;;  %v581_v54 = vpack.c.bf16 %v549_v45, %v549_v45  ;;  %4207 = vst.msk [vmem:[#allocation3 + $0x74] sm:$0xf] %vm592_vm1, %v4101_v8  ;;  %v2418_v10 = vrot.slane %v2416_v33, 5  ;;  %v3484_v48 = vshll.u32 %v3397_v62, 16  ;;  %v1142_v22 = vld [vmem:[#allocation2 + $0x10] sm:$0xf] }
 0x14e   : > { %v6186_v60 = vpop.permute.xlu0 %2223  ;;  %1099 = vst [vmem:[#allocation2 + $0x84] sm:$0xf] %v1098_v26  ;;  %v4104_v7 = vsel %vm5504_vm5, %v4102_v9, %v4103_v31  ;;  %v2414_v24 = vrot.slane %v2413_v0, 4  ;;  %v3481_v17 = vor.u32 %v3480_v58, %v6077_v5  ;;  %v639_v1 = vsel %vm5522_vm10, 0, %v638_v11  ;;  %v688_v44 = vld [vmem:[#allocation2 + $0x98] sm:$0x1] }
 0x14f   : > { %v884_v61 = vshrl.u32 %v581_v54, 16  ;;  %v887_v13 = vshll.u32 %v581_v54, 16  ;;  %2040 = vrot.lane.b32.xlu0 %v1977_v35, %s5405_s11  ;;  %4208 = vst.msk [vmem:[#allocation3 + $0x7c] sm:$0xf] %vm592_vm1, %v4104_v7  ;;  %v3486_v34 = vrot.slane %v3484_v48, 5  ;;  %v1630_v38 = vrot.slane %v1628_v57, 4 }
 0x150   : > { %v503_v36 = vpop.f32.mrf.mxu0  ;;  %v6199_v59 = vpop.permute.xlu2 %3073  ;;  %v1101_v25 = vld [vmem:[#allocation2 + $0x8c] sm:$0x1]  ;;  %640 = vst [vmem:[#allocation2 + $0x90] sm:$0x1] %v639_v1  ;;  %v2419_v37 = vsel %vm5512_vm8, %v2414_v24, %v2418_v10  ;;  %v3204_v45 = vld [vmem:[#allocation2 + $0x34] sm:$0xf] }
 0x151   : > { %v886_v15 = vrot.slane %v884_v61, 7  ;;  %v504_v18 = vadd.f32 %v5874_v39, %v503_v36  ;;  %v1645_v23 = vpop.permute.xlu1 %1644  ;;  %v3482_v39 = vrot.slane %v3481_v17, 4  ;;  %1174 = vst.msk [vmem:[#allocation3 + $0x18] sm:$0xf] %vm592_vm1, %v1142_v22  ;;  %2742 = vrot.lane.b32.xlu2 %v2419_v37, %s5408_s16  ;;  %v1166_v57 = vld [vmem:[#allocation2 + $0xa0] sm:$0xf]  ;;  %v1631_v62 = vor.u32 %v1630_v38, %v6158_v14 }
 0x152   : > { %1738 = vst.msk [vmem:[#allocation3 + $0x18] sm:$0xf] %vm1734_vm2, %v1645_v23  ;;  %v689_v46 = vsel %vm5534_vm12, 0, %v688_v44  ;;  %v1143_v54 = vld [vmem:[#allocation2 + $0x18] sm:$0xf]  ;;  %v2430_v14 = vshll.u32 %v6226_v29, 16 }
 0x153   : > { %v889_v55 = vor.u32 %v887_v13, %v886_v15  ;;  %v891_v6 = vrot.slane %v886_v15, 4  ;;  %v550_v28 = vmax.f32 %v504_v18, 0.0  ;;  %v3487_v19 = vsel %vm5512_vm8, %v3482_v39, %v3486_v34  ;;  %2078 = vst.msk [vmem:[#allocation3 + $0x18] sm:$0xf] %vm2074_vm3, %v6045_v4  ;;  %v2309_v51 = vld [vmem:[#allocation2 + $0x30] sm:$0xf] }
 0x154   : > { %v5236_v49 = vld [vmem:[#allocation3 + $0x74] sm:$0xf]  ;;  %3830 = vrot.lane.b32.xlu1 %v3487_v19, %s5411_s23  ;;  %1198 = vst.msk [vmem:[#allocation3 + $0xd8] sm:$0xf] %vm592_vm1, %v1166_v57  ;;  %v5392_v31 = vld [vmem:[%s7313_s2] ss:$0 sm:$0xff] }
 0x155   : > { %v890_v40 = vsel %vm5582_vm15, %v882_v63, %v889_v55  ;;  %v1102_v5 = vsel %vm5522_vm10, %v891_v6, %v1101_v25  ;;  %v582_v52 = vpack.c.bf16 %v550_v28, %v550_v28  ;;  %v2421_v33 = vshrl.u32 %v2309_v51, 16  ;;  %v2114_v11 = vld [vmem:[#allocation2 + $0x34] sm:$0xf]  ;;  %v2137_v58 = vld [vmem:[#allocation2 + $0xc0] sm:$0xf]  ;;  %v5261_v34 = vld [vmem:[%s7314_s3 + $0x38] sm:$0xff] }
 0x156   : > { %v1693_v30 = vpop.permute.xlu0 %1692  ;;  %1100 = vst.msk [vmem:[#allocation2 + $0x88] sm:$0xf] %vm592_vm1, %v890_v40  ;;  %v5076_v63 = vld [vmem:[#allocation3 + $0x78] sm:$0xf0]  ;;  %v2424_v8 = vshll.u32 %v2309_v51, 16  ;;  %v6243_v15 = vrot.slane %v2430_v14, 5  ;;  %4526 = vmatpush.bf16.msra.mxu1 %v5261_v34  ;;  %5364 = vmatpush.bf16.msrb.mxu3 %v5261_v34 }
 0x157   : > { %1103 = vst [vmem:[#allocation2 + $0x8c] sm:$0x1] %v1102_v5  ;;  %v893_v50 = vshrl.u32 %v582_v52, 16  ;;  %v896_v53 = vshll.u32 %v582_v52, 16  ;;  %3273 = vrot.lane.b32.xlu0 %v3204_v45, %s5410_s22  ;;  %v5079_v61 = vor.u32 %v5236_v49, %v5076_v63  ;;  %v1104_v13 = vld [vmem:[#allocation2 + $0x90] sm:$0xf] }
 0x158   : > { %v505_v26 = vpop.f32.mrf.mxu0  ;;  %v1647_v56 = vpop.permute.xlu2 %1646  ;;  %1762 = vst.msk [vmem:[#allocation3 + $0xd8] sm:$0xf] %vm1734_vm2, %v1693_v30  ;;  %v2423_v0 = vrot.slane %v2421_v33, 4  ;;  %v2426_v36 = vrot.slane %v2424_v8, 5  ;;  %v6245_v7 = vrot.slane %v1631_v62, 4  ;;  %v5259_v62 = vld [vmem:[%s7314_s3 + $0x28] sm:$0xff] }
 0x159   : > { %v6229_v47 = vrot.slane %v893_v50, 7  ;;  %v506_v4 = vadd.f32 %v5392_v31, %v505_v26  ;;  %v2031_v2 = vpop.permute.xlu1 %2030  ;;  %2102 = vst.msk [vmem:[#allocation3 + $0xd8] sm:$0xf] %vm2074_vm3, %v6142_v42  ;;  %5187 = vmatmul.msk.bf16.gmra.mxu2 %vm4477_vm0, %v5079_v61  ;;  %2185 = vrot.lane.b32.xlu2 %v2114_v11, %s5407_s15  ;;  %v3977_v18 = vld [vmem:[#allocation2 + $0x78] sm:$0xe] }
 0x15a   : > { %690 = vst [vmem:[#allocation2 + $0x98] sm:$0x1] %v689_v46  ;;  %v3978_v22 = vld [vmem:[#allocation2 + $0x7c] sm:$0xf]  ;;  %v2427_v25 = vor.u32 %v2426_v36, %v2423_v0  ;;  %v3979_v24 = vld [vmem:[#allocation2 + $0x80] sm:$0x1] }
 0x15b   : > { %v898_v9 = vor.u32 %v896_v53, %v6229_v47  ;;  %v551_v35 = vmax.f32 %v506_v4, 0.0  ;;  %v899_v10 = vrot.slane %v6229_v47, 4  ;;  %1175 = vst.msk [vmem:[#allocation3 + $0x20] sm:$0xf] %vm592_vm1, %v1143_v54  ;;  %v5008_v17 = vrot.slane %v3977_v18, 9 }
 0x15c   : > { %v4107_v1 = vrot.slane %v3978_v22, 5  ;;  %2231 = vrot.lane.b32.xlu1 %v2137_v58, %s5407_s15  ;;  %1739 = vst.msk [vmem:[#allocation3 + $0x20] sm:$0xf] %vm1734_vm2, %v1647_v56  ;;  %v4110_v16 = vrot.slane %v3979_v24, 5  ;;  %v2428_v28 = vrot.slane %v2427_v25, 4 }
 0x15d   : > { %v1105_v48 = vsel %vm5569_vm13, %v898_v9, %v1104_v13  ;;  %v583_v42 = vpack.c.bf16 %v551_v35, %v551_v35  ;;  %2101 = vst.msk [vmem:[#allocation3 + $0xd0] sm:$0xf] %vm2074_vm3, %v2031_v2  ;;  %v2870_v38 = vld [vmem:[#allocation2 + $0x30] sm:$0xe]  ;;  %v2871_v52 = vld [vmem:[#allocation2 + $0x34] sm:$0xf] }
 0x15e   : > { %v1987_v23 = vpop.permute.xlu0 %1986  ;;  %1106 = vst [vmem:[#allocation2 + $0x90] sm:$0xf] %v1105_v48  ;;  %v4108_v37 = vsel %vm5504_vm5, %v5008_v17, %v4107_v1  ;;  %v4109_v39 = vrot.slane %v4107_v1, 4  ;;  %v4987_v30 = vrot.slane %v2870_v38, 9  ;;  %v2433_v19 = vsel %vm5512_vm8, %v2428_v28, %v6243_v15  ;;  %v1250_v46 = vld [vmem:[#allocation2 + $0xbc] sm:$0x1] }
 0x15f   : > { %v901_v55 = vshrl.u32 %v583_v42, 16  ;;  %v904_v6 = vshll.u32 %v583_v42, 16  ;;  %2294 = vst.msk [vmem:[#allocation3 + $0xd0] sm:$0xf] %vm2267_vm4, %v6186_v60  ;;  %v2980_v57 = vrot.slane %v2871_v52, 5  ;;  %v5260_v60 = vld [vmem:[%s7314_s3 + $0x30] sm:$0xff]  ;;  %2744 = vrot.lane.b32.xlu0 %v2433_v19, %s5408_s16 }
 0x160   : > { %v2737_v40 = vpop.permute.xlu2 %2736  ;;  %v4111_v45 = vsel %vm5504_vm5, %v4109_v39, %v4110_v16  ;;  %4209 = vst.msk [vmem:[#allocation3 + $0x84] sm:$0xf] %vm592_vm1, %v4108_v37  ;;  %v1634_v26 = vshll.u32 %v1250_v46, 16  ;;  %v2872_v56 = vld [vmem:[#allocation2 + $0x38] sm:$0x1]  ;;  %4527 = vmatpush.bf16.msra.mxu1 %v5260_v60  ;;  %5365 = vmatpush.bf16.msrb.mxu3 %v5260_v60 }
 0x161   : > { %v903_v5 = vrot.slane %v901_v55, 7  ;;  %v2735_v44 = vpop.permute.xlu1 %2734  ;;  %v1108_v53 = vld [vmem:[#allocation2 + $0x98] sm:$0x1]  ;;  %4210 = vst.msk [vmem:[#allocation3 + $0x8c] sm:$0xf] %vm592_vm1, %v4111_v45  ;;  %v2981_v54 = vsel %vm5504_vm5, %v4987_v30, %v2980_v57  ;;  %v2982_v51 = vrot.slane %v2980_v57, 4 }
 0x162   : > { %2079 = vst.msk [vmem:[#allocation3 + $0x20] sm:$0xf] %vm2074_vm3, %v1987_v23  ;;  %3081 = vrot.lane.b32.xlu2 %v2981_v54, %s5409_s17  ;;  %v1636_v31 = vrot.slane %v1634_v26, 5  ;;  %v2983_v4 = vrot.slane %v2872_v56, 5  ;;  %v1215_v33 = vld [vmem:[#allocation2 + $0x30] sm:$0xf] }
 0x163   : > { %v906_v49 = vor.u32 %v904_v6, %v903_v5  ;;  %v908_v50 = vrot.slane %v903_v5, 4  ;;  %2831 = vst.msk [vmem:[#allocation3 + $0x10] sm:$0xf] %vm2828_vm6, %v2737_v40  ;;  %v1216_v61 = vld [vmem:[#allocation2 + $0x34] sm:$0xf]  ;;  %v1351_v13 = vshrl.u32 %v1215_v33, 16 }
 0x164   : > { %v1354_v8 = vshll.u32 %v1215_v33, 16  ;;  %v1637_v41 = vsel %vm5512_vm8, %v6245_v7, %v1636_v31  ;;  %v1360_v43 = vshll.u32 %v1216_v61, 16  ;;  %v1364_v14 = vshrl.u32 %v1216_v61, 16  ;;  %v1779_v9 = vld [vmem:[#allocation2 + $0x30] sm:$0xe]  ;;  %4528 = vmatpush.bf16.msra.mxu1 %v5259_v62  ;;  %5366 = vmatpush.bf16.msrb.mxu3 %v5259_v62 }
 0x165   : > { %v907_v63 = vsel %vm5582_vm15, %v899_v10, %v906_v49  ;;  %v1109_v47 = vsel %vm5522_vm10, %v908_v50, %v1108_v53  ;;  %1700 = vrot.lane.b32.xlu1 %v1637_v41, %s5406_s12  ;;  %3168 = vst.msk [vmem:[#allocation3 + $0x10] sm:$0xf] %vm3165_vm7, %v6199_v59  ;;  %v1353_v11 = vrot.slane %v1351_v13, 4  ;;  %v1780_v0 = vld [vmem:[#allocation2 + $0x34] sm:$0xf]  ;;  %vm3920_vm10 = vcmask 1044352  }
 0x166   : > { %v3825_v2 = vpop.permute.xlu0 %3824  ;;  %1107 = vst.msk [vmem:[#allocation2 + $0x94] sm:$0xf] %vm592_vm1, %v907_v63  ;;  %v1356_v35 = vrot.slane %v1354_v8, 5  ;;  %v2984_v7 = vsel %vm5504_vm5, %v2982_v51, %v2983_v4  ;;  %v1362_v18 = vrot.slane %v1360_v43, 5  ;;  %v4972_v59 = vrot.slane %v1779_v9, 9 }
 0x167   : > { %1110 = vst [vmem:[#allocation2 + $0x98] sm:$0x1] %v1109_v47  ;;  %v5238_v58 = vld [vmem:[#allocation3 + $0x84] sm:$0xf]  ;;  %3083 = vrot.lane.b32.xlu0 %v2984_v7, %s5409_s17  ;;  %v1896_v23 = vrot.slane %v1780_v0, 5  ;;  %v1366_v24 = vrot.slane %v1364_v14, 4 }
 0x168   : > { %v2180_v10 = vpop.permute.xlu2 %2179  ;;  %2830 = vst.msk [vmem:[#allocation3 + $0x8] sm:$0xf] %vm2828_vm6, %v2735_v44  ;;  %v5084_v48 = vld [vmem:[#allocation3 + $0x88] sm:$0xf0]  ;;  %v1357_v42 = vor.u32 %v1356_v35, %v1353_v11  ;;  %v3982_v55 = vld [vmem:[#allocation2 + $0x8c] sm:$0x1] }
 0x169   : > { %v2178_v36 = vpop.permute.xlu1 %2177  ;;  %3167 = vst.msk [vmem:[#allocation3 + $0x8] sm:$0xf] %vm3165_vm7, %v6129_v20  ;;  %v5087_v22 = vor.u32 %v5238_v58, %v5084_v48  ;;  %v3980_v25 = vld [vmem:[#allocation2 + $0x84] sm:$0xe]  ;;  %v3981_v20 = vld [vmem:[#allocation2 + $0x88] sm:$0xf]  ;;  %v1897_v37 = vsel %vm5504_vm5, %v4972_v59, %v1896_v23  ;;  %v1367_v45 = vor.u32 %v1366_v24, %v1362_v18 }
 0x16a   : > { %3361 = vst.msk [vmem:[#allocation3 + $0x8] sm:$0xf] %vm3359_vm9, %v6169_v27  ;;  %v1358_v17 = vrot.slane %v1357_v42, 4  ;;  %v5009_v1 = vrot.slane %v3980_v25, 9  ;;  %v4114_v6 = vrot.slane %v3981_v20, 5  ;;  %v4117_v34 = vrot.slane %v3982_v55, 5 }
 0x16b   : > { %3921 = vst.msk [vmem:[#allocation3] sm:$0xf] %vm3920_vm10, %v3825_v2  ;;  %5188 = vmatmul.msk.bf16.gmra.mxu2 %vm4477_vm0, %v5087_v22  ;;  %v1781_v28 = vld [vmem:[#allocation2 + $0x38] sm:$0x1]  ;;  %v3398_v40 = vld [vmem:[#allocation2 + $0x30] sm:$0xf] }
 0x16c   : > { %2272 = vst.msk [vmem:[#allocation3 + $0x20] sm:$0xf] %vm2267_vm4, %v2180_v10  ;;  %v1363_v27 = vsel %vm5512_vm8, %v1358_v17, %v1362_v18  ;;  %v4115_v39 = vsel %vm5504_vm5, %v5009_v1, %v4114_v6  ;;  %v4116_v38 = vrot.slane %v4114_v6, 4  ;;  %v3399_v5 = vld [vmem:[#allocation2 + $0x34] sm:$0xf]  ;;  %v3489_v30 = vshrl.u32 %v3398_v40, 16 }
 0x16d   : > { %2271 = vst.msk [vmem:[#allocation3 + $0x18] sm:$0xf] %vm2267_vm4, %v2178_v36  ;;  %1654 = vrot.lane.b32.xlu2 %v1363_v27, %s5406_s12  ;;  %1994 = vrot.lane.b32.xlu1 %v1897_v37, %s5405_s11  ;;  %v2115_v52 = vld [vmem:[#allocation2 + $0x3c] sm:$0xf]  ;;  %v3492_v44 = vshll.u32 %v3398_v40, 16  ;;  %v1898_v46 = vrot.slane %v1896_v23, 4 }
 0x16e   : > { %v6302_v16 = vpop.permute.xlu0 %3075  ;;  %4211 = vst.msk [vmem:[#allocation3 + $0x94] sm:$0xf] %vm592_vm1, %v4115_v39  ;;  %v4118_v57 = vsel %vm5504_vm5, %v4116_v38, %v4117_v34  ;;  %v3498_v60 = vshll.u32 %v3399_v5, 16  ;;  %v1144_v49 = vld [vmem:[#allocation2 + $0x1c] sm:$0xf]  ;;  %v1899_v26 = vrot.slane %v1781_v28, 5 }
 0x16f   : > { %v1217_v53 = vld [vmem:[#allocation2 + $0x38] sm:$0x1]  ;;  %4212 = vst.msk [vmem:[#allocation3 + $0x9c] sm:$0xf] %vm592_vm1, %v4118_v57  ;;  %v3491_v54 = vrot.slane %v3489_v30, 4  ;;  %v3494_v56 = vrot.slane %v3492_v44, 5  ;;  %2187 = vrot.lane.b32.xlu0 %v2115_v52, %s5407_s15 }
 0x170   : > { %v1649_v19 = vpop.permute.xlu2 %1648  ;;  %v1370_v51 = vshll.u32 %v1217_v53, 16  ;;  %1176 = vst.msk [vmem:[#allocation3 + $0x28] sm:$0xf] %vm592_vm1, %v1144_v49  ;;  %v3502_v63 = vshrl.u32 %v3399_v5, 16  ;;  %v1368_v47 = vrot.slane %v1367_v45, 4  ;;  %v6320_v31 = vrot.slane %v3498_v60, 5 }
 0x171   : > { %v1989_v50 = vpop.permute.xlu1 %1988  ;;  %v3495_v62 = vor.u32 %v3494_v56, %v3491_v54  ;;  %1740 = vst.msk [vmem:[#allocation3 + $0x28] sm:$0xf] %vm1734_vm2, %v1649_v19  ;;  %v3983_v33 = vld [vmem:[#allocation2 + $0x90] sm:$0xe]  ;;  %v1900_v61 = vsel %vm5504_vm5, %v1898_v46, %v1899_v26  ;;  %v3984_v8 = vld [vmem:[#allocation2 + $0x94] sm:$0xf] }
 0x172   : > { %2080 = vst.msk [vmem:[#allocation3 + $0x28] sm:$0xf] %vm2074_vm3, %v1989_v50  ;;  %v1372_v4 = vrot.slane %v1370_v51, 5  ;;  %v3985_v41 = vld [vmem:[#allocation2 + $0x98] sm:$0x1]  ;;  %v5010_v43 = vrot.slane %v3983_v33, 9 }
 0x173   : > { %v3496_v13 = vrot.slane %v3495_v62, 4  ;;  %v4121_v9 = vrot.slane %v3984_v8, 5  ;;  %v4124_v11 = vrot.slane %v3985_v41, 5  ;;  %v2434_v35 = vshrl.u32 %v6226_v29, 16  ;;  %v1782_v58 = vld [vmem:[#allocation2 + $0x3c] sm:$0xe] }
 0x174   : > { %v5258_v36 = vld [vmem:[%s7314_s3 + $0x20] sm:$0xff]  ;;  %v1373_v22 = vsel %vm5512_vm8, %v1368_v47, %v1372_v4  ;;  %v3504_v23 = vrot.slane %v3502_v63, 4  ;;  %v1168_v25 = vld [vmem:[#allocation2 + $0xac] sm:$0xf]  ;;  %v5257_v24 = vld [vmem:[%s7314_s3 + $0x18] sm:$0xff]  ;;  %v4973_v28 = vrot.slane %v1782_v58, 9 }
 0x175   : > { %v5240_v14 = vld [vmem:[#allocation3 + $0x94] sm:$0xf]  ;;  %1996 = vrot.lane.b32.xlu2 %v1900_v61, %s5405_s11  ;;  %v3501_v0 = vsel %vm5512_vm8, %v3496_v13, %v6320_v31  ;;  %v6338_v42 = vld [vmem:[#allocation2 + $0x40] sm:$0xf]  ;;  %v4122_v29 = vsel %vm5504_vm5, %v5010_v43, %v4121_v9  ;;  %v4123_v18 = vrot.slane %v4121_v9, 4  ;;  %4529 = vmatpush.bf16.msra.mxu1 %v5258_v36  ;;  %v2436_v6 = vrot.slane %v2434_v35, 4 }
 0x176   : > { %v6323_v2 = vpop.permute.xlu0 %2034  ;;  %v5092_v48 = vld [vmem:[#allocation3 + $0x98] sm:$0xf0]  ;;  %3832 = vrot.lane.b32.xlu1 %v3501_v0, %s5411_s23  ;;  %5367 = vmatpush.bf16.msrb.mxu3 %v5258_v36  ;;  %4213 = vst.msk [vmem:[#allocation3 + $0xa4] sm:$0xf] %vm592_vm1, %v4122_v29  ;;  %v3400_v20 = vld [vmem:[#allocation2 + $0x38] sm:$0x1]  ;;  %v3505_v40 = vor.u32 %v3504_v23, %v6320_v31 }
 0x177   : > { %v5095_v59 = vor.u32 %v5240_v14, %v5092_v48  ;;  %1656 = vrot.lane.b32.xlu0 %v1373_v22, %s5406_s12  ;;  %v4125_v17 = vsel %vm5504_vm5, %v4123_v18, %v4124_v11  ;;  %v3401_v1 = vld [vmem:[#allocation2 + $0x3c] sm:$0xf]  ;;  %v2311_v55 = vld [vmem:[#allocation2 + $0x38] sm:$0x1]  ;;  %v2138_v34 = vld [vmem:[#allocation2 + $0xc4] sm:$0xf]  ;;  %v2437_v57 = vor.u32 %v2436_v6, %v6243_v15 }
 0x178   : > { %v6332_v10 = vpop.permute.xlu2 %2227  ;;  %4214 = vst.msk [vmem:[#allocation3 + $0xac] sm:$0xf] %vm592_vm1, %v4125_v17  ;;  %v3513_v27 = vshrl.u32 %v3401_v1, 16  ;;  %v3516_v39 = vshll.u32 %v3401_v1, 16  ;;  %v1903_v38 = vrot.slane %v6338_v42, 5  ;;  %v3508_v5 = vshll.u32 %v3400_v20, 16 }
 0x179   : > { %v2226_v7 = vpop.permute.xlu1 %2225  ;;  %1200 = vst.msk [vmem:[#allocation3 + $0xe8] sm:$0xf] %vm592_vm1, %v1168_v25  ;;  %4530 = vmatpush.bf16.msra.mxu1 %v5257_v24  ;;  %v5256_v30 = vld [vmem:[%s7314_s3 + $0x10] sm:$0xff]  ;;  %v3205_v44 = vld [vmem:[#allocation2 + $0x3c] sm:$0xf]  ;;  %v2440_v19 = vshll.u32 %v2311_v55, 16 }
 0x17a   : > { %2295 = vst.msk [vmem:[#allocation3 + $0xd8] sm:$0xf] %vm2267_vm4, %v2226_v7  ;;  %v3515_v52 = vrot.slane %v3513_v27, 4  ;;  %5368 = vmatpush.bf16.msrb.mxu3 %v5257_v24  ;;  %v3518_v45 = vrot.slane %v3516_v39, 5  ;;  %v6365_v60 = vld [vmem:[#allocation2 + $0x40] sm:$0xf] }
 0x17b   : > { %5189 = vmatmul.msk.bf16.gmra.mxu2 %vm4477_vm0, %v5095_v59  ;;  %v3986_v49 = vld [vmem:[#allocation2 + $0x9c] sm:$0xe]  ;;  %v3987_v50 = vld [vmem:[#allocation2 + $0xa0] sm:$0xf]  ;;  %v3988_v54 = vld [vmem:[#allocation2 + $0xa4] sm:$0x1] }
 0x17c   : > { %v3519_v26 = vor.u32 %v3518_v45, %v3515_v52  ;;  %v5011_v56 = vrot.slane %v3986_v49, 9  ;;  %v4128_v51 = vrot.slane %v3987_v50, 5  ;;  %v3506_v15 = vrot.slane %v3505_v40, 4  ;;  %v5255_v63 = vld [vmem:[%s7314_s3 + $0x8] sm:$0xff]  ;;  %v2312_v61 = vld [vmem:[#allocation2 + $0x3c] sm:$0xf] }
 0x17d   : > { %2233 = vrot.lane.b32.xlu2 %v2138_v34, %s5407_s15  ;;  %v3510_v62 = vrot.slane %v3508_v5, 5  ;;  %4531 = vmatpush.bf16.msra.mxu1 %v5256_v30  ;;  %v3990_v47 = vld [vmem:[#allocation2 + $0xac] sm:$0xf]  ;;  %v4131_v33 = vrot.slane %v3988_v54, 5  ;;  %v2438_v13 = vrot.slane %v2437_v57, 4  ;;  %v2442_v8 = vrot.slane %v2440_v19, 5 }
 0x17e   : > { %v2739_v37 = vpop.permute.xlu0 %2738  ;;  %3275 = vrot.lane.b32.xlu1 %v3205_v44, %s5410_s22  ;;  %5369 = vmatpush.bf16.msrb.mxu3 %v5256_v30  ;;  %v4129_v31 = vsel %vm5504_vm5, %v5011_v56, %v4128_v51  ;;  %v4130_v4 = vrot.slane %v4128_v51, 4  ;;  %v3522_v41 = vshll.u32 %v6365_v60, 16  ;;  %v5242_v43 = vld [vmem:[#allocation3 + $0xa4] sm:$0xf]  ;;  %v3520_v9 = vrot.slane %v3519_v26, 4  ;;  %v5254_v0 = vld [vmem:[%s7314_s3] sm:$0xff] }
 0x17f   : > { %2832 = vst.msk [vmem:[#allocation3 + $0x18] sm:$0xf] %vm2828_vm6, %v2739_v37  ;;  %v5100_v14 = vld [vmem:[#allocation3 + $0xa8] sm:$0xf0]  ;;  %v3511_v58 = vsel %vm5512_vm8, %v3506_v15, %v3510_v62  ;;  %v2313_v36 = vld [vmem:[#allocation2 + $0x40] sm:$0xf]  ;;  %v2443_v22 = vsel %vm5512_vm8, %v2438_v13, %v2442_v8 }
 0x180   : > { %3169 = vst.msk [vmem:[#allocation3 + $0x18] sm:$0xf] %vm3165_vm7, %v6302_v16  ;;  %v1697_v46 = vpop.permute.xlu2 %1696  ;;  %v1904_v16 = vsel %vm5504_vm5, %v4973_v28, %v1903_v38  ;;  %v4132_v35 = vsel %vm5504_vm5, %v4130_v4, %v4131_v33  ;;  %v2445_v48 = vshrl.u32 %v2312_v61, 16  ;;  %v2448_v7 = vshll.u32 %v2312_v61, 16  ;;  %v3989_v29 = vld [vmem:[#allocation2 + $0xa8] sm:$0xe] }
 0x181   : > { %1764 = vst.msk [vmem:[#allocation3 + $0xe8] sm:$0xf] %vm1734_vm2, %v1697_v46  ;;  %v3268_v53 = vpop.permute.xlu1 %3267  ;;  %1998 = vrot.lane.b32.xlu0 %v1904_v16, %s5405_s11  ;;  %4532 = vmatpush.bf16.msra.mxu1 %v5255_v63  ;;  %v1167_v18 = vld [vmem:[#allocation2 + $0xa8] sm:$0xf]  ;;  %v4135_v59 = vrot.slane %v3990_v47, 5  ;;  %v6394_v23 = vrot.slane %v3522_v41, 5  ;;  %v5103_v24 = vor.u32 %v5242_v43, %v5100_v14 }
 0x182   : > { %3362 = vst.msk [vmem:[#allocation3 + $0x10] sm:$0xf] %vm3359_vm9, %v3268_v53  ;;  %5370 = vmatpush.bf16.msrb.mxu3 %v5255_v63  ;;  %v2454_v20 = vshll.u32 %v2313_v36, 16  ;;  %v2458_v1 = vshrl.u32 %v2313_v36, 16  ;;  %v1145_v55 = vld [vmem:[#allocation2 + $0x24] sm:$0xf] }
 0x183   : > { %4215 = vst.msk [vmem:[#allocation3 + $0xb4] sm:$0xf] %vm592_vm1, %v4129_v31  ;;  %v3525_v6 = vsel %vm5512_vm8, %v3520_v9, %v6394_v23  ;;  %v2447_v27 = vrot.slane %v2445_v48, 4  ;;  %v2450_v34 = vrot.slane %v2448_v7, 5  ;;  %v5012_v28 = vrot.slane %v3989_v29, 9  ;;  %v5393_v37 = vld [vmem:[%s7314_s3 + $0x40] sm:$0xff] }
 0x184   : > { %4216 = vst.msk [vmem:[#allocation3 + $0xbc] sm:$0xf] %vm592_vm1, %v4132_v35  ;;  %v4137_v39 = vrot.slane %v4135_v59, 4  ;;  %v3206_v5 = vld [vmem:[#allocation2 + $0x40] sm:$0xf]  ;;  %v2456_v30 = vrot.slane %v2454_v20, 5 }
 0x185   : > { %3834 = vrot.lane.b32.xlu2 %v3511_v58, %s5411_s23  ;;  %1199 = vst.msk [vmem:[#allocation3 + $0xe0] sm:$0xf] %vm592_vm1, %v1167_v18  ;;  %4533 = vmatpush.bf16.msra.mxu1 %v5254_v0  ;;  %v4136_v40 = vsel %vm5504_vm5, %v5012_v28, %v4135_v59  ;;  %v2460_v44 = vrot.slane %v2458_v1, 4  ;;  %v1218_v19 = vld [vmem:[#allocation2 + $0x3c] sm:$0xf]  ;;  %v2451_v46 = vor.u32 %v2450_v34, %v2447_v27 }
 0x186   : > { %v2182_v11 = vpop.permute.xlu0 %2181  ;;  %2746 = vrot.lane.b32.xlu1 %v2443_v22, %s5408_s16  ;;  %5371 = vmatpush.bf16.msrb.mxu3 %v5254_v0  ;;  %1177 = vst.msk [vmem:[#allocation3 + $0x30] sm:$0xf] %vm592_vm1, %v1145_v55  ;;  %v6413_v45 = vld [vmem:[#allocation2 + $0xb8] sm:$0xf]  ;;  %v2116_v57 = vld [vmem:[#allocation2 + $0x40] sm:$0xf] }
 0x187   : > { %2273 = vst.msk [vmem:[#allocation3 + $0x28] sm:$0xf] %vm2267_vm4, %v2182_v11  ;;  %v2314_v49 = vld [vmem:[#allocation2 + $0x44] sm:$0x1]  ;;  %v3991_v50 = vld [vmem:[#allocation2 + $0xb0] sm:$0x1]  ;;  %v2461_v63 = vor.u32 %v2460_v44, %v2456_v30 }
 0x188   : > { %v3270_v25 = vpop.permute.xlu2 %3269  ;;  %v3207_v53 = vld [vmem:[#allocation2 + $0x48] sm:$0xf]  ;;  %v2873_v26 = vld [vmem:[#allocation2 + $0x3c] sm:$0xe]  ;;  %4217 = vst.msk [vmem:[#allocation3 + $0xc4] sm:$0xf] %vm592_vm1, %v4136_v40 }
 0x189   : > { %3363 = vst.msk [vmem:[#allocation3 + $0x18] sm:$0xf] %vm3359_vm9, %v3270_v25  ;;  %v3827_v17 = vpop.permute.xlu1 %3826  ;;  %3836 = vrot.lane.b32.xlu0 %v3525_v6, %s5411_s23  ;;  %v2874_v54 = vld [vmem:[#allocation2 + $0x40] sm:$0xf]  ;;  %v1375_v56 = vshrl.u32 %v1218_v19, 16  ;;  %v1378_v51 = vshll.u32 %v1218_v19, 16 }
 0x18a   : > { %3922 = vst.msk [vmem:[#allocation3 + $0x8] sm:$0xf] %vm3920_vm10, %v3827_v17  ;;  %5372 = vmatpush.bf16.msra.mxu3 %v5393_v37  ;;  %v4138_v16 = vrot.slane %v3991_v50, 5  ;;  %v2464_v47 = vshll.u32 %v2314_v49, 16  ;;  %v5018_v31 = vld [vmem:[#allocation3] sm:$0xf]  ;;  %v6451_v50 = vpop.f32.mrf.mxu2 }
 0x18b   : > { %5190 = vmatmul.msk.bf16.gmra.mxu2 %vm4477_vm0, %v5103_v24  ;;  %v2452_v33 = vrot.slane %v2451_v46, 4  ;;  %v4142_v8 = vrot.slane %v6413_v45, 5  ;;  %v4988_v41 = vrot.slane %v2873_v26, 9  ;;  %v2987_v43 = vrot.slane %v2874_v54, 5  ;;  %v3992_v58 = vld [vmem:[#allocation2 + $0xb4] sm:$0xe] }
 0x18c   : > { %v4139_v13 = vsel %vm5504_vm5, %v4137_v39, %v4138_v16  ;;  %v1377_v14 = vrot.slane %v1375_v56, 4  ;;  %v1380_v9 = vrot.slane %v1378_v51, 5  ;;  %v2462_v11 = vrot.slane %v2461_v63, 4  ;;  %v1221_v48 = vld [vmem:[#allocation2 + $0x48] sm:$0xf] }
 0x18d   : > { %3277 = vrot.lane.b32.xlu2 %v3206_v5, %s5410_s22  ;;  %v2466_v35 = vrot.slane %v2464_v47, 5  ;;  %4218 = vst.msk [vmem:[#allocation3 + $0xcc] sm:$0xf] %vm592_vm1, %v4139_v13  ;;  %v2457_v36 = vsel %vm5512_vm8, %v2452_v33, %v2456_v30  ;;  %v4144_v7 = vrot.slane %v4142_v8, 4  ;;  %v5108_v29 = vld [vmem:[#allocation3 + $0xb8] sm:$0xf0]  ;;  %v2988_v18 = vsel %vm5504_vm5, %v4988_v41, %v2987_v43 }
 0x18e   : > { %v6411_v52 = vpop.permute.xlu0 %3077  ;;  %2189 = vrot.lane.b32.xlu1 %v2116_v57, %s5407_s15  ;;  %v1381_v59 = vor.u32 %v1380_v9, %v1377_v14  ;;  %v3994_v22 = vld [vmem:[#allocation2 + $0xbc] sm:$0x1]  ;;  %v5244_v25 = vld [vmem:[#allocation3 + $0xb4] sm:$0xf]  ;;  %v2989_v17 = vrot.slane %v2987_v43, 4  ;;  %v5013_v55 = vrot.slane %v3992_v58, 9 }
 0x18f   : > { %v2467_v24 = vsel %vm5512_vm8, %v2462_v11, %v2466_v35  ;;  %v1399_v27 = vshrl.u32 %v1221_v48, 16  ;;  %v1402_v34 = vshll.u32 %v1221_v48, 16  ;;  %v4145_v28 = vrot.slane %v3994_v22, 5  ;;  %v2118_v56 = vld [vmem:[#allocation2 + $0x4c] sm:$0xf] }
 0x190   : > { %v1991_v15 = vpop.permute.xlu2 %1990  ;;  %v5111_v37 = vor.u32 %v5244_v25, %v5108_v29  ;;  %v4143_v40 = vsel %vm5504_vm5, %v5013_v55, %v4142_v8  ;;  %v1382_v5 = vrot.slane %v1381_v59, 4  ;;  %v3526_v26 = vshrl.u32 %v6365_v60, 16  ;;  %v1784_v51 = vld [vmem:[#allocation2 + $0x44] sm:$0x1]  ;;  %v2117_v60 = vld [vmem:[#allocation2 + $0x48] sm:$0xf] }
 0x191   : > { %v1695_v62 = vpop.permute.xlu1 %1694  ;;  %v5223_v4 = vld [vmem:[#allocation3 + $0x4] sm:$0xf0]  ;;  %3279 = vrot.lane.b32.xlu0 %v3207_v53, %s5410_s22  ;;  %v4146_v30 = vsel %vm5504_vm5, %v4144_v7, %v4145_v28  ;;  %4219 = vst.msk [vmem:[#allocation3 + $0xd4] sm:$0xf] %vm592_vm1, %v4143_v40  ;;  %v1401_v46 = vrot.slane %v1399_v27, 4  ;;  %v1404_v49 = vrot.slane %v1402_v34, 5 }
 0x192   : > { %1763 = vst.msk [vmem:[#allocation3 + $0xe0] sm:$0xf] %vm1734_vm2, %v1695_v62  ;;  %v5019_v61 = vor.u32 %v5223_v4, %v5018_v31  ;;  %v1169_v53 = vld [vmem:[#allocation2 + $0xb4] sm:$0xf]  ;;  %v1220_v47 = vld [vmem:[#allocation2 + $0x44] sm:$0x1] }
 0x193   : > { %2103 = vst.msk [vmem:[#allocation3 + $0xe0] sm:$0xf] %vm2074_vm3, %v6323_v2  ;;  %v2875_v2 = vld [vmem:[#allocation2 + $0x44] sm:$0x1]  ;;  %v1405_v63 = vor.u32 %v1404_v49, %v1401_v46  ;;  %v1146_v31 = vld [vmem:[#allocation2 + $0x28] sm:$0xf] }
 0x194   : > { %2296 = vst.msk [vmem:[#allocation3 + $0xe0] sm:$0xf] %vm2267_vm4, %v6332_v10  ;;  %4534 = vmatmul.bf16.vlgmr.msra.gmra.mxu1 %v5019_v61  ;;  %v1219_v10 = vld [vmem:[#allocation2 + $0x40] sm:$0xf]  ;;  %v2990_v20 = vrot.slane %v2875_v2, 5  ;;  %v1905_v4 = vrot.slane %v1903_v38, 4 }
 0x195   : > { %2748 = vrot.lane.b32.xlu2 %v2457_v36, %s5408_s16  ;;  %v1384_v6 = vshll.u32 %v1219_v10, 16  ;;  %v1388_v44 = vshrl.u32 %v1219_v10, 16  ;;  %4220 = vst.msk [vmem:[#allocation3 + $0xdc] sm:$0xf] %vm592_vm1, %v4146_v30  ;;  %v1906_v33 = vrot.slane %v1784_v51, 5  ;;  %v3528_v13 = vrot.slane %v3526_v26, 4  ;;  %v6479_v10 = vpop.f32.mrf.mxu2 }
 0x196   : > { %v1651_v0 = vpop.permute.xlu0 %1650  ;;  %3085 = vrot.lane.b32.xlu1 %v2988_v18, %s5409_s17  ;;  %v2991_v45 = vsel %vm5504_vm5, %v2989_v17, %v2990_v20  ;;  %1201 = vst.msk [vmem:[#allocation3 + $0xf0] sm:$0xf] %vm592_vm1, %v1169_v53  ;;  %v1394_v14 = vshll.u32 %v1220_v47, 16  ;;  %v3403_v9 = vld [vmem:[#allocation2 + $0x44] sm:$0x1]  ;;  %v1406_v11 = vrot.slane %v1405_v63, 4 }
 0x197   : > { %1741 = vst.msk [vmem:[#allocation3 + $0x30] sm:$0xf] %vm1734_vm2, %v1651_v0  ;;  %v1386_v57 = vrot.slane %v1384_v6, 5  ;;  %v1390_v62 = vrot.slane %v1388_v44, 4  ;;  %v3405_v42 = vld [vmem:[#allocation2 + $0x4c] sm:$0xf]  ;;  %v1907_v0 = vsel %vm5504_vm5, %v1905_v4, %v1906_v33  ;;  %v3529_v36 = vor.u32 %v3528_v13, %v6394_v23 }
 0x198   : > { %2081 = vst.msk [vmem:[#allocation3 + $0x30] sm:$0xf] %vm2074_vm3, %v1991_v15  ;;  %v3272_v39 = vpop.permute.xlu2 %3271  ;;  %v6459_v15 = vld [vmem:[#allocation2 + $0x4c] sm:$0xf]  ;;  %v5246_v38 = vld [vmem:[#allocation3 + $0xc4] sm:$0xf] }
 0x199   : > { %v2037_v1 = vpop.permute.xlu1 %2036  ;;  %2750 = vrot.lane.b32.xlu0 %v2467_v24, %s5408_s16  ;;  %v1387_v54 = vsel %vm5512_vm8, %v1382_v5, %v1386_v57  ;;  %v1408_v61 = vshll.u32 %v6459_v15, 16  ;;  %v1391_v43 = vor.u32 %v1390_v62, %v1386_v57  ;;  %1178 = vst.msk [vmem:[#allocation3 + $0x38] sm:$0xf] %vm592_vm1, %v1146_v31  ;;  %v5116_v35 = vld [vmem:[#allocation3 + $0xc8] sm:$0xf0]  ;;  %v3532_v2 = vshll.u32 %v3403_v9, 16 }
 0x19a   : > { %2104 = vst.msk [vmem:[#allocation3 + $0xe8] sm:$0xf] %vm2074_vm3, %v2037_v1  ;;  %v1396_v7 = vrot.slane %v1394_v14, 5  ;;  %v3546_v22 = vshll.u32 %v3405_v42, 16  ;;  %v3550_v25 = vshrl.u32 %v3405_v42, 16  ;;  %v5119_v20 = vor.u32 %v5246_v38, %v5116_v35 }
 0x19b   : > { %5191 = vmatmul.msk.bf16.gmra.mxu2 %vm4477_vm0, %v5111_v37  ;;  %v6476_v58 = vrot.slane %v1408_v61, 5  ;;  %v1392_v48 = vrot.slane %v1391_v43, 4  ;;  %v3404_v24 = vld [vmem:[#allocation2 + $0x48] sm:$0xf]  ;;  %v1147_v17 = vld [vmem:[#allocation2 + $0x30] sm:$0xf] }
 0x19c   : > { %v1787_v23 = vld [vmem:[#allocation2 + $0x50] sm:$0x1]  ;;  %1179 = vst.msk [vmem:[#allocation3 + $0x40] sm:$0xf] %vm592_vm1, %v1147_v17  ;;  %v3530_v1 = vrot.slane %v3529_v36, 4  ;;  %v3534_v55 = vrot.slane %v3532_v2, 5 }
 0x19d   : > { %3087 = vrot.lane.b32.xlu2 %v2991_v45, %s5409_s17  ;;  %v1411_v59 = vsel %vm5512_vm8, %v1406_v11, %v6476_v58  ;;  %v1397_v6 = vsel %vm5512_vm8, %v1392_v48, %v1396_v7  ;;  %v3537_v34 = vshrl.u32 %v3404_v24, 16  ;;  %v3540_v28 = vshll.u32 %v3404_v24, 16  ;;  %v1785_v44 = vld [vmem:[#allocation2 + $0x48] sm:$0xe]  ;;  %v3406_v45 = vld [vmem:[#allocation2 + $0x50] sm:$0x1] }
 0x19e   : > { %v6446_v19 = vpop.permute.xlu0 %1992  ;;  %1658 = vrot.lane.b32.xlu1 %v1387_v54, %s5406_s12  ;;  %v3548_v40 = vrot.slane %v3546_v22, 5  ;;  %v3552_v5 = vrot.slane %v3550_v25, 4  ;;  %v3535_v57 = vsel %vm5512_vm8, %v3530_v1, %v3534_v55  ;;  %v4974_v54 = vrot.slane %v1785_v44, 9  ;;  %v1225_v33 = vld [vmem:[#allocation2 + $0x58] sm:$0xf] }
 0x19f   : > { %v3539_v49 = vrot.slane %v3537_v34, 4  ;;  %v3542_v53 = vrot.slane %v3540_v28, 5  ;;  %v3556_v51 = vshll.u32 %v3406_v45, 16  ;;  %v5248_v61 = vld [vmem:[#allocation3 + $0xd4] sm:$0xf]  ;;  %v1432_v9 = vshll.u32 %v1225_v33, 16 }
 0x1a0   : > { %v6469_v8 = vpop.permute.xlu2 %2038  ;;  %v5124_v13 = vld [vmem:[#allocation3 + $0xd8] sm:$0xf0]  ;;  %v1436_v11 = vshrl.u32 %v1225_v33, 16  ;;  %v1223_v36 = vld [vmem:[#allocation2 + $0x50] sm:$0x1] }
 0x1a1   : > { %v2741_v16 = vpop.permute.xlu1 %2740  ;;  %2193 = vrot.lane.b32.xlu0 %v2118_v56, %s5407_s15  ;;  %v3553_v56 = vor.u32 %v3552_v5, %v3548_v40  ;;  %v3543_v62 = vor.u32 %v3542_v53, %v3539_v49  ;;  %v3558_v31 = vrot.slane %v3556_v51, 5  ;;  %v2119_v2 = vld [vmem:[#allocation2 + $0x54] sm:$0xf]  ;;  %v1434_v7 = vrot.slane %v1432_v9, 5  ;;  %v1226_v25 = vld [vmem:[#allocation2 + $0x5c] sm:$0x1] }
 0x1a2   : > { %2833 = vst.msk [vmem:[#allocation3 + $0x20] sm:$0xf] %vm2828_vm6, %v2741_v16  ;;  %v6500_v16 = vpop.f32.mrf.mxu2  ;;  %v1170_v24 = vld [vmem:[#allocation2 + $0xb8] sm:$0xf]  ;;  %v1442_v1 = vshll.u32 %v1226_v25, 16 }
 0x1a3   : > { %3170 = vst.msk [vmem:[#allocation3 + $0x20] sm:$0xf] %vm3165_vm7, %v6411_v52  ;;  %v1786_v52 = vld [vmem:[#allocation2 + $0x4c] sm:$0xf]  ;;  %v3554_v47 = vrot.slane %v3553_v56, 4  ;;  %v3544_v43 = vrot.slane %v3543_v62, 4 }
 0x1a4   : > { %3364 = vst.msk [vmem:[#allocation3 + $0x20] sm:$0xf] %vm3359_vm9, %v3272_v39  ;;  %v1910_v18 = vrot.slane %v1786_v52, 5  ;;  %v1913_v39 = vrot.slane %v1787_v23, 5  ;;  %v5127_v52 = vor.u32 %v5248_v61, %v5124_v13  ;;  %v2120_v28 = vld [vmem:[#allocation2 + $0x58] sm:$0xf] }
 0x1a5   : > { %2191 = vrot.lane.b32.xlu2 %v2117_v60, %s5407_s15  ;;  %v1412_v60 = vshrl.u32 %v6459_v15, 16  ;;  %v3559_v14 = vsel %vm5512_vm8, %v3554_v47, %v3558_v31  ;;  %v1224_v15 = vld [vmem:[#allocation2 + $0x54] sm:$0xf]  ;;  %1202 = vst.msk [vmem:[#allocation3 + $0xf8] sm:$0xf] %vm592_vm1, %v1170_v24 }
 0x1a6   : > { %v3829_v41 = vpop.permute.xlu0 %3828  ;;  %2000 = vrot.lane.b32.xlu1 %v1907_v0, %s5405_s11  ;;  %v1912_v37 = vrot.slane %v1910_v18, 4  ;;  %v1911_v63 = vsel %vm5504_vm5, %v4974_v54, %v1910_v18  ;;  %v3549_v0 = vsel %vm5512_vm8, %v3544_v43, %v3548_v40  ;;  %v1423_v18 = vshrl.u32 %v1224_v15, 16  ;;  %v1788_v44 = vld [vmem:[#allocation2 + $0x54] sm:$0xe]  ;;  %v1789_v45 = vld [vmem:[#allocation2 + $0x58] sm:$0xf] }
 0x1a7   : > { %3923 = vst.msk [vmem:[#allocation3 + $0x10] sm:$0xf] %vm3920_vm10, %v3829_v41  ;;  %v3208_v41 = vld [vmem:[#allocation2 + $0x4c] sm:$0xf]  ;;  %v1414_v38 = vrot.slane %v1412_v60, 4  ;;  %v4975_v54 = vrot.slane %v1788_v44, 9 }
 0x1a8   : > { %v1914_v26 = vsel %vm5504_vm5, %v1912_v37, %v1913_v39  ;;  %v1425_v55 = vrot.slane %v1423_v18, 4  ;;  %v1791_v53 = vld [vmem:[#allocation2 + $0x60] sm:$0xe]  ;;  %v1917_v56 = vrot.slane %v1789_v45, 5  ;;  %v1790_v31 = vld [vmem:[#allocation2 + $0x5c] sm:$0x1] }
 0x1a9   : > { %v3080_v29 = vpop.permute.xlu1 %3079  ;;  %1662 = vrot.lane.b32.xlu0 %v1411_v59, %s5406_s12  ;;  %v1426_v59 = vshll.u32 %v1224_v15, 16  ;;  %v1415_v17 = vor.u32 %v1414_v38, %v6476_v58  ;;  %v1444_v58 = vrot.slane %v1442_v1, 5  ;;  %v1227_v51 = vld [vmem:[#allocation2 + $0x60] sm:$0xf]  ;;  %v1230_v60 = vld [vmem:[#allocation2 + $0x6c] sm:$0xf] }
 0x1aa   : > { %v6512_v35 = vpop.f32.mrf.mxu2  ;;  %v1447_v33 = vshrl.u32 %v1227_v51, 16  ;;  %v1450_v61 = vshll.u32 %v1227_v51, 16  ;;  %v1148_v13 = vld [vmem:[#allocation2 + $0x34] sm:$0xf]  ;;  %v1919_v9 = vrot.slane %v1917_v56, 4  ;;  %v1471_v15 = vshrl.u32 %v1230_v60, 16 }
 0x1ab   : > { %5192 = vmatmul.msk.bf16.gmra.mxu2 %vm4477_vm0, %v5119_v20  ;;  %v2743_v30 = vpop.permute.xlu2 %2742  ;;  %v1418_v20 = vshll.u32 %v1223_v36, 16  ;;  %v1416_v34 = vrot.slane %v1415_v17, 4  ;;  %1180 = vst.msk [vmem:[#allocation3 + $0x48] sm:$0xf] %vm592_vm1, %v1148_v13  ;;  %v1474_v38 = vshll.u32 %v1230_v60, 16 }
 0x1ac   : > { %2834 = vst.msk [vmem:[#allocation3 + $0x28] sm:$0xf] %vm2828_vm6, %v2743_v30  ;;  %v1228_v36 = vld [vmem:[#allocation2 + $0x64] sm:$0xf]  ;;  %v1473_v25 = vrot.slane %v1471_v15, 4 }
 0x1ad   : > { %1660 = vrot.lane.b32.xlu2 %v1397_v6, %s5406_s12  ;;  %3171 = vst.msk [vmem:[#allocation3 + $0x28] sm:$0xf] %vm3165_vm7, %v3080_v29  ;;  %v1438_v29 = vrot.slane %v1436_v11, 4  ;;  %v1428_v6 = vrot.slane %v1426_v59, 5  ;;  %v1920_v11 = vrot.slane %v1790_v31, 5  ;;  %v1456_v18 = vshll.u32 %v1228_v36, 16 }
 0x1ae   : > { %v2230_v27 = vpop.permute.xlu0 %2229  ;;  %3838 = vrot.lane.b32.xlu1 %v3535_v57, %s5411_s23  ;;  %v1460_v59 = vshrl.u32 %v1228_v36, 16  ;;  %v1476_v24 = vrot.slane %v1474_v38, 5  ;;  %v2124_v17 = vld [vmem:[#allocation2 + $0x70] sm:$0xf]  ;;  %v1794_v13 = vld [vmem:[#allocation2 + $0x6c] sm:$0xe] }
 0x1af   : > { %2297 = vst.msk [vmem:[#allocation3 + $0xe8] sm:$0xf] %vm2267_vm4, %v2230_v27  ;;  %v1439_v23 = vor.u32 %v1438_v29, %v1434_v7  ;;  %v1429_v39 = vor.u32 %v1428_v6, %v1425_v55  ;;  %v1921_v29 = vsel %vm5504_vm5, %v1919_v9, %v1920_v11  ;;  %v1231_v1 = vld [vmem:[#allocation2 + $0x70] sm:$0xf]  ;;  %v1458_v6 = vrot.slane %v1456_v18, 5 }
 0x1b0   : > { %v1795_v44 = vld [vmem:[#allocation2 + $0x70] sm:$0xf]  ;;  %v1233_v38 = vld [vmem:[#allocation2 + $0x78] sm:$0xf] }
 0x1b1   : > { %v2184_v46 = vpop.permute.xlu1 %2183  ;;  %2004 = vrot.lane.b32.xlu0 %v1914_v26, %s5405_s11  ;;  %v1440_v37 = vrot.slane %v1439_v23, 4  ;;  %v6541_v26 = vld [vmem:[#allocation2 + $0x64] sm:$0xf]  ;;  %v1931_v51 = vrot.slane %v1795_v44, 5  ;;  %v1495_v18 = vshrl.u32 %v1233_v38, 16 }
 0x1b2   : > { %2274 = vst.msk [vmem:[#allocation3 + $0x30] sm:$0xf] %vm2267_vm4, %v2184_v46  ;;  %v1430_v46 = vrot.slane %v1429_v39, 4  ;;  %v1924_v47 = vrot.slane %v6541_v26, 5  ;;  %v2123_v39 = vld [vmem:[#allocation2 + $0x6c] sm:$0xf] }
 0x1b3   : > { %v2186_v4 = vpop.permute.xlu2 %2185  ;;  %v1445_v57 = vsel %vm5512_vm8, %v1440_v37, %v1444_v58  ;;  %v1480_v37 = vshll.u32 %v1231_v1, 16 }
 0x1b4   : > { %v1435_v62 = vsel %vm5512_vm8, %v1430_v46, %v1434_v7  ;;  %v1793_v46 = vld [vmem:[#allocation2 + $0x68] sm:$0x1] }
 0x1b5   : > { %2002 = vrot.lane.b32.xlu2 %v1911_v63, %s5405_s11  ;;  %v4976_v63 = vrot.slane %v1791_v53, 9  ;;  %v1927_v31 = vrot.slane %v1793_v46, 5  ;;  %v1149_v46 = vld [vmem:[#allocation2 + $0x3c] sm:$0xf] }
 0x1b6   : > { %3281 = vrot.lane.b32.xlu1 %v3208_v41, %s5410_s22  ;;  %1181 = vst.msk [vmem:[#allocation3 + $0x50] sm:$0xf] %vm592_vm1, %v1149_v46 }
 0x1b9   : > { %3842 = vrot.lane.b32.xlu0 %v3559_v14, %s5411_s23  ;;  %v1699_v42 = vpop.permute.xlu0 %1698  ;;  %v5026_v14 = vld [vmem:[#allocation3 + $0x10] sm:$0xf] }
 0x1ba   : > { %1765 = vst.msk [vmem:[#allocation3 + $0xf0] sm:$0xf] %vm1734_vm2, %v1699_v42 }
 0x1bb   : > { %5193 = vmatmul.msk.bf16.gmra.mxu2 %vm4477_vm0, %v5127_v52  ;;  %2105 = vst.msk [vmem:[#allocation3 + $0xf0] sm:$0xf] %vm2074_vm3, %v6469_v8  ;;  %v1653_v48 = vpop.permute.xlu1 %1652  ;;  %v2121_v8 = vld [vmem:[#allocation2 + $0x60] sm:$0xf]  ;;  %v1925_v52 = vsel %vm5504_vm5, %v4976_v63, %v1924_v47  ;;  %v1926_v63 = vrot.slane %v1924_v47, 4  ;;  %v4977_v47 = vrot.slane %v1794_v13, 9 }
 0x1bc   : > { %v6520_v22 = vpop.permute.xlu2 %3081  ;;  %1742 = vst.msk [vmem:[#allocation3 + $0x38] sm:$0xf] %vm1734_vm2, %v1653_v48  ;;  %v1452_v48 = vrot.slane %v1450_v61, 5 }
 0x1bd   : > { %3840 = vrot.lane.b32.xlu2 %v3549_v0, %s5411_s23  ;;  %2082 = vst.msk [vmem:[#allocation3 + $0x38] sm:$0xf] %vm2074_vm3, %v6446_v19  ;;  %v1420_v19 = vrot.slane %v1418_v20, 5  ;;  %v1928_v9 = vsel %vm5504_vm5, %v1926_v63, %v1927_v31  ;;  %v1800_v63 = vld [vmem:[#allocation2 + $0x84] sm:$0xe] }
 0x1be   : > { %2195 = vrot.lane.b32.xlu1 %v2119_v2, %s5407_s15  ;;  %2275 = vst.msk [vmem:[#allocation3 + $0x38] sm:$0xf] %vm2267_vm4, %v2186_v4  ;;  %v1918_v4 = vsel %vm5504_vm5, %v4975_v54, %v1917_v56  ;;  %v1449_v2 = vrot.slane %v1447_v33, 4  ;;  %v1933_v33 = vrot.slane %v1931_v51, 4  ;;  %v6625_v31 = vld [vmem:[#allocation2 + $0x88] sm:$0xf] }
 0x1bf   : > { %v1421_v40 = vsel %vm5512_vm8, %v1416_v34, %v1420_v19  ;;  %v1477_v34 = vor.u32 %v1476_v24, %v1473_v25  ;;  %v1462_v19 = vrot.slane %v1460_v59, 4  ;;  %v1498_v59 = vshll.u32 %v1233_v38, 16  ;;  %v2125_v25 = vld [vmem:[#allocation2 + $0x78] sm:$0xf]  ;;  %v1235_v24 = vld [vmem:[#allocation2 + $0x80] sm:$0x1] }
 0x1c0   : > { %v1453_v20 = vor.u32 %v1452_v48, %v1449_v2  ;;  %v1932_v2 = vsel %vm5504_vm5, %v4977_v47, %v1931_v51  ;;  %v1232_v48 = vld [vmem:[#allocation2 + $0x74] sm:$0x1]  ;;  %v1799_v47 = vld [vmem:[#allocation2 + $0x80] sm:$0x1]  ;;  %v1151_v38 = vld [vmem:[#allocation2 + $0x48] sm:$0xf] }
 0x1c1   : > { %2199 = vrot.lane.b32.xlu0 %v2121_v8, %s5407_s15  ;;  %v6530_v27 = vpop.permute.xlu0 %2040  ;;  %v2122_v8 = vld [vmem:[#allocation2 + $0x64] sm:$0xf]  ;;  %1183 = vst.msk [vmem:[#allocation3 + $0x60] sm:$0xf] %vm592_vm1, %v1151_v38 }
 0x1c5   : > { %2197 = vrot.lane.b32.xlu2 %v2120_v28, %s5407_s15  ;;  %v1229_v28 = vld [vmem:[#allocation2 + $0x68] sm:$0x1] }
 0x1c6   : > { %1664 = vrot.lane.b32.xlu1 %v1421_v40, %s5406_s12  ;;  %v3831_v30 = vpop.permute.xlu1 %3830  ;;  %v1478_v40 = vrot.slane %v1477_v34, 4  ;;  %v1497_v34 = vrot.slane %v1495_v18, 4 }
 0x1c7   : > { %v1655_v5 = vpop.permute.xlu2 %1654  ;;  %3924 = vst.msk [vmem:[#allocation3 + $0x18] sm:$0xf] %vm3920_vm10, %v3831_v30  ;;  %v1466_v30 = vshll.u32 %v1229_v28, 16 }
 0x1c8   : > { %1743 = vst.msk [vmem:[#allocation3 + $0x40] sm:$0xf] %vm1734_vm2, %v1655_v5  ;;  %v1463_v5 = vor.u32 %v1462_v19, %v1458_v6 }
 0x1c9   : > { %1668 = vrot.lane.b32.xlu0 %v1445_v57, %s5406_s12  ;;  %v3274_v49 = vpop.permute.xlu0 %3273  ;;  %v6577_v57 = vrot.slane %v1480_v37, 5  ;;  %v1468_v56 = vrot.slane %v1466_v30, 5  ;;  %v2126_v30 = vld [vmem:[#allocation2 + $0x7c] sm:$0xf] }
 0x1ca   : > { %3365 = vst.msk [vmem:[#allocation3 + $0x28] sm:$0xf] %vm3359_vm9, %v3274_v49  ;;  %v1464_v54 = vrot.slane %v1463_v5, 4 }
 0x1cb   : > { %v1483_v53 = vsel %vm5512_vm8, %v1478_v40, %v6577_v57 }
 0x1cd   : > { %1666 = vrot.lane.b32.xlu2 %v1435_v62, %s5406_s12  ;;  %v1796_v62 = vld [vmem:[#allocation2 + $0x74] sm:$0x1] }
 0x1ce   : > { %2006 = vrot.lane.b32.xlu1 %v1918_v4, %s5405_s11  ;;  %v2232_v43 = vpop.permute.xlu1 %2231  ;;  %v5225_v42 = vld [vmem:[#allocation3 + $0x14] sm:$0xf0]  ;;  %v1469_v4 = vsel %vm5512_vm8, %v1464_v54, %v1468_v56  ;;  %v1934_v61 = vrot.slane %v1796_v62, 5  ;;  %v1798_v54 = vld [vmem:[#allocation2 + $0x7c] sm:$0xf] }
 0x1cf   : > { %v6551_v41 = vpop.permute.xlu2 %1996  ;;  %2298 = vst.msk [vmem:[#allocation3 + $0xf0] sm:$0xf] %vm2267_vm4, %v2232_v43  ;;  %v5027_v0 = vor.u32 %v5225_v42, %v5026_v14  ;;  %v1234_v43 = vld [vmem:[#allocation2 + $0x7c] sm:$0xf]  ;;  %v1484_v14 = vshrl.u32 %v1231_v1, 16 }
 0x1d0   : > { %v1935_v11 = vsel %vm5504_vm5, %v1933_v33, %v1934_v61  ;;  %v1508_v42 = vshrl.u32 %v1234_v43, 16  ;;  %v1236_v61 = vld [vmem:[#allocation2 + $0x84] sm:$0xf] }
 0x1d1   : > { %2010 = vrot.lane.b32.xlu0 %v1925_v52, %s5405_s11  ;;  %4539 = vmatmul.bf16.gmra.mxu1 %v5027_v0  ;;  %v2745_v7 = vpop.permute.xlu0 %2744  ;;  %v1504_v52 = vshll.u32 %v1234_v43, 16  ;;  %v1486_v0 = vrot.slane %v1484_v14, 4  ;;  %v4979_v43 = vrot.slane %v1800_v63, 9  ;;  %v1945_v14 = vrot.slane %v6625_v31, 5 }
 0x1d2   : > { %2835 = vst.msk [vmem:[#allocation3 + $0x30] sm:$0xf] %vm2828_vm6, %v2745_v7 }
 0x1d3   : > { %3172 = vst.msk [vmem:[#allocation3 + $0x30] sm:$0xf] %vm3165_vm7, %v6520_v22  ;;  %v1454_v22 = vrot.slane %v1453_v20, 4  ;;  %v1506_v7 = vrot.slane %v1504_v52, 5  ;;  %v1490_v20 = vshll.u32 %v1232_v48, 16  ;;  %v1522_v52 = vshll.u32 %v1236_v61, 16 }
 0x1d4   : > { %v1237_v48 = vld [vmem:[#allocation2 + $0x88] sm:$0xf] }
 0x1d5   : > { %2008 = vrot.lane.b32.xlu2 %v1921_v29, %s5405_s11  ;;  %v1459_v45 = vsel %vm5512_vm8, %v1454_v22, %v1458_v6  ;;  %v1510_v29 = vrot.slane %v1508_v42, 4  ;;  %v1514_v6 = vshll.u32 %v1235_v24, 16  ;;  %v1492_v40 = vrot.slane %v1490_v20, 5 }
 0x1d6   : > { %2201 = vrot.lane.b32.xlu1 %v2122_v8, %s5407_s15  ;;  %v2127_v8 = vld [vmem:[#allocation2 + $0x84] sm:$0xf]  ;;  %v1524_v18 = vrot.slane %v1522_v52, 5  ;;  %v1532_v24 = vshrl.u32 %v1237_v48, 16  ;;  %v1805_v52 = vld [vmem:[#allocation2 + $0x98] sm:$0x1] }
 0x1d7   : > { %v2234_v23 = vpop.permute.xlu2 %2233  ;;  %v1701_v55 = vpop.permute.xlu1 %1700 }
 0x1d8   : > { %1766 = vst.msk [vmem:[#allocation3 + $0xf8] sm:$0xf] %vm1734_vm2, %v1701_v55  ;;  %v1511_v55 = vor.u32 %v1510_v29, %v1506_v7 }
 0x1d9   : > { %2205 = vrot.lane.b32.xlu0 %v2124_v17, %s5407_s15  ;;  %2106 = vst.msk [vmem:[#allocation3 + $0xf8] sm:$0xf] %vm2074_vm3, %v6530_v27  ;;  %v6572_v58 = vpop.permute.xlu0 %3083  ;;  %v1487_v17 = vor.u32 %v1486_v0, %v6577_v57  ;;  %v1946_v0 = vsel %vm5504_vm5, %v4979_v43, %v1945_v14 }
 0x1da   : > { %2299 = vst.msk [vmem:[#allocation3 + $0xf8] sm:$0xf] %vm2267_vm4, %v2234_v23  ;;  %v1150_v23 = vld [vmem:[#allocation2 + $0x40] sm:$0xf]  ;;  %v1512_v44 = vrot.slane %v1511_v55, 4 }
 0x1db   : > { %1182 = vst.msk [vmem:[#allocation3 + $0x58] sm:$0xf] %vm592_vm1, %v1150_v23  ;;  %v2128_v23 = vld [vmem:[#allocation2 + $0x88] sm:$0xf] }
 0x1dd   : > { %2203 = vrot.lane.b32.xlu2 %v2123_v39, %s5407_s15  ;;  %v1488_v39 = vrot.slane %v1487_v17, 4 }
 0x1de   : > { %1670 = vrot.lane.b32.xlu1 %v1459_v45, %s5406_s12  ;;  %v1516_v45 = vrot.slane %v1514_v6, 5 }
 0x1df   : > { %v3835_v27 = vpop.permute.xlu2 %3834  ;;  %v1995_v49 = vpop.permute.xlu1 %1994 }
 0x1e0   : > { %3926 = vst.msk [vmem:[#allocation3 + $0x28] sm:$0xf] %vm3920_vm10, %v3835_v27  ;;  %v1493_v27 = vsel %vm5512_vm8, %v1488_v39, %v1492_v40  ;;  %v1517_v56 = vsel %vm5512_vm8, %v1512_v44, %v1516_v45  ;;  %v2316_v39 = vld [vmem:[#allocation2 + $0x4c] sm:$0xf]  ;;  %v2129_v40 = vld [vmem:[#allocation2 + $0x90] sm:$0xf] }
 0x1e1   : > { %2083 = vst.msk [vmem:[#allocation3 + $0x40] sm:$0xf] %vm2074_vm3, %v1995_v49  ;;  %1674 = vrot.lane.b32.xlu0 %v1483_v53, %s5406_s12  ;;  %v2188_v60 = vpop.permute.xlu0 %2187  ;;  %v1797_v53 = vld [vmem:[#allocation2 + $0x78] sm:$0xe] }
 0x1e2   : > { %2276 = vst.msk [vmem:[#allocation3 + $0x40] sm:$0xf] %vm2267_vm4, %v2188_v60  ;;  %v4978_v60 = vrot.slane %v1797_v53, 9  ;;  %v2315_v53 = vld [vmem:[#allocation2 + $0x48] sm:$0xf] }
 0x1e5   : > { %1672 = vrot.lane.b32.xlu2 %v1469_v4, %s5406_s12  ;;  %v1938_v4 = vrot.slane %v1798_v54, 5  ;;  %v6661_v54 = vld [vmem:[#allocation2 + $0x94] sm:$0xf] }
 0x1e6   : > { %2012 = vrot.lane.b32.xlu1 %v1928_v9, %s5405_s11  ;;  %v1239_v9 = vld [vmem:[#allocation2 + $0x90] sm:$0xf] }
 0x1e7   : > { %v6595_v26 = vpop.permute.xlu2 %3277  ;;  %v5227_v22 = vld [vmem:[#allocation3 + $0x24] sm:$0xf0]  ;;  %v1543_v42 = vshrl.u32 %v1239_v9, 16 }
 0x1e8   : > { %v3833_v15 = vpop.permute.xlu1 %3832 }
 0x1e9   : > { %2016 = vrot.lane.b32.xlu0 %v1935_v11, %s5405_s11  ;;  %3925 = vst.msk [vmem:[#allocation3 + $0x20] sm:$0xf] %vm3920_vm10, %v3833_v15  ;;  %v1657_v36 = vpop.permute.xlu0 %1656  ;;  %v1519_v11 = vshrl.u32 %v1236_v61, 16  ;;  %v1546_v15 = vshll.u32 %v1239_v9, 16  ;;  %v1153_v61 = vld [vmem:[#allocation2 + $0x54] sm:$0xf] }
 0x1ea   : > { %1744 = vst.msk [vmem:[#allocation3 + $0x48] sm:$0xf] %vm1734_vm2, %v1657_v36  ;;  %v1940_v36 = vrot.slane %v1938_v4, 4 }
 0x1eb   : > { %2084 = vst.msk [vmem:[#allocation3 + $0x48] sm:$0xf] %vm2074_vm3, %v6551_v41  ;;  %v1500_v41 = vrot.slane %v1498_v59, 5  ;;  %v1521_v29 = vrot.slane %v1519_v11, 4  ;;  %v1548_v17 = vrot.slane %v1546_v15, 5 }
 0x1ec   : > { %1185 = vst.msk [vmem:[#allocation3 + $0x70] sm:$0xf] %vm592_vm1, %v1153_v61  ;;  %v6679_v11 = vld [vmem:[%s7315_s4] ss:$0 sm:$0xff] }
 0x1ed   : > { %2014 = vrot.lane.b32.xlu2 %v1932_v2, %s5405_s11  ;;  %v1501_v57 = vor.u32 %v1500_v41, %v1497_v34  ;;  %v1941_v2 = vrot.slane %v1799_v47, 5  ;;  %v1525_v55 = vor.u32 %v1524_v18, %v1521_v29  ;;  %v6653_v41 = vld [vmem:[#allocation2 + $0x94] sm:$0xf] }
 0x1ee   : > { %2207 = vrot.lane.b32.xlu1 %v2125_v25, %s5407_s15  ;;  %v1528_v25 = vshll.u32 %v1237_v48, 16  ;;  %v1552_v44 = vshll.u32 %v6653_v41, 16 }
 0x1ef   : > { %v2749_v1 = vpop.permute.xlu2 %2748  ;;  %v1502_v51 = vrot.slane %v1501_v57, 4  ;;  %v1942_v20 = vsel %vm5504_vm5, %v1940_v36, %v1941_v2  ;;  %v1947_v36 = vrot.slane %v1945_v14, 4 }
 0x1f0   : > { %2837 = vst.msk [vmem:[#allocation3 + $0x40] sm:$0xf] %vm2828_vm6, %v2749_v1  ;;  %v3276_v19 = vpop.permute.xlu1 %3275  ;;  %v5034_v28 = vld [vmem:[#allocation3 + $0x20] sm:$0xf]  ;;  %v2130_v1 = vld [vmem:[#allocation2 + $0x94] sm:$0xf] }
 0x1f1   : > { %2211 = vrot.lane.b32.xlu0 %v2127_v8, %s5407_s15  ;;  %3366 = vst.msk [vmem:[#allocation3 + $0x30] sm:$0xf] %vm3359_vm9, %v3276_v19  ;;  %v5035_v37 = vor.u32 %v5227_v22, %v5034_v28  ;;  %v1507_v13 = vsel %vm5512_vm8, %v1502_v51, %v1506_v7  ;;  %v1545_v8 = vrot.slane %v1543_v42, 4  ;;  %v1530_v34 = vrot.slane %v1528_v25, 5  ;;  %v1238_v22 = vld [vmem:[#allocation2 + $0x8c] sm:$0x1] }
 0x1f2   : > { %v1534_v28 = vrot.slane %v1532_v24, 4  ;;  %v1538_v46 = vshll.u32 %v1238_v22, 16  ;;  %v2482_v51 = vshrl.u32 %v2316_v39, 16 }
 0x1f3   : > { %v6613_v5 = vpop.permute.xlu0 %1998  ;;  %4544 = vmatmul.bf16.gmra.mxu1 %v5035_v37  ;;  %v1549_v19 = vor.u32 %v1548_v17, %v1545_v8  ;;  %v1556_v8 = vshrl.u32 %v6653_v41, 16  ;;  %v2876_v41 = vld [vmem:[#allocation2 + $0x48] sm:$0xe] }
 0x1f4   : > { %v1540_v9 = vrot.slane %v1538_v46, 5  ;;  %v2484_v15 = vrot.slane %v2482_v51, 4  ;;  %v2336_v46 = vld [vmem:[#allocation2 + $0x9c] sm:$0xf] }
 0x1f5   : > { %2209 = vrot.lane.b32.xlu2 %v2126_v30, %s5407_s15  ;;  %v1526_v30 = vrot.slane %v1525_v55, 4  ;;  %v1550_v57 = vrot.slane %v1549_v19, 4 }
 0x1f6   : > { %1676 = vrot.lane.b32.xlu1 %v1493_v27, %s5406_s12  ;;  %v1535_v27 = vor.u32 %v1534_v28, %v1530_v34  ;;  %v6705_v28 = vld [vmem:[#allocation2 + $0x4c] sm:$0xf] }
 0x1f7   : > { %v6619_v49 = vpop.permute.xlu2 %3087  ;;  %v1531_v63 = vsel %vm5512_vm8, %v1526_v30, %v1530_v34  ;;  %v1241_v30 = vld [vmem:[#allocation2 + $0x98] sm:$0x1] }
 0x1f8   : > { %v2747_v62 = vpop.permute.xlu1 %2746  ;;  %v1536_v43 = vrot.slane %v1535_v27, 4  ;;  %v2994_v27 = vrot.slane %v6705_v28, 5 }
 0x1f9   : > { %1680 = vrot.lane.b32.xlu0 %v1517_v56, %s5406_s12  ;;  %2836 = vst.msk [vmem:[#allocation3 + $0x38] sm:$0xf] %vm2828_vm6, %v2747_v62  ;;  %v2478_v56 = vshll.u32 %v2316_v39, 16  ;;  %v1802_v62 = vld [vmem:[#allocation2 + $0x8c] sm:$0x1]  ;;  %v1558_v39 = vrot.slane %v1556_v8, 4 }
 0x1fa   : > { %3173 = vst.msk [vmem:[#allocation3 + $0x38] sm:$0xf] %vm3165_vm7, %v6572_v58  ;;  %v1939_v58 = vsel %vm5504_vm5, %v4978_v60, %v1938_v4  ;;  %v6668_v60 = vrot.slane %v1552_v44, 5  ;;  %v2469_v4 = vshrl.u32 %v2315_v53, 16  ;;  %v1948_v2 = vrot.slane %v1802_v62, 5 }
 0x1fb   : > { %v3837_v33 = vpop.permute.xlu0 %3836  ;;  %3367 = vst.msk [vmem:[#allocation3 + $0x38] sm:$0xf] %vm3359_vm9, %v6595_v26  ;;  %v2480_v42 = vrot.slane %v2478_v56, 5  ;;  %v1541_v25 = vsel %vm5512_vm8, %v1536_v43, %v1540_v9  ;;  %v1562_v62 = vshll.u32 %v1241_v30, 16  ;;  %v2637_v9 = vshrl.u32 %v2336_v46, 16 }
 0x1fc   : > { %3927 = vst.msk [vmem:[#allocation3 + $0x30] sm:$0xf] %vm3920_vm10, %v3837_v33  ;;  %v2472_v33 = vshll.u32 %v2315_v53, 16  ;;  %v2471_v48 = vrot.slane %v2469_v4, 4  ;;  %v1559_v51 = vor.u32 %v1558_v39, %v6668_v60  ;;  %v1154_v4 = vld [vmem:[#allocation2 + $0x58] sm:$0xf] }
 0x1fd   : > { %1678 = vrot.lane.b32.xlu2 %v1507_v13, %s5406_s12  ;;  %v2485_v14 = vor.u32 %v2484_v15, %v2480_v42  ;;  %1186 = vst.msk [vmem:[#allocation3 + $0x78] sm:$0xf] %vm592_vm1, %v1154_v4  ;;  %v6738_v15 = vld [vmem:[#allocation2 + $0xa0] sm:$0xf]  ;;  %v3428_v30 = vld [vmem:[#allocation2 + $0xa8] sm:$0xf] }
 0x1fe   : > { %2018 = vrot.lane.b32.xlu1 %v1939_v58, %s5405_s11  ;;  %v1952_v58 = vrot.slane %v6661_v54, 5  ;;  %v3732_v4 = vshll.u32 %v3428_v30, 16 }
 0x1ff   : > { %v6640_v26 = vpop.permute.xlu2 %2191  ;;  %v2486_v55 = vrot.slane %v2485_v14, 4  ;;  %v3210_v14 = vld [vmem:[#allocation2 + $0x58] sm:$0xf] }
 0x200   : > { %v2190_v7 = vpop.permute.xlu1 %2189  ;;  %v1954_v18 = vrot.slane %v1952_v58, 4 }
 0x201   : > { %2022 = vrot.lane.b32.xlu0 %v1946_v0, %s5405_s11  ;;  %2277 = vst.msk [vmem:[#allocation3 + $0x48] sm:$0xf] %vm2267_vm4, %v2190_v7  ;;  %v2317_v0 = vld [vmem:[#allocation2 + $0x50] sm:$0x1]  ;;  %v2474_v7 = vrot.slane %v2472_v33, 5 }
 0x202   : > { %v2488_v24 = vshll.u32 %v2317_v0, 16 }
 0x203   : > { %v3280_v59 = vpop.permute.xlu0 %3279  ;;  %v2475_v17 = vor.u32 %v2474_v7, %v2471_v48  ;;  %v2639_v48 = vrot.slane %v2637_v9, 4 }
 0x205   : > { %2020 = vrot.lane.b32.xlu2 %v1942_v20, %s5405_s11  ;;  %v2476_v22 = vrot.slane %v2475_v17, 4 }
 0x206   : > { %2213 = vrot.lane.b32.xlu1 %v2128_v23, %s5407_s15 }
 0x207   : > { %v1661_v6 = vpop.permute.xlu2 %1660  ;;  %v2481_v53 = vsel %vm5512_vm8, %v2476_v22, %v2480_v42  ;;  %v6757_v22 = vld [vmem:[#allocation2 + $0xa0] sm:$0xf] }
 0x208   : > { %1746 = vst.msk [vmem:[#allocation3 + $0x58] sm:$0xf] %vm1734_vm2, %v1661_v6  ;;  %v3086_v37 = vpop.permute.xlu1 %3085  ;;  %v2490_v6 = vrot.slane %v2488_v24, 5  ;;  %v2878_v24 = vld [vmem:[#allocation2 + $0x50] sm:$0x1] }
 0x209   : > { %2217 = vrot.lane.b32.xlu0 %v2130_v1, %s5407_s15  ;;  %3174 = vst.msk [vmem:[#allocation3 + $0x40] sm:$0xf] %vm3165_vm7, %v3086_v37 }
 0x20a   : > { %3368 = vst.msk [vmem:[#allocation3 + $0x40] sm:$0xf] %vm3359_vm9, %v3280_v59  ;;  %v1955_v59 = vrot.slane %v1805_v52, 5  ;;  %v1564_v52 = vrot.slane %v1562_v62, 5 }
 0x20b   : > { %v2751_v45 = vpop.permute.xlu0 %2750 }
 0x20c   : > { %2838 = vst.msk [vmem:[#allocation3 + $0x48] sm:$0xf] %vm2828_vm6, %v2751_v45  ;;  %v2491_v45 = vsel %vm5512_vm8, %v2486_v55, %v2490_v6  ;;  %v2997_v6 = vrot.slane %v2878_v24, 5 }
 0x20d   : > { %3175 = vst.msk [vmem:[#allocation3 + $0x48] sm:$0xf] %vm3165_vm7, %v6619_v49  ;;  %2215 = vrot.lane.b32.xlu2 %v2129_v40, %s5407_s15  ;;  %v1555_v49 = vsel %vm5512_vm8, %v1550_v57, %v6668_v60  ;;  %v4989_v40 = vrot.slane %v2876_v41, 9  ;;  %v3408_v60 = vld [vmem:[#allocation2 + $0x58] sm:$0xf] }
 0x20e   : > { %1682 = vrot.lane.b32.xlu1 %v1531_v63, %s5406_s12  ;;  %v1152_v63 = vld [vmem:[#allocation2 + $0x4c] sm:$0xf] }
 0x20f   : > { %v2003_v13 = vpop.permute.xlu2 %2002  ;;  %1184 = vst.msk [vmem:[#allocation3 + $0x68] sm:$0xf] %vm592_vm1, %v1152_v63  ;;  %v2995_v61 = vsel %vm5504_vm5, %v4989_v40, %v2994_v27  ;;  %v3729_v63 = vshrl.u32 %v3428_v30, 16 }
 0x210   : > { %v1659_v38 = vpop.permute.xlu1 %1658 }
 0x211   : > { %v4535_v47 = vpop.f32.mrf.mxu1  ;;  %1686 = vrot.lane.b32.xlu0 %v1555_v49, %s5406_s12  ;;  %1745 = vst.msk [vmem:[#allocation3 + $0x50] sm:$0xf] %vm1734_vm2, %v1659_v38  ;;  %v1560_v49 = vrot.slane %v1559_v51, 4  ;;  %v3407_v38 = vld [vmem:[#allocation2 + $0x54] sm:$0xf] }
 0x212   : > { %2085 = vst.msk [vmem:[#allocation3 + $0x50] sm:$0xf] %vm2074_vm3, %v6613_v5  ;;  %v4536_v31 = vadd.f32 %v6679_v11, %v4535_v47  ;;  %v1949_v5 = vsel %vm5504_vm5, %v1947_v36, %v1948_v2  ;;  %v2640_v47 = vshll.u32 %v2336_v46, 16  ;;  %v3570_v36 = vshll.u32 %v3408_v60, 16 }
 0x213   : > { %v2194_v29 = vpop.permute.xlu0 %2193  ;;  %2278 = vst.msk [vmem:[#allocation3 + $0x50] sm:$0xf] %vm2267_vm4, %v6640_v26  ;;  %v1956_v26 = vsel %vm5504_vm5, %v1954_v18, %v1955_v59  ;;  %v3574_v2 = vshrl.u32 %v3408_v60, 16  ;;  %v2646_v18 = vshll.u32 %v6738_v15, 16  ;;  %v3561_v59 = vshrl.u32 %v3407_v38, 16 }
 0x214   : > { %v4625_v1 = vadd.f32 %v6451_v50, %v4536_v31  ;;  %v2642_v7 = vrot.slane %v2640_v47, 5  ;;  %v1156_v31 = vld [vmem:[#allocation2 + $0x64] sm:$0xf]  ;;  %v6751_v8 = vrot.slane %v3570_v36, 5 }
 0x215   : > { %1684 = vrot.lane.b32.xlu2 %v1541_v25, %s5406_s12  ;;  %v3564_v25 = vshll.u32 %v3407_v38, 16  ;;  %1188 = vst.msk [vmem:[#allocation3 + $0x88] sm:$0xf] %vm592_vm1, %v1156_v31  ;;  %v6755_v28 = vrot.slane %v2646_v18, 5  ;;  %v2899_v47 = vld [vmem:[#allocation2 + $0xa4] sm:$0x1] }
 0x216   : > { %2024 = vrot.lane.b32.xlu1 %v1949_v5, %s5405_s11  ;;  %v4704_v44 = vmax.f32 %v4625_v1, 0.0  ;;  %v3576_v5 = vrot.slane %v3574_v2, 4  ;;  %v3409_v1 = vld [vmem:[#allocation2 + $0x5c] sm:$0x1]  ;;  %v2338_v38 = vld [vmem:[#allocation2 + $0xa4] sm:$0x1] }
 0x217   : > { %v3841_v20 = vpop.permute.xlu2 %3840  ;;  %v3566_v41 = vrot.slane %v3564_v25, 5  ;;  %v3731_v2 = vrot.slane %v3729_v63, 4  ;;  %v2319_v18 = vld [vmem:[#allocation2 + $0x58] sm:$0xf]  ;;  %v2656_v24 = vshll.u32 %v2338_v38, 16 }
 0x218   : > { %3929 = vst.msk [vmem:[#allocation3 + $0x40] sm:$0xf] %vm3920_vm10, %v3841_v20  ;;  %v2001_v19 = vpop.permute.xlu1 %2000  ;;  %v3577_v39 = vor.u32 %v3576_v5, %v6751_v8 }
 0x219   : > { %v4537_v23 = vpop.f32.mrf.mxu1  ;;  %2028 = vrot.lane.b32.xlu0 %v1956_v26, %s5405_s11  ;;  %2086 = vst.msk [vmem:[#allocation3 + $0x58] sm:$0xf] %vm2074_vm3, %v2001_v19  ;;  %v2996_v26 = vrot.slane %v2994_v27, 4 }
 0x21a   : > { %v4538_v34 = vadd.f32 %v6679_v11, %v4537_v23  ;;  %2279 = vst.msk [vmem:[#allocation3 + $0x58] sm:$0xf] %vm2267_vm4, %v2194_v29  ;;  %v1565_v29 = vsel %vm5512_vm8, %v1560_v49, %v1564_v52  ;;  %v2643_v23 = vor.u32 %v2642_v7, %v2639_v48  ;;  %v3578_v51 = vrot.slane %v3577_v39, 4  ;;  %v3997_v49 = vld [vmem:[#allocation2 + $0xc8] sm:$0x1] }
 0x21b   : > { %v1663_v50 = vpop.permute.xlu0 %1662  ;;  %v3734_v48 = vrot.slane %v3732_v4, 5  ;;  %v4152_v25 = vrot.slane %v3997_v49, 5  ;;  %v3224_v49 = vld [vmem:[#allocation2 + $0xac] sm:$0xf] }
 0x21c   : > { %v4627_v37 = vadd.f32 %v6479_v10, %v4538_v34  ;;  %1747 = vst.msk [vmem:[#allocation3 + $0x60] sm:$0xf] %vm1734_vm2, %v1663_v50  ;;  %v1803_v10 = vld [vmem:[#allocation2 + $0x90] sm:$0xe]  ;;  %v3563_v34 = vrot.slane %v3561_v59, 4  ;;  %v3580_v50 = vshll.u32 %v3409_v1, 16 }
 0x21d   : > { %2087 = vst.msk [vmem:[#allocation3 + $0x60] sm:$0xf] %vm2074_vm3, %v2003_v13  ;;  %2754 = vrot.lane.b32.xlu2 %v2491_v45, %s5408_s16  ;;  %v4980_v13 = vrot.slane %v1803_v10, 9  ;;  %v2644_v40 = vrot.slane %v2643_v23, 4  ;;  %v2998_v45 = vsel %vm5504_vm5, %v2996_v26, %v2997_v6  ;;  %v1157_v59 = vld [vmem:[#allocation2 + $0x6c] sm:$0xf]  ;;  %v3735_v23 = vor.u32 %v3734_v48, %v3731_v2 }
 0x21e   : > { %v4705_v57 = vmax.f32 %v4627_v37, 0.0  ;;  %2752 = vrot.lane.b32.xlu1 %v2481_v53, %s5408_s16  ;;  %v3209_v37 = vld [vmem:[#allocation2 + $0x54] sm:$0xf]  ;;  %v3567_v27 = vor.u32 %v3566_v41, %v3563_v34  ;;  %v3043_v53 = vrot.slane %v6757_v22, 5  ;;  %v3582_v62 = vrot.slane %v3580_v50, 5 }
 0x21f   : > { %v6727_v33 = vpop.permute.xlu2 %2197  ;;  %v1953_v0 = vsel %vm5504_vm5, %v4980_v13, %v1952_v58  ;;  %v5042_v58 = vld [vmem:[#allocation3 + $0x30] sm:$0xf]  ;;  %v2649_v46 = vsel %vm5512_vm8, %v2644_v40, %v6755_v28  ;;  %1189 = vst.msk [vmem:[#allocation3 + $0x90] sm:$0xf] %vm592_vm1, %v1157_v59  ;;  %v1159_v26 = vld [vmem:[#allocation2 + $0x78] sm:$0xf] }
 0x220   : > { %v5266_v56 = vpack.c.bf16 %v4705_v57, %v4704_v44  ;;  %v3839_v43 = vpop.permute.xlu1 %3838  ;;  %v3996_v44 = vld [vmem:[#allocation2 + $0xc4] sm:$0xf]  ;;  %v2650_v57 = vshrl.u32 %v6738_v15, 16  ;;  %v3568_v9 = vrot.slane %v3567_v27, 4  ;;  %v3045_v15 = vrot.slane %v3043_v53, 4 }
 0x221   : > { %3089 = vrot.lane.b32.xlu0 %v2995_v61, %s5409_s17  ;;  %3928 = vst.msk [vmem:[#allocation3 + $0x38] sm:$0xf] %vm3920_vm10, %v3839_v43  ;;  %v3995_v61 = vld [vmem:[#allocation2 + $0xc0] sm:$0xe]  ;;  %v4149_v13 = vrot.slane %v3996_v44, 5  ;;  %v3583_v36 = vsel %vm5512_vm8, %v3578_v51, %v3582_v62  ;;  %v2502_v1 = vshll.u32 %v2319_v18, 16 }
 0x222   : > { %5267 = vst [vmem:[%s6721_s10] sm:$0xff] %v5266_v56   ;;  %v1155_v56 = vld [vmem:[#allocation2 + $0x60] sm:$0xf]  ;;  %v2652_v60 = vrot.slane %v2650_v57, 4  ;;  %v3573_v31 = vsel %vm5512_vm8, %v3568_v9, %v6751_v8  ;;  %v2318_v8 = vld [vmem:[#allocation2 + $0x54] sm:$0xf]  ;;  %v2658_v40 = vrot.slane %v2656_v24, 5 }
 0x223   : > { %v6736_v42 = vpop.permute.xlu0 %2004  ;;  %1187 = vst.msk [vmem:[#allocation3 + $0x80] sm:$0xf] %vm592_vm1, %v1155_v56  ;;  %v4151_v7 = vrot.slane %v4149_v13, 4  ;;  %v5050_v41 = vld [vmem:[#allocation3 + $0x40] sm:$0xf]  ;;  %v2493_v30 = vshrl.u32 %v2318_v8, 16 }
 0x224   : > { %1191 = vst.msk [vmem:[#allocation3 + $0xa0] sm:$0xf] %vm592_vm1, %v1159_v26  ;;  %v2496_v44 = vshll.u32 %v2318_v8, 16  ;;  %v2504_v57 = vrot.slane %v2502_v1, 5  ;;  %v2880_v59 = vld [vmem:[#allocation2 + $0x58] sm:$0xf] }
 0x225   : > { %2026 = vrot.lane.b32.xlu2 %v1953_v0, %s5405_s11  ;;  %v5014_v0 = vrot.slane %v3995_v61, 9  ;;  %v2495_v62 = vrot.slane %v2493_v30, 4  ;;  %v2881_v26 = vld [vmem:[#allocation2 + $0x5c] sm:$0x1]  ;;  %v1162_v30 = vld [vmem:[#allocation2 + $0x88] sm:$0xf] }
 0x226   : > { %1688 = vrot.lane.b32.xlu1 %v1565_v29, %s5406_s12  ;;  %v3046_v29 = vrot.slane %v2899_v47, 5  ;;  %v2498_v63 = vrot.slane %v2496_v44, 5  ;;  %1194 = vst.msk [vmem:[#allocation3 + $0xb8] sm:$0xf] %vm592_vm1, %v1162_v30 }
 0x227   : > { %v1667_v54 = vpop.permute.xlu2 %1666  ;;  %v4150_v6 = vsel %vm5504_vm5, %v5014_v0, %v4149_v13  ;;  %v3411_v0 = vld [vmem:[#allocation2 + $0x64] sm:$0xf] }
 0x228   : > { %1749 = vst.msk [vmem:[#allocation3 + $0x70] sm:$0xf] %vm1734_vm2, %v1667_v54  ;;  %v3282_v17 = vpop.permute.xlu1 %3281  ;;  %v5229_v20 = vld [vmem:[#allocation3 + $0x34] sm:$0xf0]  ;;  %v2897_v54 = vld [vmem:[#allocation2 + $0x9c] sm:$0xe]  ;;  %v3047_v5 = vsel %vm5504_vm5, %v3045_v15, %v3046_v29  ;;  %v2499_v47 = vor.u32 %v2498_v63, %v2495_v62 }
 0x229   : > { %3285 = vrot.lane.b32.xlu0 %v3210_v14, %s5410_s22  ;;  %3369 = vst.msk [vmem:[#allocation3 + $0x48] sm:$0xf] %vm3359_vm9, %v3282_v17  ;;  %v5043_v55 = vor.u32 %v5229_v20, %v5042_v58  ;;  %v2653_v14 = vor.u32 %v2652_v60, %v6755_v28  ;;  %v3429_v20 = vld [vmem:[#allocation2 + $0xac] sm:$0xf]  ;;  %v3430_v60 = vld [vmem:[#allocation2 + $0xb0] sm:$0x1] }
 0x22a   : > { %4221 = vst.msk [vmem:[#allocation3 + $0xe4] sm:$0xf] %vm592_vm1, %v4150_v6  ;;  %v3748_v48 = vshll.u32 %v3430_v60, 16  ;;  %v2500_v29 = vrot.slane %v2499_v47, 4  ;;  %v2339_v62 = vld [vmem:[#allocation2 + $0xa8] sm:$0xf] }
 0x22b   : > { %v3843_v19 = vpop.permute.xlu0 %3842  ;;  %4549 = vmatmul.bf16.gmra.mxu1 %v5043_v55  ;;  %v2506_v55 = vshrl.u32 %v2319_v18, 16  ;;  %v2654_v22 = vrot.slane %v2653_v14, 4  ;;  %v1158_v18 = vld [vmem:[#allocation2 + $0x70] sm:$0xf]  ;;  %v3410_v14 = vld [vmem:[#allocation2 + $0x60] sm:$0xf] }
 0x22c   : > { %3930 = vst.msk [vmem:[#allocation3 + $0x48] sm:$0xf] %vm3920_vm10, %v3843_v19  ;;  %v4996_v19 = vrot.slane %v2897_v54, 9  ;;  %v3585_v8 = vshrl.u32 %v3410_v14, 16  ;;  %v3588_v6 = vshll.u32 %v3410_v14, 16  ;;  %v2664_v47 = vshll.u32 %v2339_v62, 16 }
 0x22d   : > { %3283 = vrot.lane.b32.xlu2 %v3209_v37, %s5410_s22  ;;  %v3738_v37 = vshll.u32 %v3429_v20, 16  ;;  %v2508_v27 = vrot.slane %v2506_v55, 4  ;;  %1190 = vst.msk [vmem:[#allocation3 + $0x98] sm:$0xf] %vm592_vm1, %v1158_v18  ;;  %v2900_v60 = vld [vmem:[#allocation2 + $0xa8] sm:$0xe] }
 0x22e   : > { %3091 = vrot.lane.b32.xlu1 %v2998_v45, %s5409_s17  ;;  %v3044_v50 = vsel %vm5504_vm5, %v4996_v19, %v3043_v53  ;;  %v3736_v45 = vrot.slane %v3735_v23, 4  ;;  %v2659_v53 = vsel %vm5512_vm8, %v2654_v22, %v2658_v40  ;;  %v3001_v23 = vrot.slane %v2880_v59, 5  ;;  %v2340_v22 = vld [vmem:[#allocation2 + $0xac] sm:$0xf]  ;;  %v2879_v40 = vld [vmem:[#allocation2 + $0x54] sm:$0xe] }
 0x22f   : > { %v6766_v10 = vpop.permute.xlu2 %2008  ;;  %v3740_v56 = vrot.slane %v3738_v37, 5  ;;  %v2509_v61 = vor.u32 %v2508_v27, %v2504_v57  ;;  %v3587_v27 = vrot.slane %v3585_v8, 4  ;;  %v2341_v18 = vld [vmem:[#allocation2 + $0xb0] sm:$0x1]  ;;  %v2666_v59 = vrot.slane %v2664_v47, 5 }
 0x230   : > { %v2196_v43 = vpop.permute.xlu1 %2195 }
 0x231   : > { %2780 = vrot.lane.b32.xlu0 %v2649_v46, %s5408_s16  ;;  %2280 = vst.msk [vmem:[#allocation3 + $0x60] sm:$0xf] %vm2267_vm4, %v2196_v43  ;;  %v4153_v46 = vsel %vm5504_vm5, %v4151_v7, %v4152_v25  ;;  %v3741_v4 = vsel %vm5512_vm8, %v3736_v45, %v3740_v56  ;;  %v2510_v15 = vrot.slane %v2509_v61, 4  ;;  %v3594_v25 = vshll.u32 %v3411_v0, 16 }
 0x232   : > { %4222 = vst.msk [vmem:[#allocation3 + $0xec] sm:$0xf] %vm592_vm1, %v4153_v46  ;;  %v3590_v46 = vrot.slane %v3588_v6, 5 }
 0x233   : > { %v6775_v52 = vpop.permute.xlu0 %2199  ;;  %v5231_v17 = vld [vmem:[#allocation3 + $0x44] sm:$0xf0]  ;;  %v6830_v1 = vrot.slane %v3594_v25, 5 }
 0x234   : > { %v5051_v28 = vor.u32 %v5231_v17, %v5050_v41  ;;  %v3412_v41 = vld [vmem:[#allocation2 + $0x68] sm:$0x1] }
 0x235   : > { %3846 = vrot.lane.b32.xlu2 %v3583_v36, %s5411_s23  ;;  %v3223_v36 = vld [vmem:[#allocation2 + $0xa8] sm:$0xf] }
 0x236   : > { %3844 = vrot.lane.b32.xlu1 %v3573_v31, %s5411_s23  ;;  %v3598_v31 = vshrl.u32 %v3411_v0, 16 }
 0x237   : > { %v6786_v58 = vpop.permute.xlu2 %2203 }
 0x238   : > { %v1665_v34 = vpop.permute.xlu1 %1664  ;;  %v3600_v55 = vrot.slane %v3598_v31, 4 }
 0x239   : > { %3119 = vrot.lane.b32.xlu0 %v3047_v5, %s5409_s17  ;;  %1748 = vst.msk [vmem:[#allocation3 + $0x68] sm:$0xf] %vm1734_vm2, %v1665_v34  ;;  %v3750_v5 = vrot.slane %v3748_v48, 5  ;;  %v1160_v34 = vld [vmem:[#allocation2 + $0x7c] sm:$0xf] }
 0x23a   : > { %2088 = vst.msk [vmem:[#allocation3 + $0x68] sm:$0xf] %vm2074_vm3, %v6736_v42  ;;  %v2320_v42 = vld [vmem:[#allocation2 + $0x5c] sm:$0x1]  ;;  %v3601_v45 = vor.u32 %v3600_v55, %v6830_v1  ;;  %v3212_v55 = vld [vmem:[#allocation2 + $0x64] sm:$0xf] }
 0x23b   : > { %v1669_v39 = vpop.permute.xlu0 %1668  ;;  %2281 = vst.msk [vmem:[#allocation3 + $0x68] sm:$0xf] %vm2267_vm4, %v6727_v33  ;;  %4554 = vmatmul.bf16.gmra.mxu1 %v5051_v28  ;;  %v3742_v33 = vshrl.u32 %v3429_v20, 16  ;;  %v2512_v13 = vshll.u32 %v2320_v42, 16  ;;  %v2505_v20 = vsel %vm5512_vm8, %v2500_v29, %v2504_v57  ;;  %v3211_v28 = vld [vmem:[#allocation2 + $0x60] sm:$0xf] }
 0x23c   : > { %1750 = vst.msk [vmem:[#allocation3 + $0x78] sm:$0xf] %vm1734_vm2, %v1669_v39  ;;  %v3003_v39 = vrot.slane %v3001_v23, 4  ;;  %v3604_v57 = vshll.u32 %v3412_v41, 16 }
 0x23d   : > { %3117 = vrot.lane.b32.xlu2 %v3044_v50, %s5409_s17  ;;  %2090 = vst.msk [vmem:[#allocation3 + $0x78] sm:$0xf] %vm2074_vm3, %v6766_v10  ;;  %v3744_v43 = vrot.slane %v3742_v33, 4  ;;  %v2514_v38 = vrot.slane %v2512_v13, 5  ;;  %v3004_v50 = vrot.slane %v2881_v26, 5  ;;  %v2670_v33 = vshll.u32 %v2340_v22, 16 }
 0x23e   : > { %2782 = vrot.lane.b32.xlu1 %v2659_v53, %s5408_s16  ;;  %1192 = vst.msk [vmem:[#allocation3 + $0xa8] sm:$0xf] %vm592_vm1, %v1160_v34  ;;  %v4990_v53 = vrot.slane %v2879_v40, 9  ;;  %v3606_v61 = vrot.slane %v3604_v57, 5  ;;  %v3591_v13 = vor.u32 %v3590_v46, %v3587_v27  ;;  %v1161_v46 = vld [vmem:[#allocation2 + $0x84] sm:$0xf] }
 0x23f   : > { %v1673_v51 = vpop.permute.xlu2 %1672  ;;  %v3745_v2 = vor.u32 %v3744_v43, %v3740_v56  ;;  %v3005_v63 = vsel %vm5504_vm5, %v3003_v39, %v3004_v50  ;;  %1193 = vst.msk [vmem:[#allocation3 + $0xb0] sm:$0xf] %vm592_vm1, %v1161_v46  ;;  %v1164_v46 = vld [vmem:[#allocation2 + $0x94] sm:$0xf] }
 0x240   : > { %1752 = vst.msk [vmem:[#allocation3 + $0x88] sm:$0xf] %vm1734_vm2, %v1673_v51  ;;  %v2007_v10 = vpop.permute.xlu1 %2006  ;;  %v2674_v51 = vshrl.u32 %v2340_v22, 16  ;;  %v3002_v43 = vsel %vm5504_vm5, %v4990_v53, %v3001_v23  ;;  %v3592_v0 = vrot.slane %v3591_v13, 4  ;;  %v2321_v23 = vld [vmem:[#allocation2 + $0x60] sm:$0xf] }
 0x241   : > { %3872 = vrot.lane.b32.xlu0 %v3741_v4, %s5411_s23  ;;  %2089 = vst.msk [vmem:[#allocation3 + $0x70] sm:$0xf] %vm2074_vm3, %v2007_v10  ;;  %v3746_v24 = vrot.slane %v3745_v2, 4  ;;  %v3602_v4 = vrot.slane %v3601_v45, 4  ;;  %v2902_v53 = vld [vmem:[#allocation2 + $0xb0] sm:$0x1] }
 0x242   : > { %2282 = vst.msk [vmem:[#allocation3 + $0x70] sm:$0xf] %vm2267_vm4, %v6775_v52  ;;  %v2515_v52 = vsel %vm5512_vm8, %v2510_v15, %v2514_v38  ;;  %v2676_v2 = vrot.slane %v2674_v51, 4  ;;  %v1163_v51 = vld [vmem:[#allocation2 + $0x90] sm:$0xf] }
 0x243   : > { %v2011_v9 = vpop.permute.xlu0 %2010  ;;  %v3751_v19 = vsel %vm5512_vm8, %v3746_v24, %v3750_v5  ;;  %v3607_v38 = vsel %vm5512_vm8, %v3602_v4, %v3606_v61  ;;  %v2680_v5 = vshll.u32 %v2341_v18, 16  ;;  %1195 = vst.msk [vmem:[#allocation3 + $0xc0] sm:$0xf] %vm592_vm1, %v1163_v51  ;;  %v3226_v13 = vld [vmem:[#allocation2 + $0xb8] sm:$0xf] }
 0x244   : > { %v2342_v51 = vld [vmem:[#allocation2 + $0xb4] sm:$0xf]  ;;  %1196 = vst.msk [vmem:[#allocation3 + $0xc8] sm:$0xf] %vm592_vm1, %v1164_v46 }
 0x245   : > { %3313 = vrot.lane.b32.xlu2 %v3224_v49, %s5410_s22  ;;  %v6855_v49 = vld [vmem:[#allocation2 + $0xac] sm:$0xf]  ;;  %v2682_v41 = vrot.slane %v2680_v5, 5 }
 0x246   : > { %3311 = vrot.lane.b32.xlu1 %v3223_v36, %s5410_s22  ;;  %v2672_v36 = vrot.slane %v2670_v33, 5  ;;  %v3050_v14 = vrot.slane %v6855_v49, 5 }
 0x247   : > { %v2015_v7 = vpop.permute.xlu2 %2014 }
 0x248   : > { %v2202_v54 = vpop.permute.xlu1 %2201  ;;  %v2677_v24 = vor.u32 %v2676_v2, %v2672_v36  ;;  %v3052_v47 = vrot.slane %v3050_v14, 4  ;;  %v3225_v2 = vld [vmem:[#allocation2 + $0xb4] sm:$0xf] }
 0x249   : > { %2758 = vrot.lane.b32.xlu0 %v2515_v52, %s5408_s16  ;;  %2283 = vst.msk [vmem:[#allocation3 + $0x78] sm:$0xf] %vm2267_vm4, %v2202_v54  ;;  %v4997_v54 = vrot.slane %v2900_v60, 9 }
 0x24a   : > { %v2678_v34 = vrot.slane %v2677_v24, 4 }
 0x24b   : > { %v6826_v17 = vpop.permute.xlu0 %2205  ;;  %v3051_v6 = vsel %vm5504_vm5, %v4997_v54, %v3050_v14  ;;  %v4634_v14 = vpop.f32.mrf.mxu2 }
 0x24c   : > { %v2683_v45 = vsel %vm5512_vm8, %v2678_v34, %v2682_v41 }
 0x24d   : > { %2756 = vrot.lane.b32.xlu2 %v2505_v20, %s5408_s16 }
 0x24e   : > { %3874 = vrot.lane.b32.xlu1 %v3751_v19, %s5411_s23  ;;  %v4540_v44 = vpop.f32.mrf.mxu1  ;;  %v2520_v19 = vshll.u32 %v2321_v23, 16 }
 0x24f   : > { %v6837_v37 = vpop.permute.xlu2 %2209  ;;  %v4541_v10 = vadd.f32 %v6679_v11, %v4540_v44  ;;  %v3431_v44 = vld [vmem:[#allocation2 + $0xb4] sm:$0xf] }
 0x250   : > { %v1671_v42 = vpop.permute.xlu1 %1670  ;;  %v2522_v27 = vrot.slane %v2520_v19, 5  ;;  %v3756_v33 = vshll.u32 %v3431_v44, 16 }
 0x251   : > { %3287 = vrot.lane.b32.xlu0 %v3211_v28, %s5410_s22  ;;  %1751 = vst.msk [vmem:[#allocation3 + $0x80] sm:$0xf] %vm1734_vm2, %v1671_v42  ;;  %v4630_v48 = vadd.f32 %v6500_v16, %v4541_v10  ;;  %v3597_v16 = vsel %vm5512_vm8, %v3592_v0, %v6830_v1  ;;  %v2517_v1 = vshrl.u32 %v2321_v23, 16  ;;  %v3432_v28 = vld [vmem:[#allocation2 + $0xb8] sm:$0xf] }
 0x252   : > { %2091 = vst.msk [vmem:[#allocation3 + $0x80] sm:$0xf] %vm2074_vm3, %v2011_v9  ;;  %v2661_v9 = vshrl.u32 %v2339_v62, 16  ;;  %v3762_v40 = vshll.u32 %v3432_v28, 16  ;;  %v3766_v30 = vshrl.u32 %v3432_v28, 16 }
 0x253   : > { %v1675_v56 = vpop.permute.xlu0 %1674  ;;  %2284 = vst.msk [vmem:[#allocation3 + $0x80] sm:$0xf] %vm2267_vm4, %v6786_v58  ;;  %v4706_v20 = vmax.f32 %v4630_v48, 0.0  ;;  %v2519_v57 = vrot.slane %v2517_v1, 4 }
 0x254   : > { %1753 = vst.msk [vmem:[#allocation3 + $0x90] sm:$0xf] %vm1734_vm2, %v1675_v56  ;;  %v2663_v52 = vrot.slane %v2661_v9, 4  ;;  %v3753_v56 = vshrl.u32 %v3431_v44, 16  ;;  %v3764_v4 = vrot.slane %v3762_v40, 5  ;;  %v3768_v61 = vrot.slane %v3766_v30, 4 }
 0x255   : > { %3095 = vrot.lane.b32.xlu2 %v3005_v63, %s5409_s17  ;;  %2093 = vst.msk [vmem:[#allocation3 + $0x90] sm:$0xf] %vm2074_vm3, %v2015_v7  ;;  %v2322_v63 = vld [vmem:[#allocation2 + $0x64] sm:$0xf]  ;;  %v2523_v10 = vor.u32 %v2522_v27, %v2519_v57  ;;  %v3414_v57 = vld [vmem:[#allocation2 + $0x70] sm:$0xf] }
 0x256   : > { %3093 = vrot.lane.b32.xlu1 %v3002_v43, %s5409_s17  ;;  %v4542_v15 = vpop.f32.mrf.mxu1  ;;  %v3433_v43 = vld [vmem:[#allocation2 + $0xbc] sm:$0x1]  ;;  %v2526_v60 = vshll.u32 %v2322_v63, 16  ;;  %v3755_v49 = vrot.slane %v3753_v56, 4  ;;  %v3769_v0 = vor.u32 %v3768_v61, %v3764_v4 }
 0x257   : > { %v1679_v58 = vpop.permute.xlu2 %1678  ;;  %v4543_v29 = vadd.f32 %v6679_v11, %v4542_v15  ;;  %v3758_v15 = vrot.slane %v3756_v33, 5  ;;  %v2524_v48 = vrot.slane %v2523_v10, 4 }
 0x258   : > { %1755 = vst.msk [vmem:[#allocation3 + $0xa0] sm:$0xf] %vm1734_vm2, %v1679_v58  ;;  %v2013_v7 = vpop.permute.xlu1 %2012  ;;  %v3053_v58 = vrot.slane %v2902_v53, 5 }
 0x259   : > { %3850 = vrot.lane.b32.xlu0 %v3607_v38, %s5411_s23  ;;  %2092 = vst.msk [vmem:[#allocation3 + $0x88] sm:$0xf] %vm2074_vm3, %v2013_v7  ;;  %v4632_v25 = vadd.f32 %v6512_v35, %v4543_v29  ;;  %v6897_v7 = vld [vmem:[#allocation2 + $0x64] sm:$0xf]  ;;  %v3413_v29 = vld [vmem:[#allocation2 + $0x6c] sm:$0xf] }
 0x25a   : > { %2285 = vst.msk [vmem:[#allocation3 + $0x88] sm:$0xf] %vm2267_vm4, %v6826_v17  ;;  %v2667_v17 = vor.u32 %v2666_v59, %v2663_v52  ;;  %v3054_v18 = vsel %vm5504_vm5, %v3052_v47, %v3053_v58  ;;  %v2528_v52 = vrot.slane %v2526_v60, 5  ;;  %v2530_v59 = vshrl.u32 %v2322_v63, 16  ;;  %v4636_v47 = vpop.f32.mrf.mxu2 }
 0x25b   : > { %v2017_v31 = vpop.permute.xlu0 %2016  ;;  %v4707_v26 = vmax.f32 %v4632_v25, 0.0  ;;  %v3759_v25 = vor.u32 %v3758_v15, %v3755_v49  ;;  %v3008_v24 = vrot.slane %v6897_v7, 5  ;;  %v3609_v5 = vshrl.u32 %v3413_v29, 16  ;;  %v2344_v7 = vld [vmem:[#allocation2 + $0xbc] sm:$0x1] }
 0x25c   : > { %v2668_v39 = vrot.slane %v2667_v17, 4  ;;  %v2685_v49 = vshrl.u32 %v2342_v51, 16  ;;  %v2688_v15 = vshll.u32 %v2342_v51, 16 }
 0x25d   : > { %3848 = vrot.lane.b32.xlu2 %v3597_v16, %s5411_s23  ;;  %v5271_v8 = vpack.c.bf16 %v4707_v26, %v4706_v20  ;;  %v2529_v16 = vsel %vm5512_vm8, %v2524_v48, %v2528_v52  ;;  %v3612_v20 = vshll.u32 %v3413_v29, 16  ;;  %v3760_v17 = vrot.slane %v3759_v25, 4 }
 0x25e   : > { %3289 = vrot.lane.b32.xlu1 %v3212_v55, %s5410_s22  ;;  %v2673_v42 = vsel %vm5512_vm8, %v2668_v39, %v2672_v36  ;;  %v3772_v36 = vshll.u32 %v3433_v43, 16  ;;  %v2884_v55 = vld [vmem:[#allocation2 + $0x68] sm:$0x1]  ;;  %v3010_v41 = vrot.slane %v3008_v24, 4  ;;  %v3611_v19 = vrot.slane %v3609_v5, 4 }
 0x25f   : > { %v2021_v35 = vpop.permute.xlu2 %2020  ;;  %5343 = vst [vmem:[%s6721_s10 + $0x8] sm:$0xff] %v5271_v8   ;;  %v2323_v8 = vld [vmem:[#allocation2 + $0x68] sm:$0x1]  ;;  %v3011_v1 = vrot.slane %v2884_v55, 5  ;;  %v3614_v28 = vrot.slane %v3612_v20, 5  ;;  %v3765_v44 = vsel %vm5512_vm8, %v3760_v17, %v3764_v4  ;;  %v3622_v48 = vshrl.u32 %v3414_v57, 16 }
 0x260   : > { %v2208_v22 = vpop.permute.xlu1 %2207  ;;  %v3774_v54 = vrot.slane %v3772_v36, 5  ;;  %v2882_v39 = vld [vmem:[#allocation2 + $0x60] sm:$0xe]  ;;  %v2536_v40 = vshll.u32 %v2323_v8, 16  ;;  %v2687_v25 = vrot.slane %v2685_v49, 4 }
 0x261   : > { %3121 = vrot.lane.b32.xlu0 %v3051_v6, %s5409_s17  ;;  %2286 = vst.msk [vmem:[#allocation3 + $0x90] sm:$0xf] %vm2267_vm4, %v2208_v22  ;;  %v2343_v22 = vld [vmem:[#allocation2 + $0xb8] sm:$0xf]  ;;  %v4991_v53 = vrot.slane %v2882_v39, 9  ;;  %v3615_v56 = vor.u32 %v3614_v28, %v3611_v19  ;;  %v3624_v5 = vrot.slane %v3622_v48, 4 }
 0x262   : > { %v2694_v27 = vshll.u32 %v2343_v22, 16  ;;  %v2698_v33 = vshrl.u32 %v2343_v22, 16  ;;  %v2538_v4 = vrot.slane %v2536_v40, 5  ;;  %v3214_v55 = vld [vmem:[#allocation2 + $0x70] sm:$0xf] }
 0x263   : > { %v6878_v50 = vpop.permute.xlu0 %2211  ;;  %v3616_v36 = vrot.slane %v3615_v56, 4  ;;  %v2904_v28 = vld [vmem:[#allocation2 + $0xb8] sm:$0xf]  ;;  %v3434_v40 = vld [vmem:[#allocation2 + $0xc0] sm:$0xf] }
 0x264   : > { %v6927_v60 = vrot.slane %v2694_v27, 5  ;;  %v3777_v27 = vshrl.u32 %v3434_v40, 16  ;;  %v3780_v46 = vshll.u32 %v3434_v40, 16  ;;  %v2325_v49 = vld [vmem:[#allocation2 + $0x70] sm:$0xf] }
 0x265   : > { %2786 = vrot.lane.b32.xlu2 %v2683_v45, %s5408_s16 }
 0x266   : > { %2784 = vrot.lane.b32.xlu1 %v2673_v42, %s5408_s16  ;;  %v3012_v42 = vsel %vm5504_vm5, %v3010_v41, %v3011_v1 }
 0x267   : > { %v6887_v62 = vpop.permute.xlu2 %2215 }
 0x268   : > { %v1677_v9 = vpop.permute.xlu1 %1676 }
 0x269   : > { %3317 = vrot.lane.b32.xlu0 %v3226_v13, %s5410_s22  ;;  %1754 = vst.msk [vmem:[#allocation3 + $0x98] sm:$0xf] %vm1734_vm2, %v1677_v9  ;;  %v3618_v9 = vshll.u32 %v3414_v57, 16  ;;  %v3057_v57 = vrot.slane %v2904_v28, 5 }
 0x26a   : > { %2094 = vst.msk [vmem:[#allocation3 + $0x98] sm:$0xf] %vm2074_vm3, %v2017_v31  ;;  %v3770_v31 = vrot.slane %v3769_v0, 4  ;;  %v3009_v0 = vsel %vm5504_vm5, %v4991_v53, %v3008_v24 }
 0x26b   : > { %v1681_v38 = vpop.permute.xlu0 %1680  ;;  %2287 = vst.msk [vmem:[#allocation3 + $0x98] sm:$0xf] %vm2267_vm4, %v6837_v37 }
 0x26c   : > { %1756 = vst.msk [vmem:[#allocation3 + $0xa8] sm:$0xf] %vm1734_vm2, %v1681_v38  ;;  %v3775_v34 = vsel %vm5512_vm8, %v3770_v31, %v3774_v54 }
 0x26d   : > { %3315 = vrot.lane.b32.xlu2 %v3225_v2, %s5410_s22  ;;  %2096 = vst.msk [vmem:[#allocation3 + $0xa8] sm:$0xf] %vm2074_vm3, %v2021_v35  ;;  %v2532_v35 = vrot.slane %v2530_v59, 4  ;;  %v2700_v2 = vrot.slane %v2698_v33, 4  ;;  %v3436_v33 = vld [vmem:[#allocation2 + $0xc8] sm:$0x1] }
 0x26e   : > { %3123 = vrot.lane.b32.xlu1 %v3054_v18, %s5409_s17 }
 0x26f   : > { %v1685_v37 = vpop.permute.xlu2 %1684 }
 0x270   : > { %1758 = vst.msk [vmem:[#allocation3 + $0xb8] sm:$0xf] %vm1734_vm2, %v1685_v37  ;;  %v2019_v26 = vpop.permute.xlu1 %2018  ;;  %v4545_v23 = vpop.f32.mrf.mxu1  ;;  %v2690_v37 = vrot.slane %v2688_v15, 5 }
 0x271   : > { %2760 = vrot.lane.b32.xlu0 %v2529_v16, %s5408_s16  ;;  %2095 = vst.msk [vmem:[#allocation3 + $0xa0] sm:$0xf] %vm2074_vm3, %v2019_v26  ;;  %v4546_v30 = vadd.f32 %v6679_v11, %v4545_v23  ;;  %v2704_v16 = vshll.u32 %v2344_v7, 16  ;;  %v3415_v23 = vld [vmem:[#allocation2 + $0x74] sm:$0x1] }
 0x272   : > { %2288 = vst.msk [vmem:[#allocation3 + $0xa0] sm:$0xf] %vm2267_vm4, %v6878_v50  ;;  %v2533_v50 = vor.u32 %v2532_v35, %v2528_v52  ;;  %v3620_v52 = vrot.slane %v3618_v9, 5  ;;  %v2691_v26 = vor.u32 %v2690_v37, %v2687_v25  ;;  %v3435_v35 = vld [vmem:[#allocation2 + $0xc4] sm:$0xf]  ;;  %v3628_v1 = vshll.u32 %v3415_v23, 16 }
 0x273   : > { %v6911_v6 = vpop.permute.xlu0 %2022  ;;  %v4635_v13 = vadd.f32 %v4634_v14, %v4546_v30  ;;  %v2701_v14 = vor.u32 %v2700_v2, %v6927_v60  ;;  %v2706_v8 = vrot.slane %v2704_v16, 5  ;;  %v3786_v22 = vshll.u32 %v3435_v35, 16  ;;  %v3227_v9 = vld [vmem:[#allocation2 + $0xc0] sm:$0xf]  ;;  %v2324_v2 = vld [vmem:[#allocation2 + $0x6c] sm:$0xf] }
 0x274   : > { %v2534_v43 = vrot.slane %v2533_v50, 4  ;;  %v3621_v54 = vsel %vm5512_vm8, %v3616_v36, %v3620_v52  ;;  %v3625_v41 = vor.u32 %v3624_v5, %v3620_v52  ;;  %v3790_v39 = vshrl.u32 %v3435_v35, 16  ;;  %v2886_v5 = vld [vmem:[#allocation2 + $0x70] sm:$0xf]  ;;  %v2345_v35 = vld [vmem:[#allocation2 + $0xc0] sm:$0xf] }
 0x275   : > { %3878 = vrot.lane.b32.xlu2 %v3775_v34, %s5411_s23  ;;  %v2702_v17 = vrot.slane %v2701_v14, 4  ;;  %v3213_v34 = vld [vmem:[#allocation2 + $0x6c] sm:$0xf]  ;;  %v3630_v50 = vrot.slane %v3628_v1, 5  ;;  %v3788_v53 = vrot.slane %v3786_v22, 5  ;;  %v2541_v52 = vshrl.u32 %v2324_v2, 16 }
 0x276   : > { %3876 = vrot.lane.b32.xlu1 %v3765_v44, %s5411_s23  ;;  %v2539_v18 = vsel %vm5512_vm8, %v2534_v43, %v2538_v4  ;;  %v3626_v44 = vrot.slane %v3625_v41, 4  ;;  %v3792_v56 = vrot.slane %v3790_v39, 4  ;;  %v3782_v43 = vrot.slane %v3780_v46, 5 }
 0x277   : > { %v2755_v45 = vpop.permute.xlu2 %2754  ;;  %v2543_v23 = vrot.slane %v2541_v52, 4  ;;  %v3015_v41 = vrot.slane %v2886_v5, 5  ;;  %v2709_v22 = vshrl.u32 %v2345_v35, 16 }
 0x278   : > { %2840 = vst.msk [vmem:[#allocation3 + $0x58] sm:$0xf] %vm2828_vm6, %v2755_v45  ;;  %v2214_v63 = vpop.permute.xlu1 %2213  ;;  %v4547_v61 = vpop.f32.mrf.mxu1  ;;  %v3631_v51 = vsel %vm5512_vm8, %v3626_v44, %v3630_v50  ;;  %v2712_v44 = vshll.u32 %v2345_v35, 16  ;;  %v3417_v50 = vld [vmem:[#allocation2 + $0x7c] sm:$0xf] }
 0x279   : > { %3099 = vrot.lane.b32.xlu0 %v3012_v42, %s5409_s17  ;;  %2289 = vst.msk [vmem:[#allocation3 + $0xa8] sm:$0xf] %vm2267_vm4, %v2214_v63  ;;  %v4548_v10 = vadd.f32 %v6679_v11, %v4547_v61  ;;  %v4708_v11 = vmax.f32 %v4635_v13, 0.0  ;;  %v2905_v42 = vld [vmem:[#allocation2 + $0xbc] sm:$0x1]  ;;  %v3059_v61 = vrot.slane %v3057_v57, 4 }
 0x27a   : > { %v3060_v4 = vrot.slane %v2905_v42, 5  ;;  %v2903_v13 = vld [vmem:[#allocation2 + $0xb4] sm:$0xe]  ;;  %v2711_v46 = vrot.slane %v2709_v22, 4 }
 0x27b   : > { %v2218_v58 = vpop.permute.xlu0 %2217  ;;  %v4637_v38 = vadd.f32 %v4636_v47, %v4548_v10  ;;  %v3779_v10 = vrot.slane %v3777_v27, 4  ;;  %v3793_v47 = vor.u32 %v3792_v56, %v3788_v53  ;;  %v4998_v15 = vrot.slane %v2903_v13, 9  ;;  %v2887_v13 = vld [vmem:[#allocation2 + $0x74] sm:$0x1] }
 0x27c   : > { %v3642_v56 = vshll.u32 %v3417_v50, 16 }
 0x27d   : > { %3097 = vrot.lane.b32.xlu2 %v3009_v0, %s5409_s17  ;;  %v4709_v29 = vmax.f32 %v4637_v38, 0.0  ;;  %v3061_v0 = vsel %vm5504_vm5, %v3059_v61, %v3060_v4  ;;  %v3783_v36 = vor.u32 %v3782_v43, %v3779_v10  ;;  %v3794_v48 = vrot.slane %v3793_v47, 4  ;;  %v2346_v10 = vld [vmem:[#allocation2 + $0xc4] sm:$0xf]  ;;  %v3216_v43 = vld [vmem:[#allocation2 + $0x7c] sm:$0xf] }
 0x27e   : > { %2762 = vrot.lane.b32.xlu1 %v2539_v18, %s5408_s16  ;;  %v3058_v18 = vsel %vm5504_vm5, %v4998_v15, %v3057_v57  ;;  %v3416_v57 = vld [vmem:[#allocation2 + $0x78] sm:$0xf]  ;;  %v7008_v47 = vrot.slane %v3642_v56, 5  ;;  %v3418_v15 = vld [vmem:[#allocation2 + $0x80] sm:$0x1] }
 0x27f   : > { %v2027_v59 = vpop.permute.xlu2 %2026  ;;  %v5276_v31 = vpack.c.bf16 %v4709_v29, %v4708_v11  ;;  %v2550_v11 = vshll.u32 %v2325_v49, 16  ;;  %v2554_v29 = vshrl.u32 %v2325_v49, 16  ;;  %v3784_v37 = vrot.slane %v3783_v36, 4  ;;  %v2906_v56 = vld [vmem:[#allocation2 + $0xc0] sm:$0xe] }
 0x280   : > { %v1683_v24 = vpop.permute.xlu1 %1682  ;;  %v3636_v61 = vshll.u32 %v3416_v57, 16  ;;  %v3017_v36 = vrot.slane %v3015_v41, 4 }
 0x281   : > { %3852 = vrot.lane.b32.xlu0 %v3621_v54, %s5411_s23  ;;  %5344 = vst [vmem:[%s6721_s10 + $0x10] sm:$0xff] %v5276_v31   ;;  %v2552_v54 = vrot.slane %v2550_v11, 5  ;;  %v2556_v14 = vrot.slane %v2554_v29, 4  ;;  %v3437_v11 = vld [vmem:[#allocation2 + $0xcc] sm:$0xf] }
 0x282   : > { %1757 = vst.msk [vmem:[#allocation3 + $0xb0] sm:$0xf] %vm1734_vm2, %v1683_v24  ;;  %v2885_v24 = vld [vmem:[#allocation2 + $0x6c] sm:$0xe]  ;;  %v3215_v29 = vld [vmem:[#allocation2 + $0x78] sm:$0xf] }
 0x283   : > { %v1687_v20 = vpop.permute.xlu0 %1686  ;;  %2097 = vst.msk [vmem:[#allocation3 + $0xb0] sm:$0xf] %vm2074_vm3, %v6911_v6  ;;  %v2692_v6 = vrot.slane %v2691_v26, 4  ;;  %v6978_v26 = vpop.f32.mrf.mxu2  ;;  %v2557_v1 = vor.u32 %v2556_v14, %v2552_v54  ;;  %v7020_v14 = vld [vmem:[#allocation2 + $0xc4] sm:$0xf] }
 0x284   : > { %2290 = vst.msk [vmem:[#allocation3 + $0xb0] sm:$0xf] %vm2267_vm4, %v6887_v62  ;;  %v2707_v62 = vsel %vm5512_vm8, %v2702_v17, %v2706_v8  ;;  %v3789_v8 = vsel %vm5512_vm8, %v3784_v37, %v3788_v53  ;;  %v2714_v53 = vrot.slane %v2712_v44, 5 }
 0x285   : > { %3293 = vrot.lane.b32.xlu2 %v3214_v55, %s5410_s22  ;;  %1759 = vst.msk [vmem:[#allocation3 + $0xc0] sm:$0xf] %vm1734_vm2, %v1687_v20  ;;  %v2326_v20 = vld [vmem:[#allocation2 + $0x74] sm:$0x1]  ;;  %v2558_v40 = vrot.slane %v2557_v1, 4 }
 0x286   : > { %2099 = vst.msk [vmem:[#allocation3 + $0xc0] sm:$0xf] %vm2074_vm3, %v2027_v59  ;;  %3291 = vrot.lane.b32.xlu1 %v3213_v34, %s5410_s22  ;;  %v2544_v59 = vshll.u32 %v2324_v2, 16  ;;  %v4992_v34 = vrot.slane %v2885_v24, 9  ;;  %v3018_v2 = vrot.slane %v2887_v13, 5 }
 0x287   : > { %v3284_v19 = vpop.permute.xlu2 %3283  ;;  %2292 = vst.msk [vmem:[#allocation3 + $0xc0] sm:$0xf] %vm2267_vm4, %v6080_v12  ;;  %v2697_v12 = vsel %vm5512_vm8, %v2692_v6, %v6927_v60  ;;  %v3228_v6 = vld [vmem:[#allocation2 + $0xc4] sm:$0xf] }
 0x288   : > { %v2025_v30 = vpop.permute.xlu1 %2024  ;;  %v2546_v55 = vrot.slane %v2544_v59, 5  ;;  %v3016_v39 = vsel %vm5504_vm5, %v4992_v34, %v3015_v41  ;;  %v3652_v59 = vshll.u32 %v3418_v15, 16  ;;  %v3019_v24 = vsel %vm5504_vm5, %v3017_v36, %v3018_v2  ;;  %v2908_v34 = vld [vmem:[#allocation2 + $0xc8] sm:$0x1]  ;;  %v2327_v15 = vld [vmem:[#allocation2 + $0x78] sm:$0xf] }
 0x289   : > { %2790 = vrot.lane.b32.xlu0 %v2707_v62, %s5408_s16  ;;  %2098 = vst.msk [vmem:[#allocation3 + $0xb8] sm:$0xf] %vm2074_vm3, %v2025_v30  ;;  %v3064_v41 = vrot.slane %v7020_v14, 5 }
 0x28a   : > { %2291 = vst.msk [vmem:[#allocation3 + $0xb8] sm:$0xf] %vm2267_vm4, %v2218_v58  ;;  %v3796_v58 = vshll.u32 %v3436_v33, 16  ;;  %v2547_v28 = vor.u32 %v2546_v55, %v2543_v23  ;;  %v3646_v33 = vshrl.u32 %v3417_v50, 16  ;;  %v3804_v23 = vshll.u32 %v3437_v11, 16 }
 0x28b   : > { %v2029_v45 = vpop.permute.xlu0 %2028  ;;  %v3654_v35 = vrot.slane %v3652_v59, 5 }
 0x28c   : > { %v3798_v7 = vrot.slane %v3796_v58, 5  ;;  %v3648_v58 = vrot.slane %v3646_v33, 4 }
 0x28d   : > { %2788 = vrot.lane.b32.xlu2 %v2697_v12, %s5408_s16  ;;  %v6995_v12 = vpop.f32.mrf.mxu2 }
 0x28e   : > { %3854 = vrot.lane.b32.xlu1 %v3631_v51, %s5411_s23  ;;  %v3799_v31 = vsel %vm5512_vm8, %v3794_v48, %v3798_v7  ;;  %v3633_v51 = vshrl.u32 %v3416_v57, 16  ;;  %v2718_v48 = vshll.u32 %v2346_v10, 16  ;;  %v3649_v52 = vor.u32 %v3648_v58, %v7008_v47 }
 0x28f   : > { %v6963_v63 = vpop.permute.xlu2 %3846 }
 0x290   : > { %v2753_v60 = vpop.permute.xlu1 %2752  ;;  %v2720_v5 = vrot.slane %v2718_v48, 5 }
 0x291   : > { %3319 = vrot.lane.b32.xlu0 %v3227_v9, %s5410_s22  ;;  %2839 = vst.msk [vmem:[#allocation3 + $0x50] sm:$0xf] %vm2828_vm6, %v2753_v60  ;;  %v2715_v9 = vor.u32 %v2714_v53, %v2711_v46  ;;  %v3067_v53 = vrot.slane %v2908_v34, 5 }
 0x293   : > { %v3090_v38 = vpop.permute.xlu0 %3089 }
 0x294   : > { %3176 = vst.msk [vmem:[#allocation3 + $0x50] sm:$0xf] %vm3165_vm7, %v3090_v38  ;;  %v3635_v38 = vrot.slane %v3633_v51, 4 }
 0x295   : > { %3370 = vst.msk [vmem:[#allocation3 + $0x50] sm:$0xf] %vm3359_vm9, %v3284_v19  ;;  %3127 = vrot.lane.b32.xlu2 %v3061_v0, %s5409_s17  ;;  %v2560_v19 = vshll.u32 %v2326_v20, 16  ;;  %v3638_v0 = vrot.slane %v3636_v61, 5  ;;  %v3801_v20 = vshrl.u32 %v3437_v11, 16 }
 0x296   : > { %3125 = vrot.lane.b32.xlu1 %v3058_v18, %s5409_s17  ;;  %v2716_v18 = vrot.slane %v2715_v9, 4 }
 0x297   : > { %v3118_v25 = vpop.permute.xlu2 %3117  ;;  %v2562_v30 = vrot.slane %v2560_v19, 5  ;;  %v3803_v50 = vrot.slane %v3801_v20, 4 }
 0x298   : > { %v1689_v16 = vpop.permute.xlu1 %1688 }
 0x299   : > { %3882 = vrot.lane.b32.xlu0 %v3799_v31, %s5411_s23  ;;  %1760 = vst.msk [vmem:[#allocation3 + $0xc8] sm:$0xf] %vm1734_vm2, %v1689_v16  ;;  %v2563_v42 = vsel %vm5512_vm8, %v2558_v40, %v2562_v30  ;;  %v2722_v31 = vshrl.u32 %v2346_v10, 16  ;;  %v7022_v16 = vpop.f32.mrf.mxu2 }
 0x29a   : > { %2100 = vst.msk [vmem:[#allocation3 + $0xc8] sm:$0xf] %vm2074_vm3, %v2029_v45  ;;  %v2548_v45 = vrot.slane %v2547_v28, 4 }
 0x29b   : > { %v3286_v17 = vpop.permute.xlu0 %3285  ;;  %2293 = vst.msk [vmem:[#allocation3 + $0xc8] sm:$0xf] %vm2267_vm4, %v6075_v3  ;;  %v2724_v40 = vrot.slane %v2722_v31, 4 }
 0x29c   : > { %v2553_v4 = vsel %vm5512_vm8, %v2548_v45, %v2552_v54  ;;  %v3639_v54 = vor.u32 %v3638_v0, %v3635_v38  ;;  %v3806_v45 = vrot.slane %v3804_v23, 5 }
 0x29d   : > { %3880 = vrot.lane.b32.xlu2 %v3789_v8, %s5411_s23  ;;  %v3650_v8 = vrot.slane %v3649_v52, 4  ;;  %v2725_v51 = vor.u32 %v2724_v40, %v2720_v5  ;;  %v2568_v52 = vshll.u32 %v2327_v15, 16 }
 0x29e   : > { %3321 = vrot.lane.b32.xlu1 %v3228_v6, %s5410_s22 }
 0x29f   : > { %v6988_v62 = vpop.permute.xlu2 %3313  ;;  %v3655_v46 = vsel %vm5512_vm8, %v3650_v8, %v3654_v35  ;;  %v2726_v36 = vrot.slane %v2725_v51, 4 }
 0x2a0   : > { %v3092_v3 = vpop.permute.xlu1 %3091 }
 0x2a1   : > { %3101 = vrot.lane.b32.xlu0 %v3016_v39, %s5409_s17  ;;  %3177 = vst.msk [vmem:[#allocation3 + $0x58] sm:$0xf] %vm3165_vm7, %v3092_v3  ;;  %v3640_v39 = vrot.slane %v3639_v54, 4  ;;  %v2347_v3 = vld [vmem:[#allocation2 + $0xc8] sm:$0x1]  ;;  %v4646_v9 = vpop.f32.mrf.mxu2 }
 0x2a2   : > { %3371 = vst.msk [vmem:[#allocation3 + $0x58] sm:$0xf] %vm3359_vm9, %v3286_v17  ;;  %v2721_v17 = vsel %vm5512_vm8, %v2716_v18, %v2720_v5  ;;  %v2728_v61 = vshll.u32 %v2347_v3, 16  ;;  %v2565_v18 = vshrl.u32 %v2327_v15, 16  ;;  %v2329_v54 = vld [vmem:[#allocation2 + $0x80] sm:$0x1] }
 0x2a3   : > { %v2781_v27 = vpop.permute.xlu0 %2780  ;;  %3932 = vst.msk [vmem:[#allocation3 + $0x58] sm:$0xf] %vm3920_vm10, %v6963_v63  ;;  %v3645_v33 = vsel %vm5512_vm8, %v3640_v39, %v7008_v47  ;;  %v2584_v34 = vshll.u32 %v2329_v54, 16 }
 0x2a4   : > { %2853 = vst.msk [vmem:[#allocation3 + $0xc0] sm:$0xf] %vm2828_vm6, %v2781_v27  ;;  %v2730_v2 = vrot.slane %v2728_v61, 5  ;;  %v2567_v23 = vrot.slane %v2565_v18, 4  ;;  %v2889_v61 = vld [vmem:[#allocation2 + $0x7c] sm:$0xf] }
 0x2a5   : > { %2766 = vrot.lane.b32.xlu2 %v2563_v42, %s5408_s16  ;;  %3190 = vst.msk [vmem:[#allocation3 + $0xc0] sm:$0xf] %vm3165_vm7, %v3118_v25  ;;  %v7016_v25 = vld [vmem:[%s7315_s4] ss:$0 sm:$0xff]  ;;  %v3066_v42 = vrot.slane %v3064_v41, 4  ;;  %v3022_v15 = vrot.slane %v2889_v61, 5 }
 0x2a6   : > { %2764 = vrot.lane.b32.xlu1 %v2553_v4, %s5408_s16  ;;  %v2328_v4 = vld [vmem:[#allocation2 + $0x7c] sm:$0xf] }
 0x2a7   : > { %v2757_v63 = vpop.permute.xlu2 %2756  ;;  %v2578_v47 = vshrl.u32 %v2328_v4, 16  ;;  %v3024_v18 = vrot.slane %v3022_v15, 4 }
 0x2a8   : > { %2841 = vst.msk [vmem:[#allocation3 + $0x60] sm:$0xf] %vm2828_vm6, %v2757_v63  ;;  %v3845_v60 = vpop.permute.xlu1 %3844  ;;  %v4550_v49 = vpop.f32.mrf.mxu1 }
 0x2a9   : > { %3297 = vrot.lane.b32.xlu0 %v3216_v43, %s5410_s22  ;;  %3931 = vst.msk [vmem:[#allocation3 + $0x50] sm:$0xf] %vm3920_vm10, %v3845_v60  ;;  %v4551_v37 = vadd.f32 %v7016_v25, %v4550_v49  ;;  %v4999_v43 = vrot.slane %v2906_v56, 9  ;;  %v3068_v60 = vsel %vm5504_vm5, %v3066_v42, %v3067_v53  ;;  %v2574_v49 = vshll.u32 %v2328_v4, 16 }
 0x2aa   : > { %v5233_v22 = vld [vmem:[#allocation3 + $0x54] sm:$0xf0]  ;;  %v2580_v31 = vrot.slane %v2578_v47, 4  ;;  %v2890_v47 = vld [vmem:[#allocation2 + $0x80] sm:$0x1] }
 0x2ab   : > { %v3120_v7 = vpop.permute.xlu0 %3119  ;;  %v4640_v1 = vadd.f32 %v6978_v26, %v4551_v37  ;;  %v3438_v26 = vld [vmem:[#allocation2 + $0xd0] sm:$0xf]  ;;  %v3065_v59 = vsel %vm5504_vm5, %v4999_v43, %v3064_v41  ;;  %v7057_v37 = vrot.slane %v2574_v49, 5  ;;  %v3439_v41 = vld [vmem:[#allocation2 + $0xd4] sm:$0x1] }
 0x2ac   : > { %v3810_v13 = vshll.u32 %v3438_v26, 16  ;;  %v3419_v43 = vld [vmem:[#allocation2 + $0x84] sm:$0xf] }
 0x2ad   : > { %3295 = vrot.lane.b32.xlu2 %v3215_v29, %s5410_s22  ;;  %v4710_v63 = vmax.f32 %v4640_v1, 0.0  ;;  %v3814_v29 = vshrl.u32 %v3438_v26, 16  ;;  %v2581_v35 = vor.u32 %v2580_v31, %v7057_v37  ;;  %v3420_v26 = vld [vmem:[#allocation2 + $0x88] sm:$0xf] }
 0x2ae   : > { %3103 = vrot.lane.b32.xlu1 %v3019_v24, %s5409_s17  ;;  %v2731_v24 = vsel %vm5512_vm8, %v2726_v36, %v2730_v2  ;;  %v3666_v4 = vshll.u32 %v3420_v26, 16  ;;  %v3657_v2 = vshrl.u32 %v3419_v43, 16 }
 0x2af   : > { %v7027_v55 = vpop.permute.xlu2 %3095  ;;  %v3816_v8 = vrot.slane %v3814_v29, 4  ;;  %v3217_v29 = vld [vmem:[#allocation2 + $0x84] sm:$0xf] }
 0x2b0   : > { %v2783_v19 = vpop.permute.xlu1 %2782  ;;  %v4552_v6 = vpop.f32.mrf.mxu1  ;;  %v5058_v28 = vld [vmem:[#allocation3 + $0x50] sm:$0xf]  ;;  %v3659_v54 = vrot.slane %v3657_v2, 4 }
 0x2b1   : > { %2792 = vrot.lane.b32.xlu0 %v2721_v17, %s5408_s16  ;;  %2854 = vst.msk [vmem:[#allocation3 + $0xc8] sm:$0xf] %vm2828_vm6, %v2783_v19  ;;  %v4553_v30 = vadd.f32 %v7016_v25, %v4552_v6  ;;  %v5059_v44 = vor.u32 %v5233_v22, %v5058_v28  ;;  %v2570_v17 = vrot.slane %v2568_v52, 5  ;;  %v7072_v19 = vpop.f32.mrf.mxu2  ;;  %v3230_v22 = vld [vmem:[#allocation2 + $0xd0] sm:$0xf]  ;;  %v3025_v52 = vrot.slane %v2890_v47, 5 }
 0x2b2   : > { %3191 = vst.msk [vmem:[#allocation3 + $0xc8] sm:$0xf] %vm3165_vm7, %v3120_v7  ;;  %v3812_v7 = vrot.slane %v3810_v13, 5 }
 0x2b3   : > { %v3873_v57 = vpop.permute.xlu0 %3872  ;;  %3385 = vst.msk [vmem:[#allocation3 + $0xc8] sm:$0xf] %vm3359_vm9, %v6988_v62  ;;  %v4642_v27 = vadd.f32 %v6995_v12, %v4553_v30  ;;  %4559 = vmatmul.bf16.gmra.mxu1 %v5059_v44  ;;  %v3807_v12 = vor.u32 %v3806_v45, %v3803_v50  ;;  %v2571_v40 = vor.u32 %v2570_v17, %v2567_v23  ;;  %v3820_v44 = vshll.u32 %v3439_v41, 16  ;;  %v3229_v50 = vld [vmem:[#allocation2 + $0xcc] sm:$0xf] }
 0x2b4   : > { %v3817_v30 = vor.u32 %v3816_v8, %v3812_v7  ;;  %v2582_v45 = vrot.slane %v2581_v35, 4  ;;  %v3026_v35 = vsel %vm5504_vm5, %v3024_v18, %v3025_v52 }
 0x2b5   : > { %3858 = vrot.lane.b32.xlu2 %v3655_v46, %s5411_s23  ;;  %v4711_v62 = vmax.f32 %v4642_v27, 0.0  ;;  %v3808_v48 = vrot.slane %v3807_v12, 4  ;;  %v2572_v42 = vrot.slane %v2571_v40, 4  ;;  %v3822_v56 = vrot.slane %v3820_v44, 5 }
 0x2b6   : > { %3856 = vrot.lane.b32.xlu1 %v3645_v33, %s5411_s23  ;;  %v3818_v53 = vrot.slane %v3817_v30, 4 }
 0x2b7   : > { %v7047_v10 = vpop.permute.xlu2 %3848  ;;  %v5281_v58 = vpack.c.bf16 %v4711_v62, %v4710_v63  ;;  %v3813_v5 = vsel %vm5512_vm8, %v3808_v48, %v3812_v7  ;;  %v3670_v63 = vshrl.u32 %v3420_v26, 16  ;;  %v3660_v48 = vshll.u32 %v3419_v43, 16  ;;  %v3421_v7 = vld [vmem:[#allocation2 + $0x8c] sm:$0x1]  ;;  %v2892_v26 = vld [vmem:[#allocation2 + $0x88] sm:$0xf] }
 0x2b8   : > { %v3312_v38 = vpop.permute.xlu1 %3311  ;;  %v4555_v0 = vpop.f32.mrf.mxu1  ;;  %v3823_v49 = vsel %vm5512_vm8, %v3818_v53, %v3822_v56  ;;  %v3676_v31 = vshll.u32 %v3421_v7, 16 }
 0x2b9   : > { %3131 = vrot.lane.b32.xlu0 %v3068_v60, %s5409_s17  ;;  %5345 = vst [vmem:[%s6721_s10 + $0x18] sm:$0xff] %v5281_v58   ;;  %v4556_v14 = vadd.f32 %v7016_v25, %v4555_v0  ;;  %v2577_v60 = vsel %vm5512_vm8, %v2572_v42, %v7057_v37  ;;  %v3668_v0 = vrot.slane %v3666_v4, 5  ;;  %v3672_v36 = vrot.slane %v3670_v63, 4 }
 0x2ba   : > { %3384 = vst.msk [vmem:[#allocation3 + $0xc0] sm:$0xf] %vm3359_vm9, %v3312_v38  ;;  %v7091_v38 = vpop.f32.mrf.mxu2  ;;  %v3678_v41 = vrot.slane %v3676_v31, 5 }
 0x2bb   : > { %v2759_v11 = vpop.permute.xlu0 %2758  ;;  %3945 = vst.msk [vmem:[#allocation3 + $0xc0] sm:$0xf] %vm3920_vm10, %v3873_v57  ;;  %v4645_v6 = vadd.f32 %v7022_v16, %v4556_v14  ;;  %v2586_v57 = vrot.slane %v2584_v34, 5  ;;  %v3673_v37 = vor.u32 %v3672_v36, %v3668_v0  ;;  %v3662_v14 = vrot.slane %v3660_v48, 5  ;;  %v3423_v36 = vld [vmem:[#allocation2 + $0x94] sm:$0xf] }
 0x2bc   : > { %2842 = vst.msk [vmem:[#allocation3 + $0x68] sm:$0xf] %vm2828_vm6, %v2759_v11 }
 0x2bd   : > { %3129 = vrot.lane.b32.xlu2 %v3065_v59, %s5409_s17  ;;  %3179 = vst.msk [vmem:[#allocation3 + $0x68] sm:$0xf] %vm3165_vm7, %v7027_v55  ;;  %v4712_v27 = vmax.f32 %v4645_v6, 0.0  ;;  %v2587_v51 = vsel %vm5512_vm8, %v2582_v45, %v2586_v57  ;;  %v2888_v59 = vld [vmem:[#allocation2 + $0x78] sm:$0xe]  ;;  %v3674_v34 = vrot.slane %v3673_v37, 4 }
 0x2be   : > { %2794 = vrot.lane.b32.xlu1 %v2731_v24, %s5408_s16  ;;  %v2331_v24 = vld [vmem:[#allocation2 + $0x88] sm:$0xf]  ;;  %v2891_v57 = vld [vmem:[#allocation2 + $0x84] sm:$0xe]  ;;  %v3694_v37 = vshrl.u32 %v3423_v36, 16 }
 0x2bf   : > { %v2787_v20 = vpop.permute.xlu2 %2786  ;;  %v2598_v17 = vshll.u32 %v2331_v24, 16  ;;  %v2602_v8 = vshrl.u32 %v2331_v24, 16  ;;  %v3679_v44 = vsel %vm5512_vm8, %v3674_v34, %v3678_v41  ;;  %v4994_v63 = vrot.slane %v2891_v57, 9  ;;  %v3424_v34 = vld [vmem:[#allocation2 + $0x98] sm:$0x1] }
 0x2c0   : > { %2856 = vst.msk [vmem:[#allocation3 + $0xd8] sm:$0xf] %vm2828_vm6, %v2787_v20  ;;  %v3875_v1 = vpop.permute.xlu1 %3874  ;;  %v4557_v55 = vpop.f32.mrf.mxu1  ;;  %v2330_v20 = vld [vmem:[#allocation2 + $0x84] sm:$0xf] }
 0x2c1   : > { %3884 = vrot.lane.b32.xlu0 %v3813_v5, %s5411_s23  ;;  %3946 = vst.msk [vmem:[#allocation3 + $0xc8] sm:$0xf] %vm3920_vm10, %v3875_v1  ;;  %v4558_v28 = vadd.f32 %v7016_v25, %v4557_v55  ;;  %v3663_v1 = vor.u32 %v3662_v14, %v3659_v54  ;;  %v2589_v55 = vshrl.u32 %v2330_v20, 16  ;;  %v2592_v6 = vshll.u32 %v2330_v20, 16 }
 0x2c2   : > { %v5114_v12 = vld [vmem:[#allocation3 + $0xc0] sm:$0xf]  ;;  %v2600_v40 = vrot.slane %v2598_v17, 5  ;;  %v2604_v30 = vrot.slane %v2602_v8, 4  ;;  %v3696_v17 = vrot.slane %v3694_v37, 4 }
 0x2c3   : > { %v3288_v39 = vpop.permute.xlu0 %3287  ;;  %v4647_v3 = vadd.f32 %v4646_v9, %v4558_v28  ;;  %v7106_v28 = vpop.f32.mrf.mxu2 }
 0x2c5   : > { %3325 = vrot.lane.b32.xlu2 %v3230_v22, %s5410_s22  ;;  %v4713_v46 = vmax.f32 %v4647_v3, 0.0  ;;  %v3664_v3 = vrot.slane %v3663_v1, 4 }
 0x2c6   : > { %3323 = vrot.lane.b32.xlu1 %v3229_v50, %s5410_s22  ;;  %v2332_v50 = vld [vmem:[#allocation2 + $0x8c] sm:$0x1] }
 0x2c7   : > { %v7079_v16 = vpop.permute.xlu2 %3315  ;;  %v5286_v33 = vpack.c.bf16 %v4713_v46, %v4712_v27  ;;  %v2591_v27 = vrot.slane %v2589_v55, 4  ;;  %v2594_v46 = vrot.slane %v2592_v6, 5  ;;  %v2608_v61 = vshll.u32 %v2332_v50, 16  ;;  %v3425_v50 = vld [vmem:[#allocation2 + $0x9c] sm:$0xf] }
 0x2c8   : > { %v3094_v62 = vpop.permute.xlu1 %3093  ;;  %v5247_v13 = vld [vmem:[#allocation3 + $0xc4] sm:$0xf0]  ;;  %v3669_v4 = vsel %vm5512_vm8, %v3664_v3, %v3668_v0  ;;  %v3700_v3 = vshll.u32 %v3424_v34, 16 }
 0x2c9   : > { %2770 = vrot.lane.b32.xlu0 %v2587_v51, %s5408_s16  ;;  %5346 = vst [vmem:[%s6721_s10 + $0x20] sm:$0xff] %v5286_v33   ;;  %v5115_v9 = vor.u32 %v5247_v13, %v5114_v12  ;;  %v2605_v51 = vor.u32 %v2604_v30, %v2600_v40  ;;  %v2333_v12 = vld [vmem:[#allocation2 + $0x90] sm:$0xf]  ;;  %v3218_v13 = vld [vmem:[#allocation2 + $0x88] sm:$0xf]  ;;  %v2595_v43 = vor.u32 %v2594_v46, %v2591_v27 }
 0x2ca   : > { %3178 = vst.msk [vmem:[#allocation3 + $0x60] sm:$0xf] %vm3165_vm7, %v3094_v62  ;;  %v3029_v62 = vrot.slane %v2892_v26, 5  ;;  %v2613_v47 = vshrl.u32 %v2333_v12, 16 }
 0x2cb   : > { %v3851_v58 = vpop.permute.xlu0 %3850  ;;  %3372 = vst.msk [vmem:[#allocation3 + $0x60] sm:$0xf] %vm3359_vm9, %v3288_v39  ;;  %4594 = vmatmul.bf16.vlgmr.msrb.gmra.mxu3 %v5115_v9  ;;  %v2596_v2 = vrot.slane %v2595_v43, 4 }
 0x2cc   : > { %3933 = vst.msk [vmem:[#allocation3 + $0x60] sm:$0xf] %vm3920_vm10, %v7047_v10  ;;  %v4993_v10 = vrot.slane %v2888_v59, 9  ;;  %v2615_v18 = vrot.slane %v2613_v47, 4  ;;  %v3690_v59 = vshll.u32 %v3423_v36, 16 }
 0x2cd   : > { %2768 = vrot.lane.b32.xlu2 %v2577_v60, %s5408_s16  ;;  %v2610_v60 = vrot.slane %v2608_v61, 5  ;;  %v2601_v31 = vsel %vm5512_vm8, %v2596_v2, %v2600_v40  ;;  %v3219_v40 = vld [vmem:[#allocation2 + $0x90] sm:$0xf]  ;;  %v2335_v47 = vld [vmem:[#allocation2 + $0x98] sm:$0x1] }
 0x2ce   : > { %3886 = vrot.lane.b32.xlu1 %v3823_v49, %s5411_s23  ;;  %v3023_v22 = vsel %vm5504_vm5, %v4993_v10, %v3022_v15  ;;  %v7124_v49 = vpop.f32.mrf.mxu2  ;;  %v2616_v15 = vshll.u32 %v2333_v12, 16  ;;  %v3220_v10 = vld [vmem:[#allocation2 + $0x94] sm:$0xf]  ;;  %v2896_v12 = vld [vmem:[#allocation2 + $0x98] sm:$0x1] }
 0x2cf   : > { %v7098_v11 = vpop.permute.xlu2 %3878  ;;  %v3039_v2 = vrot.slane %v2896_v12, 5 }
 0x2d0   : > { %v3290_v5 = vpop.permute.xlu1 %3289  ;;  %v2618_v52 = vrot.slane %v2616_v15, 5 }
 0x2d1   : > { %3299 = vrot.lane.b32.xlu0 %v3217_v29, %s5410_s22  ;;  %3373 = vst.msk [vmem:[#allocation3 + $0x68] sm:$0xf] %vm3359_vm9, %v3290_v5  ;;  %v3422_v29 = vld [vmem:[#allocation2 + $0x90] sm:$0xf]  ;;  %v2893_v5 = vld [vmem:[#allocation2 + $0x8c] sm:$0x1] }
 0x2d2   : > { %3934 = vst.msk [vmem:[#allocation3 + $0x68] sm:$0xf] %vm3920_vm10, %v3851_v58  ;;  %v2606_v58 = vrot.slane %v2605_v51, 4  ;;  %v3681_v54 = vshrl.u32 %v3422_v29, 16  ;;  %v3684_v14 = vshll.u32 %v3422_v29, 16  ;;  %v2619_v20 = vor.u32 %v2618_v52, %v2615_v18 }
 0x2d3   : > { %v3122_v23 = vpop.permute.xlu0 %3121  ;;  %v5066_v42 = vld [vmem:[#allocation3 + $0x60] sm:$0xf]  ;;  %v3032_v1 = vrot.slane %v2893_v5, 5  ;;  %v3702_v51 = vrot.slane %v3700_v3, 5  ;;  %v3221_v3 = vld [vmem:[#allocation2 + $0x9c] sm:$0xf] }
 0x2d4   : > { %v2611_v7 = vsel %vm5512_vm8, %v2606_v58, %v2610_v60  ;;  %v3683_v6 = vrot.slane %v3681_v54, 4  ;;  %v2620_v30 = vrot.slane %v2619_v20, 4  ;;  %v3708_v60 = vshll.u32 %v3425_v50, 16 }
 0x2d5   : > { %3107 = vrot.lane.b32.xlu2 %v3026_v35, %s5409_s17  ;;  %v3031_v35 = vrot.slane %v3029_v62, 4 }
 0x2d6   : > { %3105 = vrot.lane.b32.xlu1 %v3023_v22, %s5409_s17  ;;  %v7143_v41 = vpop.f32.mrf.mxu2  ;;  %v3686_v22 = vrot.slane %v3684_v14, 5  ;;  %v3710_v37 = vrot.slane %v3708_v60, 5 }
 0x2d7   : > { %v3098_v39 = vpop.permute.xlu2 %3097  ;;  %v3033_v57 = vsel %vm5504_vm5, %v3031_v35, %v3032_v1 }
 0x2d8   : > { %v2785_v45 = vpop.permute.xlu1 %2784  ;;  %v3687_v46 = vor.u32 %v3686_v22, %v3683_v6 }
 0x2d9   : > { %3862 = vrot.lane.b32.xlu0 %v3679_v44, %s5411_s23  ;;  %2855 = vst.msk [vmem:[#allocation3 + $0xd0] sm:$0xf] %vm2828_vm6, %v2785_v45  ;;  %v5235_v53 = vld [vmem:[#allocation3 + $0x64] sm:$0xf0]  ;;  %v2895_v45 = vld [vmem:[#allocation2 + $0x94] sm:$0xf] }
 0x2da   : > { %3192 = vst.msk [vmem:[#allocation3 + $0xd0] sm:$0xf] %vm3165_vm7, %v3122_v23  ;;  %v5067_v56 = vor.u32 %v5235_v53, %v5066_v42  ;;  %v3692_v23 = vrot.slane %v3690_v59, 5  ;;  %v3705_v53 = vshrl.u32 %v3425_v50, 16  ;;  %v3036_v61 = vrot.slane %v2895_v45, 5 }
 0x2db   : > { %v3318_v33 = vpop.permute.xlu0 %3317  ;;  %3386 = vst.msk [vmem:[#allocation3 + $0xd0] sm:$0xf] %vm3359_vm9, %v7079_v16  ;;  %v3030_v16 = vsel %vm5504_vm5, %v4994_v63, %v3029_v62  ;;  %v3688_v43 = vrot.slane %v3687_v46, 4  ;;  %v2632_v59 = vshll.u32 %v2335_v47, 16 }
 0x2dc   : > { %4564 = vmatmul.bf16.gmra.mxu1 %v5067_v56  ;;  %v3697_v44 = vor.u32 %v3696_v17, %v3692_v23  ;;  %v3038_v36 = vrot.slane %v3036_v61, 4  ;;  %v3707_v29 = vrot.slane %v3705_v53, 4 }
 0x2dd   : > { %3860 = vrot.lane.b32.xlu2 %v3669_v4, %s5411_s23  ;;  %v3693_v18 = vsel %vm5512_vm8, %v3688_v43, %v3692_v23 }
 0x2de   : > { %3301 = vrot.lane.b32.xlu1 %v3218_v13, %s5410_s22  ;;  %v7155_v15 = vpop.f32.mrf.mxu2 }
 0x2df   : > { %v7122_v9 = vpop.permute.xlu2 %3293 }
 0x2e0   : > { %v3124_v0 = vpop.permute.xlu1 %3123 }
 0x2e1   : > { %3109 = vrot.lane.b32.xlu0 %v3030_v16, %s5409_s17  ;;  %3193 = vst.msk [vmem:[#allocation3 + $0xd8] sm:$0xf] %vm3165_vm7, %v3124_v0 }
 0x2e2   : > { %3387 = vst.msk [vmem:[#allocation3 + $0xd8] sm:$0xf] %vm3359_vm9, %v3318_v33  ;;  %v3698_v33 = vrot.slane %v3697_v44, 4  ;;  %v3427_v44 = vld [vmem:[#allocation2 + $0xa4] sm:$0x1] }
 0x2e3   : > { %v2761_v48 = vpop.permute.xlu0 %2760  ;;  %3948 = vst.msk [vmem:[#allocation3 + $0xd8] sm:$0xf] %vm3920_vm10, %v7098_v11  ;;  %v2334_v11 = vld [vmem:[#allocation2 + $0x94] sm:$0xf] }
 0x2e4   : > { %2843 = vst.msk [vmem:[#allocation3 + $0x70] sm:$0xf] %vm2828_vm6, %v2761_v48  ;;  %v2622_v55 = vshll.u32 %v2334_v11, 16  ;;  %v2626_v27 = vshrl.u32 %v2334_v11, 16  ;;  %v3703_v0 = vsel %vm5512_vm8, %v3698_v33, %v3702_v51  ;;  %v2894_v48 = vld [vmem:[#allocation2 + $0x90] sm:$0xe] }
 0x2e5   : > { %2774 = vrot.lane.b32.xlu2 %v2611_v7, %s5408_s16  ;;  %3180 = vst.msk [vmem:[#allocation3 + $0x70] sm:$0xf] %vm3165_vm7, %v3098_v39  ;;  %v3426_v7 = vld [vmem:[#allocation2 + $0xa0] sm:$0xf]  ;;  %v4995_v54 = vrot.slane %v2894_v48, 9  ;;  %v2634_v11 = vrot.slane %v2632_v59, 5 }
 0x2e6   : > { %2772 = vrot.lane.b32.xlu1 %v2601_v31, %s5408_s16  ;;  %v2624_v26 = vrot.slane %v2622_v55, 5  ;;  %v2628_v58 = vrot.slane %v2626_v27, 4  ;;  %v3040_v31 = vsel %vm5504_vm5, %v3038_v36, %v3039_v2  ;;  %v3714_v14 = vshll.u32 %v3426_v7, 16 }
 0x2e7   : > { %v2789_v24 = vpop.permute.xlu2 %2788  ;;  %v3037_v23 = vsel %vm5504_vm5, %v4995_v54, %v3036_v61  ;;  %v3718_v1 = vshrl.u32 %v3426_v7, 16 }
 0x2e8   : > { %2857 = vst.msk [vmem:[#allocation3 + $0xe0] sm:$0xf] %vm2828_vm6, %v2789_v24  ;;  %v3877_v8 = vpop.permute.xlu1 %3876  ;;  %v2625_v56 = vsel %vm5512_vm8, %v2620_v30, %v2624_v26  ;;  %v2629_v52 = vor.u32 %v2628_v58, %v2624_v26  ;;  %v3716_v17 = vrot.slane %v3714_v14, 5  ;;  %v3222_v30 = vld [vmem:[#allocation2 + $0xa0] sm:$0xf]  ;;  %v3724_v26 = vshll.u32 %v3427_v44, 16 }
 0x2e9   : > { %3305 = vrot.lane.b32.xlu0 %v3220_v10, %s5410_s22  ;;  %3947 = vst.msk [vmem:[#allocation3 + $0xd0] sm:$0xf] %vm3920_vm10, %v3877_v8  ;;  %v3711_v10 = vor.u32 %v3710_v37, %v3707_v29  ;;  %v7175_v8 = vpop.f32.mrf.mxu2 }
 0x2ea   : > { %v5249_v62 = vld [vmem:[#allocation3 + $0xd4] sm:$0xf0]  ;;  %v2630_v5 = vrot.slane %v2629_v52, 4  ;;  %v3726_v51 = vrot.slane %v3724_v26, 5  ;;  %v3998_v26 = vld [vmem:[#allocation2 + $0xcc] sm:$0xe] }
 0x2eb   : > { %v3100_v39 = vpop.permute.xlu0 %3099  ;;  %v3712_v34 = vrot.slane %v3711_v10, 4 }
 0x2ec   : > { %v2635_v35 = vsel %vm5512_vm8, %v2630_v5, %v2634_v11 }
 0x2ed   : > { %3303 = vrot.lane.b32.xlu2 %v3219_v40, %s5410_s22  ;;  %v3717_v6 = vsel %vm5512_vm8, %v3712_v34, %v3716_v17 }
 0x2ee   : > { %3111 = vrot.lane.b32.xlu1 %v3033_v57, %s5409_s17 }
 0x2ef   : > { %v3128_v42 = vpop.permute.xlu2 %3127 }
 0x2f0   : > { %v2763_v4 = vpop.permute.xlu1 %2762  ;;  %v5122_v63 = vld [vmem:[#allocation3 + $0xd0] sm:$0xf] }
 0x2f1   : > { %2776 = vrot.lane.b32.xlu0 %v2625_v56, %s5408_s16  ;;  %2844 = vst.msk [vmem:[#allocation3 + $0x78] sm:$0xf] %vm2828_vm6, %v2763_v4  ;;  %v5123_v13 = vor.u32 %v5249_v62, %v5122_v63  ;;  %v7187_v57 = vpop.f32.mrf.mxu2 }
 0x2f2   : > { %3181 = vst.msk [vmem:[#allocation3 + $0x78] sm:$0xf] %vm3165_vm7, %v3100_v39  ;;  %v3720_v39 = vrot.slane %v3718_v1, 4 }
 0x2f3   : > { %v3853_v16 = vpop.permute.xlu0 %3852  ;;  %3375 = vst.msk [vmem:[#allocation3 + $0x78] sm:$0xf] %vm3359_vm9, %v7122_v9  ;;  %4599 = vmatmul.bf16.gmra.mxu3 %v5123_v13 }
 0x2f4   : > { %v3721_v50 = vor.u32 %v3720_v39, %v3716_v17 }
 0x2f5   : > { %3866 = vrot.lane.b32.xlu2 %v3703_v0, %s5411_s23 }
 0x2f6   : > { %3864 = vrot.lane.b32.xlu1 %v3693_v18, %s5411_s23  ;;  %v3722_v56 = vrot.slane %v3721_v50, 4 }
 0x2f7   : > { %v3881_v9 = vpop.permute.xlu2 %3880 }
 0x2f8   : > { %v3292_v24 = vpop.permute.xlu1 %3291  ;;  %v3727_v61 = vsel %vm5512_vm8, %v3722_v56, %v3726_v51 }
 0x2f9   : > { %3115 = vrot.lane.b32.xlu0 %v3040_v31, %s5409_s17  ;;  %3374 = vst.msk [vmem:[#allocation3 + $0x70] sm:$0xf] %vm3359_vm9, %v3292_v24  ;;  %v7195_v62 = vpop.f32.mrf.mxu2 }
 0x2fa   : > { %3935 = vst.msk [vmem:[#allocation3 + $0x70] sm:$0xf] %vm3920_vm10, %v3853_v16 }
 0x2fb   : > { %v2791_v20 = vpop.permute.xlu0 %2790 }
 0x2fc   : > { %2858 = vst.msk [vmem:[#allocation3 + $0xe8] sm:$0xf] %vm2828_vm6, %v2791_v20 }
 0x2fd   : > { %3195 = vst.msk [vmem:[#allocation3 + $0xe8] sm:$0xf] %vm3165_vm7, %v3128_v42  ;;  %3113 = vrot.lane.b32.xlu2 %v3037_v23, %s5409_s17 }
 0x2fe   : > { %2778 = vrot.lane.b32.xlu1 %v2635_v35, %s5408_s16 }
 0x2ff   : > { %v2767_v55 = vpop.permute.xlu2 %2766 }
 0x300   : > { %2846 = vst.msk [vmem:[#allocation3 + $0x88] sm:$0xf] %vm2828_vm6, %v2767_v55  ;;  %v3855_v22 = vpop.permute.xlu1 %3854 }
 0x301   : > { %3868 = vrot.lane.b32.xlu0 %v3717_v6, %s5411_s23  ;;  %3936 = vst.msk [vmem:[#allocation3 + $0x78] sm:$0xf] %vm3920_vm10, %v3855_v22  ;;  %v5074_v46 = vld [vmem:[#allocation3 + $0x70] sm:$0xf]  ;;  %v7201_v47 = vpop.f32.mrf.mxu2 }
 0x303   : > { %v3320_v40 = vpop.permute.xlu0 %3319 }
 0x305   : > { %3309 = vrot.lane.b32.xlu2 %v3222_v30, %s5410_s22 }
 0x306   : > { %3307 = vrot.lane.b32.xlu1 %v3221_v3, %s5410_s22 }
 0x307   : > { %v3296_v45 = vpop.permute.xlu2 %3295 }
 0x308   : > { %v3126_v27 = vpop.permute.xlu1 %3125  ;;  %v5237_v42 = vld [vmem:[#allocation3 + $0x74] sm:$0xf0] }
 0x309   : > { %3194 = vst.msk [vmem:[#allocation3 + $0xe0] sm:$0xf] %vm3165_vm7, %v3126_v27  ;;  %v5075_v53 = vor.u32 %v5237_v42, %v5074_v46  ;;  %v7208_v48 = vpop.f32.mrf.mxu2  ;;  %v3999_v27 = vld [vmem:[#allocation2 + $0xd0] sm:$0xf]  ;;  %v4000_v46 = vld [vmem:[#allocation2 + $0xd4] sm:$0x1] }
 0x30a   : > { %3388 = vst.msk [vmem:[#allocation3 + $0xe0] sm:$0xf] %vm3359_vm9, %v3320_v40  ;;  %v5015_v42 = vrot.slane %v3998_v26, 9  ;;  %v4159_v56 = vrot.slane %v4000_v46, 5 }
 0x30b   : > { %v3883_v33 = vpop.permute.xlu0 %3882  ;;  %3949 = vst.msk [vmem:[#allocation3 + $0xe0] sm:$0xf] %vm3920_vm10, %v3881_v9  ;;  %4569 = vmatmul.bf16.gmra.mxu1 %v5075_v53  ;;  %v4156_v53 = vrot.slane %v3999_v27, 5 }
 0x30d   : > { %v4158_v51 = vrot.slane %v4156_v53, 4 }
 0x30e   : > { %3870 = vrot.lane.b32.xlu1 %v3727_v61, %s5411_s23 }
 0x30f   : > { %v3859_v4 = vpop.permute.xlu2 %3858 }
 0x310   : > { %v3322_v63 = vpop.permute.xlu1 %3321 }
 0x311   : > { %3389 = vst.msk [vmem:[#allocation3 + $0xe8] sm:$0xf] %vm3359_vm9, %v3322_v63  ;;  %v7213_v59 = vpop.f32.mrf.mxu2  ;;  %v4160_v63 = vsel %vm5504_vm5, %v4158_v51, %v4159_v56 }
 0x312   : > { %3950 = vst.msk [vmem:[#allocation3 + $0xe8] sm:$0xf] %vm3920_vm10, %v3883_v33  ;;  %v5130_v58 = vld [vmem:[#allocation3 + $0xe0] sm:$0xf]  ;;  %v4157_v33 = vsel %vm5504_vm5, %v5015_v42, %v4156_v53 }
 0x313   : > { %v3102_v12 = vpop.permute.xlu0 %3101  ;;  %4223 = vst.msk [vmem:[#allocation3 + $0xf4] sm:$0xf] %vm592_vm1, %v4157_v33 }
 0x314   : > { %4224 = vst.msk [vmem:[#allocation3 + $0xfc] sm:$0xf] %vm592_vm1, %v4160_v63 }
 0x317   : > { %v3130_v13 = vpop.permute.xlu2 %3129 }
 0x318   : > { %v2765_v43 = vpop.permute.xlu1 %2764 }
 0x319   : > { %2845 = vst.msk [vmem:[#allocation3 + $0x80] sm:$0xf] %vm2828_vm6, %v2765_v43  ;;  %v5251_v60 = vld [vmem:[#allocation3 + $0xe4] sm:$0xf0]  ;;  %v7222_v35 = vpop.f32.mrf.mxu2 }
 0x31a   : > { %3182 = vst.msk [vmem:[#allocation3 + $0x80] sm:$0xf] %vm3165_vm7, %v3102_v12  ;;  %v5131_v32 = vor.u32 %v5251_v60, %v5130_v58 }
 0x31b   : > { %v3298_v16 = vpop.permute.xlu0 %3297  ;;  %3376 = vst.msk [vmem:[#allocation3 + $0x80] sm:$0xf] %vm3359_vm9, %v3296_v45 }
 0x31c   : > { %4604 = vmatmul.bf16.gmra.mxu3 %v5131_v32 }
 0x31f   : > { %v3326_v0 = vpop.permute.xlu2 %3325 }
 0x320   : > { %v3104_v36 = vpop.permute.xlu1 %3103 }
 0x321   : > { %3183 = vst.msk [vmem:[#allocation3 + $0x88] sm:$0xf] %vm3165_vm7, %v3104_v36  ;;  %v7231_v30 = vpop.f32.mrf.mxu2  ;;  %v5132_v36 = vld [vmem:[#allocation3 + $0xe8] sm:$0xf0] }
 0x322   : > { %3377 = vst.msk [vmem:[#allocation3 + $0x88] sm:$0xf] %vm3359_vm9, %v3298_v16 }
 0x323   : > { %v2793_v2 = vpop.permute.xlu0 %2792  ;;  %3938 = vst.msk [vmem:[#allocation3 + $0x88] sm:$0xf] %vm3920_vm10, %v3859_v4 }
 0x324   : > { %2859 = vst.msk [vmem:[#allocation3 + $0xf0] sm:$0xf] %vm2828_vm6, %v2793_v2 }
 0x325   : > { %3196 = vst.msk [vmem:[#allocation3 + $0xf0] sm:$0xf] %vm3165_vm7, %v3130_v13 }
 0x327   : > { %v2769_v7 = vpop.permute.xlu2 %2768 }
 0x328   : > { %2847 = vst.msk [vmem:[#allocation3 + $0x90] sm:$0xf] %vm2828_vm6, %v2769_v7  ;;  %v3857_v29 = vpop.permute.xlu1 %3856 }
 0x329   : > { %3937 = vst.msk [vmem:[#allocation3 + $0x80] sm:$0xf] %vm3920_vm10, %v3857_v29  ;;  %v4684_v61 = vpop.f32.mrf.mxu2 }
 0x32a   : > { %v5239_v54 = vld [vmem:[#allocation3 + $0x84] sm:$0xf0] }
 0x32b   : > { %v3132_v18 = vpop.permute.xlu0 %3131 }
 0x32f   : > { %v3108_v52 = vpop.permute.xlu2 %3107 }
 0x330   : > { %v2795_v37 = vpop.permute.xlu1 %2794  ;;  %v4560_v9 = vpop.f32.mrf.mxu1  ;;  %v5082_v31 = vld [vmem:[#allocation3 + $0x80] sm:$0xf] }
 0x331   : > { %2860 = vst.msk [vmem:[#allocation3 + $0xf8] sm:$0xf] %vm2828_vm6, %v2795_v37  ;;  %v5083_v14 = vor.u32 %v5239_v54, %v5082_v31  ;;  %v4561_v5 = vadd.f32 %v7016_v25, %v4560_v9  ;;  %v4686_v2 = vpop.f32.mrf.mxu2 }
 0x332   : > { %3197 = vst.msk [vmem:[#allocation3 + $0xf8] sm:$0xf] %vm3165_vm7, %v3132_v18 }
 0x333   : > { %v3885_v24 = vpop.permute.xlu0 %3884  ;;  %3391 = vst.msk [vmem:[#allocation3 + $0xf8] sm:$0xf] %vm3359_vm9, %v3326_v0  ;;  %4574 = vmatmul.bf16.gmra.mxu1 %v5083_v14  ;;  %v4650_v23 = vadd.f32 %v7072_v19, %v4561_v5  ;;  %v5250_v0 = vld [vmem:[#allocation3 + $0xe4] sm:$0xf] }
 0x334   : > { %v5135_v9 = vor.u32 %v5250_v0, %v5132_v36  ;;  %v7275_v36 = vld [vmem:[%s7315_s4] ss:$0 sm:$0xff] }
 0x335   : > { %v4714_v55 = vmax.f32 %v4650_v23, 0.0 }
 0x337   : > { %v3861_v11 = vpop.permute.xlu2 %3860 }
 0x338   : > { %v3324_v10 = vpop.permute.xlu1 %3323  ;;  %v4562_v20 = vpop.f32.mrf.mxu1 }
 0x339   : > { %3390 = vst.msk [vmem:[#allocation3 + $0xf0] sm:$0xf] %vm3359_vm9, %v3324_v10  ;;  %v4563_v17 = vadd.f32 %v7016_v25, %v4562_v20  ;;  %v4689_v27 = vpop.f32.mrf.mxu2 }
 0x33a   : > { %3951 = vst.msk [vmem:[#allocation3 + $0xf0] sm:$0xf] %vm3920_vm10, %v3885_v24 }
 0x33b   : > { %v2771_v34 = vpop.permute.xlu0 %2770  ;;  %v4652_v1 = vadd.f32 %v7091_v38, %v4563_v17 }
 0x33c   : > { %2848 = vst.msk [vmem:[#allocation3 + $0x98] sm:$0xf] %vm2828_vm6, %v2771_v34 }
 0x33d   : > { %3185 = vst.msk [vmem:[#allocation3 + $0x98] sm:$0xf] %vm3165_vm7, %v3108_v52  ;;  %v4715_v6 = vmax.f32 %v4652_v1, 0.0 }
 0x33f   : > { %v2775_v22 = vpop.permute.xlu2 %2774  ;;  %v5291_v39 = vpack.c.bf16 %v4715_v6, %v4714_v55  ;;  %v5252_v6 = vld [vmem:[#allocation3 + $0xf4] sm:$0xf] }
 0x340   : > { %2850 = vst.msk [vmem:[#allocation3 + $0xa8] sm:$0xf] %vm2828_vm6, %v2775_v22  ;;  %v3887_v19 = vpop.permute.xlu1 %3886  ;;  %v5140_v22 = vld [vmem:[#allocation3 + $0xf8] sm:$0xf0] }
 0x341   : > { %5347 = vst [vmem:[%s6721_s10 + $0x28] sm:$0xff] %v5291_v39   ;;  %v5138_v44 = vld [vmem:[#allocation3 + $0xf0] sm:$0xf] }
 0x342   : > { %3952 = vst.msk [vmem:[#allocation3 + $0xf8] sm:$0xf] %vm3920_vm10, %v3887_v19 }
 0x343   : > { %v3300_v40 = vpop.permute.xlu0 %3299 }
 0x347   : > { %v3304_v12 = vpop.permute.xlu2 %3303 }
 0x348   : > { %v3106_v3 = vpop.permute.xlu1 %3105 }
 0x349   : > { %3184 = vst.msk [vmem:[#allocation3 + $0x90] sm:$0xf] %vm3165_vm7, %v3106_v3  ;;  %v5253_v38 = vld [vmem:[#allocation3 + $0xf4] sm:$0xf0] }
 0x34a   : > { %3378 = vst.msk [vmem:[#allocation3 + $0x90] sm:$0xf] %vm3359_vm9, %v3300_v40  ;;  %v5139_v50 = vor.u32 %v5253_v38, %v5138_v44  ;;  %v5143_v44 = vor.u32 %v5252_v6, %v5140_v22 }
 0x34b   : > { %v3863_v45 = vpop.permute.xlu0 %3862  ;;  %3939 = vst.msk [vmem:[#allocation3 + $0x90] sm:$0xf] %vm3920_vm10, %v3861_v11 }
 0x34c   : > { %4609 = vmatmul.bf16.gmra.mxu3 %v5139_v50 }
 0x34e   : > { %v4595_v4 = vpop.f32.mrf.mxu3 }
 0x34f   : > { %v4596_v58 = vadd.f32 %v7016_v25, %v4595_v4  ;;  %v3867_v37 = vpop.permute.xlu2 %3866  ;;  %v4691_v4 = vpop.f32.mrf.mxu2 }
 0x350   : > { %v3302_v13 = vpop.permute.xlu1 %3301 }
 0x351   : > { %3379 = vst.msk [vmem:[#allocation3 + $0x98] sm:$0xf] %vm3359_vm9, %v3302_v13  ;;  %v4685_v32 = vadd.f32 %v4684_v61, %v4596_v58 }
 0x352   : > { %3940 = vst.msk [vmem:[#allocation3 + $0x98] sm:$0xf] %vm3920_vm10, %v3863_v45  ;;  %v5090_v18 = vld [vmem:[#allocation3 + $0x90] sm:$0xf] }
 0x353   : > { %v3110_v43 = vpop.permute.xlu0 %3109  ;;  %v4728_v14 = vmax.f32 %v4685_v32, 0.0 }
 0x356   : > { %v4597_v60 = vpop.f32.mrf.mxu3 }
 0x357   : > { %v4598_v16 = vadd.f32 %v7016_v25, %v4597_v60  ;;  %v3114_v1 = vpop.permute.xlu2 %3113 }
 0x358   : > { %v2773_v21 = vpop.permute.xlu1 %2772 }
 0x359   : > { %v4687_v7 = vadd.f32 %v4686_v2, %v4598_v16  ;;  %2849 = vst.msk [vmem:[#allocation3 + $0xa0] sm:$0xf] %vm2828_vm6, %v2773_v21  ;;  %v4565_v29 = vpop.f32.mrf.mxu1  ;;  %v5241_v52 = vld [vmem:[#allocation3 + $0x94] sm:$0xf0] }
 0x35a   : > { %3186 = vst.msk [vmem:[#allocation3 + $0xa0] sm:$0xf] %vm3165_vm7, %v3110_v43  ;;  %v5091_v31 = vor.u32 %v5241_v52, %v5090_v18  ;;  %v4566_v11 = vadd.f32 %v7016_v25, %v4565_v29 }
 0x35b   : > { %v3306_v54 = vpop.permute.xlu0 %3305  ;;  %v4729_v24 = vmax.f32 %v4687_v7, 0.0  ;;  %3380 = vst.msk [vmem:[#allocation3 + $0xa0] sm:$0xf] %vm3359_vm9, %v3304_v12 }
 0x35c   : > { %5194 = vmatmul.msk.bf16.vlgmr.msra.gmra.mxu3 %vm4477_vm0, %v5135_v9  ;;  %4579 = vmatmul.bf16.gmra.mxu1 %v5091_v31  ;;  %v4655_v23 = vadd.f32 %v7106_v28, %v4566_v11 }
 0x35d   : > { %v5326_v5 = vpack.c.bf16 %v4729_v24, %v4728_v14 }
 0x35e   : > { %v4716_v39 = vmax.f32 %v4655_v23, 0.0 }
 0x35f   : > { %5354 = vst [vmem:[%s6721_s10 + $0x60] sm:$0xff] %v5326_v5   ;;  %v3310_v26 = vpop.permute.xlu2 %3309 }
 0x360   : > { %v3112_v10 = vpop.permute.xlu1 %3111 }
 0x361   : > { %3187 = vst.msk [vmem:[#allocation3 + $0xa8] sm:$0xf] %vm3165_vm7, %v3112_v10  ;;  %v4567_v20 = vpop.f32.mrf.mxu1 }
 0x362   : > { %3381 = vst.msk [vmem:[#allocation3 + $0xa8] sm:$0xf] %vm3359_vm9, %v3306_v54  ;;  %v4568_v17 = vadd.f32 %v7016_v25, %v4567_v20 }
 0x363   : > { %v2777_v34 = vpop.permute.xlu0 %2776  ;;  %3942 = vst.msk [vmem:[#allocation3 + $0xa8] sm:$0xf] %vm3920_vm10, %v3867_v37 }
 0x364   : > { %v4657_v55 = vadd.f32 %v7124_v49, %v4568_v17  ;;  %2851 = vst.msk [vmem:[#allocation3 + $0xb0] sm:$0xf] %vm2828_vm6, %v2777_v34 }
 0x365   : > { %3188 = vst.msk [vmem:[#allocation3 + $0xb0] sm:$0xf] %vm3165_vm7, %v3114_v1 }
 0x366   : > { %v4717_v19 = vmax.f32 %v4657_v55, 0.0 }
 0x368   : > { %v5296_v28 = vpack.c.bf16 %v4717_v19, %v4716_v39  ;;  %v3865_v40 = vpop.permute.xlu1 %3864 }
 0x369   : > { %3941 = vst.msk [vmem:[#allocation3 + $0xa0] sm:$0xf] %vm3920_vm10, %v3865_v40 }
 0x36a   : > { %5348 = vst [vmem:[%s6721_s10 + $0x30] sm:$0xff] %v5296_v28   ;;  %v5243_v49 = vld [vmem:[#allocation3 + $0xa4] sm:$0xf0] }
 0x36b   : > { %v3116_v3 = vpop.permute.xlu0 %3115 }
 0x36c   : > { %5195 = vmatmul.msk.bf16.gmra.mxu3 %vm4477_vm0, %v5143_v44 }
 0x370   : > { %v2779_v38 = vpop.permute.xlu1 %2778  ;;  %v5098_v50 = vld [vmem:[#allocation3 + $0xa0] sm:$0xf] }
 0x371   : > { %2852 = vst.msk [vmem:[#allocation3 + $0xb8] sm:$0xf] %vm2828_vm6, %v2779_v38  ;;  %v5099_v45 = vor.u32 %v5243_v49, %v5098_v50 }
 0x372   : > { %3189 = vst.msk [vmem:[#allocation3 + $0xb8] sm:$0xf] %vm3165_vm7, %v3116_v3 }
 0x373   : > { %3383 = vst.msk [vmem:[#allocation3 + $0xb8] sm:$0xf] %vm3359_vm9, %v3310_v26  ;;  %4584 = vmatmul.bf16.gmra.mxu1 %v5099_v45  ;;  %v3869_v53 = vpop.permute.xlu0 %3868 }
 0x376   : > { %v4600_v46 = vpop.f32.mrf.mxu3 }
 0x377   : > { %v4601_v56 = vadd.f32 %v7016_v25, %v4600_v46 }
 0x378   : > { %v3308_v42 = vpop.permute.xlu1 %3307 }
 0x379   : > { %3382 = vst.msk [vmem:[#allocation3 + $0xb0] sm:$0xf] %vm3359_vm9, %v3308_v42  ;;  %v4690_v51 = vadd.f32 %v4689_v27, %v4601_v56 }
 0x37a   : > { %3943 = vst.msk [vmem:[#allocation3 + $0xb0] sm:$0xf] %vm3920_vm10, %v3869_v53 }
 0x37b   : > { %v4730_v13 = vmax.f32 %v4690_v51, 0.0 }
 0x37e   : > { %v4602_v33 = vpop.f32.mrf.mxu3 }
 0x37f   : > { %v4603_v61 = vadd.f32 %v7016_v25, %v4602_v33 }
 0x380   : > { %v3871_v63 = vpop.permute.xlu1 %3870 }
 0x381   : > { %v4692_v12 = vadd.f32 %v4691_v4, %v4603_v61  ;;  %3944 = vst.msk [vmem:[#allocation3 + $0xb8] sm:$0xf] %vm3920_vm10, %v3871_v63  ;;  %v5106_v32 = vld [vmem:[#allocation3 + $0xb0] sm:$0xf] }
 0x383   : > { %v4731_v43 = vmax.f32 %v4692_v12, 0.0 }
 0x385   : > { %v5331_v58 = vpack.c.bf16 %v4731_v43, %v4730_v13 }
 0x387   : > { %5355 = vst [vmem:[%s6721_s10 + $0x68] sm:$0xff] %v5331_v58  }
 0x388   : > { %v4570_v60 = vpop.f32.mrf.mxu1  ;;  %v5245_v16 = vld [vmem:[#allocation3 + $0xb4] sm:$0xf0] }
 0x389   : > { %v5107_v0 = vor.u32 %v5245_v16, %v5106_v32  ;;  %v4571_v25 = vadd.f32 %v7275_v36, %v4570_v60 }
 0x38b   : > { %4589 = vmatmul.bf16.gmra.mxu1 %v5107_v0  ;;  %v4660_v21 = vadd.f32 %v7143_v41, %v4571_v25 }
 0x38d   : > { %v4718_v18 = vmax.f32 %v4660_v21, 0.0 }
 0x390   : > { %v4572_v2 = vpop.f32.mrf.mxu1 }
 0x391   : > { %v4573_v7 = vadd.f32 %v7275_v36, %v4572_v2 }
 0x393   : > { %v4662_v29 = vadd.f32 %v7155_v15, %v4573_v7 }
 0x395   : > { %v4719_v52 = vmax.f32 %v4662_v29, 0.0 }
 0x397   : > { %v5301_v37 = vpack.c.bf16 %v4719_v52, %v4718_v18 }
 0x399   : > { %5349 = vst [vmem:[%s6721_s10 + $0x38] sm:$0xff] %v5301_v37  }
 0x39f   : > { %v4605_v41 = vpop.f32.mrf.mxu3 }
 0x3a7   : > { %v4607_v15 = vpop.f32.mrf.mxu3 }
 0x3a8   : > { %v4608_v19 = vadd.f32 %v7275_v36, %v4607_v15 }
 0x3b0   : > { %v4575_v9 = vpop.f32.mrf.mxu1 }
 0x3b1   : > { %v4576_v31 = vadd.f32 %v7275_v36, %v4575_v9 }
 0x3b3   : > { %v4665_v14 = vadd.f32 %v7175_v8, %v4576_v31 }
 0x3b5   : > { %v4720_v11 = vmax.f32 %v4665_v14, 0.0 }
 0x3b8   : > { %v4577_v54 = vpop.f32.mrf.mxu1 }
 0x3b9   : > { %v4578_v24 = vadd.f32 %v7275_v36, %v4577_v54 }
 0x3bb   : > { %v4667_v5 = vadd.f32 %v7187_v57, %v4578_v24  ;;  %v4606_v57 = vadd.f32 %v7275_v36, %v4605_v41 }
 0x3bd   : > { %v4721_v10 = vmax.f32 %v4667_v5, 0.0 }
 0x3bf   : > { %v5306_v20 = vpack.c.bf16 %v4721_v10, %v4720_v11 }
 0x3c1   : > { %5350 = vst [vmem:[%s6721_s10 + $0x40] sm:$0xff] %v5306_v20  }
 0x3cf   : > { %v4610_v23 = vpop.f32.mrf.mxu3 }
 0x3d0   : > { %v4611_v46 = vadd.f32 %v7275_v36, %v4610_v23 }
 0x3d7   : > { %v4612_v17 = vpop.f32.mrf.mxu3 }
 0x3d8   : > { %v4613_v42 = vadd.f32 %v7275_v36, %v4612_v17 }
 0x3d9   : > { %v4580_v34 = vpop.f32.mrf.mxu1 }
 0x3da   : > { %v4581_v1 = vadd.f32 %v7275_v36, %v4580_v34 }
 0x3dc   : > { %v4670_v8 = vadd.f32 %v7195_v62, %v4581_v1 }
 0x3de   : > { %v4722_v28 = vmax.f32 %v4670_v8, 0.0 }
 0x3df   : > { %v4694_v55 = vpop.f32.mrf.mxu3 }
 0x3e0   : > { %v4695_v40 = vadd.f32 %v4694_v55, %v4606_v57 }
 0x3e1   : > { %v4582_v6 = vpop.f32.mrf.mxu1 }
 0x3e2   : > { %v4583_v22 = vadd.f32 %v7275_v36, %v4582_v6  ;;  %v4732_v49 = vmax.f32 %v4695_v40, 0.0 }
 0x3e4   : > { %v4672_v39 = vadd.f32 %v7201_v47, %v4583_v22 }
 0x3e6   : > { %v4723_v44 = vmax.f32 %v4672_v39, 0.0 }
 0x3e7   : > { %v4696_v3 = vpop.f32.mrf.mxu3 }
 0x3e8   : > { %v5311_v38 = vpack.c.bf16 %v4723_v44, %v4722_v28  ;;  %v4697_v50 = vadd.f32 %v4696_v3, %v4608_v19 }
 0x3ea   : > { %5351 = vst [vmem:[%s6721_s10 + $0x48] sm:$0xff] %v5311_v38   ;;  %v4733_v45 = vmax.f32 %v4697_v50, 0.0 }
 0x3ec   : > { %v5336_v26 = vpack.c.bf16 %v4733_v45, %v4732_v49 }
 0x3ee   : > { %5356 = vst [vmem:[%s6721_s10 + $0x70] sm:$0xff] %v5336_v26  }
 0x3ef   : > { %v4699_v62 = vpop.f32.mrf.mxu3 }
 0x3f0   : > { %v4585_v27 = vpop.f32.mrf.mxu1  ;;  %v4700_v53 = vadd.f32 %v4699_v62, %v4611_v46 }
 0x3f1   : > { %v4586_v47 = vadd.f32 %v7275_v36, %v4585_v27 }
 0x3f2   : > { %v4734_v63 = vmax.f32 %v4700_v53, 0.0 }
 0x3f3   : > { %v4675_v61 = vadd.f32 %v7208_v48, %v4586_v47 }
 0x3f5   : > { %v4724_v58 = vmax.f32 %v4675_v61, 0.0 }
 0x3f7   : > { %v4701_v56 = vpop.f32.mrf.mxu3 }
 0x3f8   : > { %v4702_v33 = vadd.f32 %v4701_v56, %v4613_v42  ;;  %v4587_v51 = vpop.f32.mrf.mxu1 }
 0x3f9   : > { %v4588_v4 = vadd.f32 %v7275_v36, %v4587_v51 }
 0x3fa   : > { %v4735_v12 = vmax.f32 %v4702_v33, 0.0 }
 0x3fb   : > { %v4677_v13 = vadd.f32 %v7213_v59, %v4588_v4 }
 0x3fc   : > { %v5341_v43 = vpack.c.bf16 %v4735_v12, %v4734_v63 }
 0x3fd   : > { %v4725_v60 = vmax.f32 %v4677_v13, 0.0 }
 0x3fe   : > { %5357 = vst [vmem:[%s6721_s10 + $0x78] sm:$0xff] %v5341_v43  }
 0x3ff   : > { %v5316_v32 = vpack.c.bf16 %v4725_v60, %v4724_v58 }
 0x401   : > { %5352 = vst [vmem:[%s6721_s10 + $0x50] sm:$0xff] %v5316_v32  }
 0x408   : > { %v4590_v16 = vpop.f32.mrf.mxu1 }
 0x409   : > { %v4591_v0 = vadd.f32 %v7275_v36, %v4590_v16 }
 0x40b   : > { %v4680_v2 = vadd.f32 %v7222_v35, %v4591_v0 }
 0x40d   : > { %v4726_v7 = vmax.f32 %v4680_v2, 0.0 }
 0x410   : > { %v4592_v25 = vpop.f32.mrf.mxu1 }
 0x411   : > { %v4593_v48 = vadd.f32 %v7275_v36, %v4592_v25 }
 0x413   : > { %v4682_v21 = vadd.f32 %v7231_v30, %v4593_v48 }
 0x415   : > { %v4727_v29 = vmax.f32 %v4682_v21, 0.0 }
 0x417   : > { %v5321_v59 = vpack.c.bf16 %v4727_v29, %v4726_v7 }
 0x419   : > { %5353 = vst [vmem:[%s6721_s10 + $0x58] sm:$0xff] %v5321_v59  }
 0x41a PF: > { %s15_s18 = sadd.s32 1, %s5402_s18  }
 0x41b   : > { %p12_p4 = scmp.ge.s32.totalorder %s15_s18, 4  }
 0x41d   :  { %14 = sbr.rel (!%p12_p4) target bundleno = 1 (0x1), region = 73 }

</bundles_post_ra>
